<compile_context>
chip_gen: v5e
topology: v5e:2x2
jax: 0.10.0
libtpu: 0.0.40
codegen_flags: <defaults>
</compile_context>

<pallas_src>
import numpy as np
import jax
import jax.numpy as jnp
from jax.experimental import pallas as pl
from jax.experimental.pallas import tpu as pltpu


MAX_BATCH_TILE = 64     # images per grid step; sized to fit v7x (64 MiB VMEM).
                        # Safe on v5e/v6e too (raise to 128/256 there if desired).


# ------------------------------ fused kernel ---------------------------------
def _lenet_kernel(x_ref, w1_ref, b1_ref, w2_ref, b2_ref,
                  fw1_ref, fb1_ref, fw2_ref, fb2_ref, fw3_ref, fb3_ref,
                  o_ref):
    f32 = jnp.float32
    B = o_ref.shape[0]                       # batch tile

    # ---- conv1 (5x5, 1->32): ONE MXU matmul -----------------------------------
    # x_ref is (28, B, 28) = (H, b, W).  lhs rows = (oh, b); the 5 kh taps are
    # folded into the contraction (lane index = kh*28 + w_in, K = 140); the kw
    # taps / W-im2col and the W-half of the 2x2 max-pool are folded into the
    # banded weight columns (N = 768: even/odd output-column parity halves).
    slabs = [x_ref[kh:kh + 24, :, :].reshape(24 * B, 28) for kh in range(5)]
    lhs1 = jnp.concatenate(slabs, axis=-1)                         # (24B, 140)
    acc1 = jnp.dot(lhs1, w1_ref[...], preferred_element_type=f32)  # (24B, 768)
    h1 = jnp.maximum(acc1[:, :384], acc1[:, 384:])                 # W max-pool
    h1 = jnp.maximum(h1 + b1_ref[...], 0.0)                        # bias + ReLU
    h1r = h1.reshape(12, 2, B, 384)                                # (ph, r, b, .)
    p1 = jnp.maximum(h1r[:, 0], h1r[:, 1])                         # H max-pool -> (12, B, 384)

    # ---- conv2 (5x5, 32->16): ONE MXU matmul ----------------------------------
    # lanes = kh*384 + w_in*32 + c_in (K = 1920, 128-aligned concat pieces);
    # columns = even/odd parity halves of (pooled-ow, c_out) (N = 128).
    slabs2 = [p1[kh:kh + 8].reshape(8 * B, 384) for kh in range(5)]
    lhs2 = jnp.concatenate(slabs2, axis=-1)                        # (8B, 1920)
    acc2 = jnp.dot(lhs2, w2_ref[...], preferred_element_type=f32)  # (8B, 128)
    h2 = jnp.maximum(acc2[:, :64], acc2[:, 64:])                   # W max-pool
    h2 = jnp.maximum(h2 + b2_ref[...], 0.0)                        # bias + ReLU
    h2r = h2.reshape(4, 2, B, 64)
    p2 = jnp.maximum(h2r[:, 0], h2r[:, 1])                         # (4, B, 64)

    # ---- fc1 (PyTorch NCHW flatten folded into fw1), fc2, fc3 -----------------
    z = jnp.zeros((B, 32), f32)
    for h in range(4):                                             # pooled-H index
        z = z + jnp.dot(p2[h], fw1_ref[h], preferred_element_type=f32)
    z = jnp.maximum(z + fb1_ref[...], 0.0)
    z = jnp.maximum(jnp.dot(z, fw2_ref[...], preferred_element_type=f32)
                    + fb2_ref[...], 0.0)
    # fc3 weight/bias are zero-padded to 128 columns -> lane-dense output store.
    o_ref[...] = (jnp.dot(z, fw3_ref[...], preferred_element_type=f32)
                  + fb3_ref[...]).astype(o_ref.dtype)


# --------------------------------- wrapper ------------------------------------
def _round_up(n, m):
    return (n + m - 1) // m * m


def sparse_lenet_forward(x_nchw, params):
    """x_nchw: (N, 1, 28, 28) float32 -> logits (N, 10)."""
    N = x_nchw.shape[0]
    B = min(MAX_BATCH_TILE, max(8, _round_up(N, 8)))
    x = x_nchw.reshape(N, 28, 28).astype(jnp.float32)      # C == 1
    npad = _round_up(N, B)
    if npad != N:
        x = jnp.pad(x, ((0, npad - N), (0, 0), (0, 0)))
    xt = jnp.transpose(x, (1, 0, 2))                        # (28, npad, 28): H-major

    keys = ("w1", "b1", "w2", "b2", "fw1", "fb1", "fw2", "fb2", "fw3", "fb3")
    args = [params[k] for k in keys]

    def const_spec(a):
        nd = a.ndim
        return pl.BlockSpec(a.shape, lambda n, _nd=nd: (0,) * _nd)

    out = pl.pallas_call(
        _lenet_kernel,
        out_shape=jax.ShapeDtypeStruct((npad, 128), jnp.float32),  # lane-dense logits
        grid=(npad // B,),
        in_specs=[pl.BlockSpec((28, B, 28), lambda n: (0, n, 0))]
        + [const_spec(a) for a in args],
        out_specs=pl.BlockSpec((B, 128), lambda n: (n, 0)),
        compiler_params=pltpu.CompilerParams(
            dimension_semantics=("parallel",),          # megacore-shardable batch axis
            vmem_limit_bytes=48 * 1024 * 1024),         # > v5e's 16 MiB default, < v7x's 64 MiB
    )(xt, *args)
    return out[:N, :10]


# --------------------------- parameter preparation ----------------------------
def prepare_params(raw):
    """Pack PyTorch-layout parameters into the kernel's banded/fused layout."""
    w1 = np.asarray(raw["conv1_w"], np.float32)   # (32, 1, 5, 5)  OIHW
    b1 = np.asarray(raw["conv1_b"], np.float32)   # (32,)
    w2 = np.asarray(raw["conv2_w"], np.float32)   # (16, 32, 5, 5) OIHW
    b2 = np.asarray(raw["conv2_b"], np.float32)   # (16,)
    f1 = np.asarray(raw["fc1_w"], np.float32)     # (32, 256), in-index = c*16 + h*4 + w
    g1 = np.asarray(raw["fc1_b"], np.float32)
    f2 = np.asarray(raw["fc2_w"], np.float32)     # (16, 32)
    g2 = np.asarray(raw["fc2_b"], np.float32)
    f3 = np.asarray(raw["fc3_w"], np.float32)     # (10, 16)
    g3 = np.asarray(raw["fc3_b"], np.float32)

    # conv1 banded weight: rows = kh*28 + w_in (K = 140),
    # cols = parity*384 + pooled_ow*32 + c_out (N = 768, W-pool in parity halves).
    c1 = w1.shape[0]                                          # 32
    band1 = np.zeros((5, 28, 2, 12, c1), np.float32)
    for kh in range(5):
        for kw in range(5):
            for par in range(2):
                for owp in range(12):
                    ow = 2 * owp + par
                    band1[kh, ow + kw, par, owp, :] = w1[:, 0, kh, kw]
    band1 = band1.reshape(5 * 28, 2 * 12 * c1)                # (140, 768)
    b1t = np.tile(b1, 12)[None, :]                            # (1, 384)

    # conv2 banded weight: rows = kh*384 + w_in*32 + c_in (K = 1920),
    # cols = parity*64 + pooled_ow*16 + c_out (N = 128).
    c2, ci2 = w2.shape[0], w2.shape[1]                        # 16, 32
    band2 = np.zeros((5, 12, ci2, 2, 4, c2), np.float32)
    for kh in range(5):
        for kw in range(5):
            for par in range(2):
                for owp in range(4):
                    ow = 2 * owp + par
                    band2[kh, ow + kw, :, par, owp, :] = w2[:, :, kh, kw].T
    band2 = band2.reshape(5 * 12 * ci2, 2 * 4 * c2)           # (1920, 128)
    b2t = np.tile(b2, 4)[None, :]                             # (1, 64)

    # fc1: fold PyTorch's NCHW flatten into the weight; split by pooled-H index.
    # fw1[h, w*16 + c, j] = f1[j, c*16 + h*4 + w]
    fw1 = f1.reshape(32, 16, 4, 4).transpose(2, 3, 1, 0).reshape(4, 64, 32)

    # fc3: zero-pad the 10 logits to a lane-dense 128-wide output slab.
    fw3 = np.zeros((16, 128), np.float32)
    fw3[:, :10] = f3.T
    fb3 = np.zeros((1, 128), np.float32)
    fb3[0, :10] = g3

    return {
        "w1": jnp.asarray(band1), "b1": jnp.asarray(b1t),
        "w2": jnp.asarray(band2), "b2": jnp.asarray(b2t),
        "fw1": jnp.asarray(fw1), "fb1": jnp.asarray(g1[None, :]),
        "fw2": jnp.asarray(f2.T), "fb2": jnp.asarray(g2[None, :]),
        "fw3": jnp.asarray(fw3), "fb3": jnp.asarray(fb3),
    }


def init_raw_params(key):
    """Random parameters in PyTorch layouts (conv OIHW, linear (out, in))."""
    ks = jax.random.split(key, 10)
    s = 0.05
    return {
        "conv1_w": s * jax.random.normal(ks[0], (32, 1, 5, 5), jnp.float32),
        "conv1_b": s * jax.random.normal(ks[1], (32,), jnp.float32),
        "conv2_w": s * jax.random.normal(ks[2], (16, 32, 5, 5), jnp.float32),
        "conv2_b": s * jax.random.normal(ks[3], (16,), jnp.float32),
        "fc1_w": s * jax.random.normal(ks[4], (32, 256), jnp.float32),
        "fc1_b": s * jax.random.normal(ks[5], (32,), jnp.float32),
        "fc2_w": s * jax.random.normal(ks[6], (16, 32), jnp.float32),
        "fc2_b": s * jax.random.normal(ks[7], (16,), jnp.float32),
        "fc3_w": s * jax.random.normal(ks[8], (10, 16), jnp.float32),
        "fc3_b": s * jax.random.normal(ks[9], (10,), jnp.float32),
    }


# ---------------------------- pure-JAX reference ------------------------------
def reference_forward(x_nchw, raw):
    y = jax.lax.conv_general_dilated(
        x_nchw, raw["conv1_w"], (1, 1), "VALID",
        dimension_numbers=("NCHW", "OIHW", "NCHW"))
    y = jax.nn.relu(y + raw["conv1_b"][None, :, None, None])
    y = jax.lax.reduce_window(y, -jnp.inf, jax.lax.max,
                              (1, 1, 2, 2), (1, 1, 2, 2), "VALID")
    y = jax.lax.conv_general_dilated(
        y, raw["conv2_w"], (1, 1), "VALID",
        dimension_numbers=("NCHW", "OIHW", "NCHW"))
    y = jax.nn.relu(y + raw["conv2_b"][None, :, None, None])
    y = jax.lax.reduce_window(y, -jnp.inf, jax.lax.max,
                              (1, 1, 2, 2), (1, 1, 2, 2), "VALID")
    y = y.reshape(y.shape[0], 16 * 4 * 4)
    y = jax.nn.relu(y @ raw["fc1_w"].T + raw["fc1_b"])
    y = jax.nn.relu(y @ raw["fc2_w"].T + raw["fc2_b"])
    return y @ raw["fc3_w"].T + raw["fc3_b"]


# ----------------------------------- main --------------------------------------
if __name__ == "__main__":
    root = jax.random.PRNGKey(0)
    k_x, k_p = jax.random.split(root)
    raw = init_raw_params(k_p)
    params = prepare_params(raw)

    fwd = jax.jit(sparse_lenet_forward)
    ref = jax.jit(reference_forward)

    # Small batch (2 images): single padded tile.
    x_small = jax.random.normal(k_x, (2, 1, 28, 28), jnp.float32)   # (N, C, H, W)
    out = jax.block_until_ready(fwd(x_small, params))
    assert out.shape == (2, 10), out.shape
    assert out.dtype == jnp.float32
    err = float(jnp.max(jnp.abs(out - jax.block_until_ready(ref(x_small, raw)))))
    assert err < 1e-2, f"kernel/reference mismatch (small batch): {err}"

    # Larger batch (80 images): exercises the full 64-image tile, a 2-step grid,
    # and the batch padding path.
    x_big = jax.random.normal(k_x, (80, 1, 28, 28), jnp.float32)
    out_b = jax.block_until_ready(fwd(x_big, params))
    assert out_b.shape == (80, 10), out_b.shape
    err_b = float(jnp.max(jnp.abs(out_b - jax.block_until_ready(ref(x_big, raw)))))
    assert err_b < 1e-2, f"kernel/reference mismatch (large batch): {err_b}"

    print("KERNEL_OK")
</pallas_src>

<mosaic_0001>
module attributes {stable_mosaic.version = 11 : i64} {
  func.func @_lenet_kernel(%arg0: i32, %arg1: memref<28x8x28xf32, #tpu.memory_space<vmem>>, %arg2: memref<140x768xf32, #tpu.memory_space<vmem>>, %arg3: memref<1x384xf32, #tpu.memory_space<vmem>>, %arg4: memref<1920x128xf32, #tpu.memory_space<vmem>>, %arg5: memref<1x64xf32, #tpu.memory_space<vmem>>, %arg6: memref<4x64x32xf32, #tpu.memory_space<vmem>>, %arg7: memref<1x32xf32, #tpu.memory_space<vmem>>, %arg8: memref<32x16xf32, #tpu.memory_space<vmem>>, %arg9: memref<1x16xf32, #tpu.memory_space<vmem>>, %arg10: memref<16x128xf32, #tpu.memory_space<vmem>>, %arg11: memref<1x128xf32, #tpu.memory_space<vmem>>, %arg12: memref<8x128xf32, #tpu.memory_space<vmem>>) attributes {dimension_semantics = [#tpu.dimension_semantics<parallel>], iteration_bounds = array<i64: 1>, scalar_prefetch = 0 : i64, scratch_operands = 0 : i64, tpu.core_type = #tpu.core_type<tc>, window_params = [{transform_indices = @transform_0, window_bounds = array<i64: 28, 8, 28>}, {pipeline_mode = #tpu.pipeline_mode<synchronous>, transform_indices = @transform_1, window_bounds = array<i64: 140, 768>}, {pipeline_mode = #tpu.pipeline_mode<synchronous>, transform_indices = @transform_2, window_bounds = array<i64: 1, 384>}, {pipeline_mode = #tpu.pipeline_mode<synchronous>, transform_indices = @transform_3, window_bounds = array<i64: 1920, 128>}, {pipeline_mode = #tpu.pipeline_mode<synchronous>, transform_indices = @transform_4, window_bounds = array<i64: 1, 64>}, {pipeline_mode = #tpu.pipeline_mode<synchronous>, transform_indices = @transform_5, window_bounds = array<i64: 4, 64, 32>}, {pipeline_mode = #tpu.pipeline_mode<synchronous>, transform_indices = @transform_6, window_bounds = array<i64: 1, 32>}, {pipeline_mode = #tpu.pipeline_mode<synchronous>, transform_indices = @transform_7, window_bounds = array<i64: 32, 16>}, {pipeline_mode = #tpu.pipeline_mode<synchronous>, transform_indices = @transform_8, window_bounds = array<i64: 1, 16>}, {pipeline_mode = #tpu.pipeline_mode<synchronous>, transform_indices = @transform_9, window_bounds = array<i64: 16, 128>}, {pipeline_mode = #tpu.pipeline_mode<synchronous>, transform_indices = @transform_10, window_bounds = array<i64: 1, 128>}, {transform_indices = @transform_11, window_bounds = array<i64: 8, 128>}]} {
    %c0 = arith.constant 0 : index
    %c0_0 = arith.constant 0 : index
    %c0_1 = arith.constant 0 : index
    %0 = vector.load %arg1[%c0, %c0_0, %c0_1] : memref<28x8x28xf32, #tpu.memory_space<vmem>>, vector<24x8x28xf32>
    %1 = vector.shape_cast %0 : vector<24x8x28xf32> to vector<192x28xf32>
    %c1 = arith.constant 1 : index
    %c0_2 = arith.constant 0 : index
    %c0_3 = arith.constant 0 : index
    %2 = vector.load %arg1[%c1, %c0_2, %c0_3] : memref<28x8x28xf32, #tpu.memory_space<vmem>>, vector<24x8x28xf32>
    %3 = vector.shape_cast %2 : vector<24x8x28xf32> to vector<192x28xf32>
    %c2 = arith.constant 2 : index
    %c0_4 = arith.constant 0 : index
    %c0_5 = arith.constant 0 : index
    %4 = vector.load %arg1[%c2, %c0_4, %c0_5] : memref<28x8x28xf32, #tpu.memory_space<vmem>>, vector<24x8x28xf32>
    %5 = vector.shape_cast %4 : vector<24x8x28xf32> to vector<192x28xf32>
    %c3 = arith.constant 3 : index
    %c0_6 = arith.constant 0 : index
    %c0_7 = arith.constant 0 : index
    %6 = vector.load %arg1[%c3, %c0_6, %c0_7] : memref<28x8x28xf32, #tpu.memory_space<vmem>>, vector<24x8x28xf32>
    %7 = vector.shape_cast %6 : vector<24x8x28xf32> to vector<192x28xf32>
    %c4 = arith.constant 4 : index
    %c0_8 = arith.constant 0 : index
    %c0_9 = arith.constant 0 : index
    %8 = vector.load %arg1[%c4, %c0_8, %c0_9] : memref<28x8x28xf32, #tpu.memory_space<vmem>>, vector<24x8x28xf32>
    %9 = vector.shape_cast %8 : vector<24x8x28xf32> to vector<192x28xf32>
    %10 = tpu.concatenate %1, %3, %5, %7, %9 in 1 : vector<192x28xf32>, vector<192x28xf32>, vector<192x28xf32>, vector<192x28xf32>, vector<192x28xf32> -> vector<192x140xf32>
    %c0_10 = arith.constant 0 : index
    %c0_11 = arith.constant 0 : index
    %11 = vector.load %arg2[%c0_10, %c0_11] : memref<140x768xf32, #tpu.memory_space<vmem>>, vector<140x768xf32>
    %cst = arith.constant dense<0.000000e+00> : vector<192x768xf32>
    %12 = tpu.matmul %10, %11, %cst {dimension_numbers = #tpu.dot_dimension_numbers<[1], [0], [0], [1], [0, 0, 1, 1], [], []>} : vector<192x140xf32>, vector<140x768xf32>, vector<192x768xf32> -> vector<192x768xf32>
    %13 = vector.extract_strided_slice %12 {offsets = [0, 0], sizes = [192, 384], strides = [1, 1]} : vector<192x768xf32> to vector<192x384xf32>
    %14 = vector.extract_strided_slice %12 {offsets = [0, 384], sizes = [192, 384], strides = [1, 1]} : vector<192x768xf32> to vector<192x384xf32>
    %15 = arith.maximumf %13, %14 : vector<192x384xf32>
    %c0_12 = arith.constant 0 : index
    %c0_13 = arith.constant 0 : index
    %16 = vector.load %arg3[%c0_12, %c0_13] : memref<1x384xf32, #tpu.memory_space<vmem>>, vector<1x384xf32>
    %17 = vector.broadcast %16 : vector<1x384xf32> to vector<192x384xf32>
    %18 = arith.addf %15, %17 : vector<192x384xf32>
    %cst_14 = arith.constant 0.000000e+00 : f32
    %19 = vector.broadcast %cst_14 : f32 to vector<192x384xf32>
    %20 = arith.maximumf %18, %19 : vector<192x384xf32>
    %21 = vector.shape_cast %20 : vector<192x384xf32> to vector<12x2x8x384xf32>
    %22 = vector.extract_strided_slice %21 {offsets = [0, 0, 0, 0], sizes = [12, 1, 8, 384], strides = [1, 1, 1, 1]} : vector<12x2x8x384xf32> to vector<12x1x8x384xf32>
    %23 = vector.shape_cast %22 : vector<12x1x8x384xf32> to vector<12x8x384xf32>
    %24 = vector.extract_strided_slice %21 {offsets = [0, 1, 0, 0], sizes = [12, 1, 8, 384], strides = [1, 1, 1, 1]} : vector<12x2x8x384xf32> to vector<12x1x8x384xf32>
    %25 = vector.shape_cast %24 : vector<12x1x8x384xf32> to vector<12x8x384xf32>
    %26 = arith.maximumf %23, %25 : vector<12x8x384xf32>
    %27 = vector.extract_strided_slice %26 {offsets = [0, 0, 0], sizes = [8, 8, 384], strides = [1, 1, 1]} : vector<12x8x384xf32> to vector<8x8x384xf32>
    %28 = vector.shape_cast %27 : vector<8x8x384xf32> to vector<64x384xf32>
    %29 = vector.extract_strided_slice %26 {offsets = [1, 0, 0], sizes = [8, 8, 384], strides = [1, 1, 1]} : vector<12x8x384xf32> to vector<8x8x384xf32>
    %30 = vector.shape_cast %29 : vector<8x8x384xf32> to vector<64x384xf32>
    %31 = vector.extract_strided_slice %26 {offsets = [2, 0, 0], sizes = [8, 8, 384], strides = [1, 1, 1]} : vector<12x8x384xf32> to vector<8x8x384xf32>
    %32 = vector.shape_cast %31 : vector<8x8x384xf32> to vector<64x384xf32>
    %33 = vector.extract_strided_slice %26 {offsets = [3, 0, 0], sizes = [8, 8, 384], strides = [1, 1, 1]} : vector<12x8x384xf32> to vector<8x8x384xf32>
    %34 = vector.shape_cast %33 : vector<8x8x384xf32> to vector<64x384xf32>
    %35 = vector.extract_strided_slice %26 {offsets = [4, 0, 0], sizes = [8, 8, 384], strides = [1, 1, 1]} : vector<12x8x384xf32> to vector<8x8x384xf32>
    %36 = vector.shape_cast %35 : vector<8x8x384xf32> to vector<64x384xf32>
    %37 = tpu.concatenate %28, %30, %32, %34, %36 in 1 : vector<64x384xf32>, vector<64x384xf32>, vector<64x384xf32>, vector<64x384xf32>, vector<64x384xf32> -> vector<64x1920xf32>
    %c0_15 = arith.constant 0 : index
    %c0_16 = arith.constant 0 : index
    %38 = vector.load %arg4[%c0_15, %c0_16] : memref<1920x128xf32, #tpu.memory_space<vmem>>, vector<1920x128xf32>
    %cst_17 = arith.constant dense<0.000000e+00> : vector<64x128xf32>
    %39 = tpu.matmul %37, %38, %cst_17 {dimension_numbers = #tpu.dot_dimension_numbers<[1], [0], [0], [1], [0, 0, 1, 1], [], []>} : vector<64x1920xf32>, vector<1920x128xf32>, vector<64x128xf32> -> vector<64x128xf32>
    %40 = vector.extract_strided_slice %39 {offsets = [0, 0], sizes = [64, 64], strides = [1, 1]} : vector<64x128xf32> to vector<64x64xf32>
    %41 = vector.extract_strided_slice %39 {offsets = [0, 64], sizes = [64, 64], strides = [1, 1]} : vector<64x128xf32> to vector<64x64xf32>
    %42 = arith.maximumf %40, %41 : vector<64x64xf32>
    %c0_18 = arith.constant 0 : index
    %c0_19 = arith.constant 0 : index
    %43 = vector.load %arg5[%c0_18, %c0_19] : memref<1x64xf32, #tpu.memory_space<vmem>>, vector<1x64xf32>
    %44 = vector.broadcast %43 : vector<1x64xf32> to vector<64x64xf32>
    %45 = arith.addf %42, %44 : vector<64x64xf32>
    %cst_20 = arith.constant 0.000000e+00 : f32
    %46 = vector.broadcast %cst_20 : f32 to vector<64x64xf32>
    %47 = arith.maximumf %45, %46 : vector<64x64xf32>
    %48 = vector.shape_cast %47 : vector<64x64xf32> to vector<4x2x8x64xf32>
    %49 = vector.extract_strided_slice %48 {offsets = [0, 0, 0, 0], sizes = [4, 1, 8, 64], strides = [1, 1, 1, 1]} : vector<4x2x8x64xf32> to vector<4x1x8x64xf32>
    %50 = vector.shape_cast %49 : vector<4x1x8x64xf32> to vector<4x8x64xf32>
    %51 = vector.extract_strided_slice %48 {offsets = [0, 1, 0, 0], sizes = [4, 1, 8, 64], strides = [1, 1, 1, 1]} : vector<4x2x8x64xf32> to vector<4x1x8x64xf32>
    %52 = vector.shape_cast %51 : vector<4x1x8x64xf32> to vector<4x8x64xf32>
    %53 = arith.maximumf %50, %52 : vector<4x8x64xf32>
    %cst_21 = arith.constant 0.000000e+00 : f32
    %54 = vector.broadcast %cst_21 : f32 to vector<8x32xf32>
    %55 = vector.extract_strided_slice %53 {offsets = [0, 0, 0], sizes = [1, 8, 64], strides = [1, 1, 1]} : vector<4x8x64xf32> to vector<1x8x64xf32>
    %56 = vector.shape_cast %55 : vector<1x8x64xf32> to vector<8x64xf32>
    %c0_22 = arith.constant 0 : index
    %c0_23 = arith.constant 0 : index
    %c0_24 = arith.constant 0 : index
    %57 = vector.load %arg6[%c0_22, %c0_23, %c0_24] : memref<4x64x32xf32, #tpu.memory_space<vmem>>, vector<1x64x32xf32>
    %58 = vector.shape_cast %57 : vector<1x64x32xf32> to vector<64x32xf32>
    %cst_25 = arith.constant dense<0.000000e+00> : vector<8x32xf32>
    %59 = tpu.matmul %56, %58, %cst_25 {dimension_numbers = #tpu.dot_dimension_numbers<[1], [0], [0], [1], [0, 0, 1, 1], [], []>} : vector<8x64xf32>, vector<64x32xf32>, vector<8x32xf32> -> vector<8x32xf32>
    %60 = arith.addf %54, %59 : vector<8x32xf32>
    %61 = vector.extract_strided_slice %53 {offsets = [1, 0, 0], sizes = [1, 8, 64], strides = [1, 1, 1]} : vector<4x8x64xf32> to vector<1x8x64xf32>
    %62 = vector.shape_cast %61 : vector<1x8x64xf32> to vector<8x64xf32>
    %c1_26 = arith.constant 1 : index
    %c0_27 = arith.constant 0 : index
    %c0_28 = arith.constant 0 : index
    %63 = vector.load %arg6[%c1_26, %c0_27, %c0_28] : memref<4x64x32xf32, #tpu.memory_space<vmem>>, vector<1x64x32xf32>
    %64 = vector.shape_cast %63 : vector<1x64x32xf32> to vector<64x32xf32>
    %cst_29 = arith.constant dense<0.000000e+00> : vector<8x32xf32>
    %65 = tpu.matmul %62, %64, %cst_29 {dimension_numbers = #tpu.dot_dimension_numbers<[1], [0], [0], [1], [0, 0, 1, 1], [], []>} : vector<8x64xf32>, vector<64x32xf32>, vector<8x32xf32> -> vector<8x32xf32>
    %66 = arith.addf %60, %65 : vector<8x32xf32>
    %67 = vector.extract_strided_slice %53 {offsets = [2, 0, 0], sizes = [1, 8, 64], strides = [1, 1, 1]} : vector<4x8x64xf32> to vector<1x8x64xf32>
    %68 = vector.shape_cast %67 : vector<1x8x64xf32> to vector<8x64xf32>
    %c2_30 = arith.constant 2 : index
    %c0_31 = arith.constant 0 : index
    %c0_32 = arith.constant 0 : index
    %69 = vector.load %arg6[%c2_30, %c0_31, %c0_32] : memref<4x64x32xf32, #tpu.memory_space<vmem>>, vector<1x64x32xf32>
    %70 = vector.shape_cast %69 : vector<1x64x32xf32> to vector<64x32xf32>
    %cst_33 = arith.constant dense<0.000000e+00> : vector<8x32xf32>
    %71 = tpu.matmul %68, %70, %cst_33 {dimension_numbers = #tpu.dot_dimension_numbers<[1], [0], [0], [1], [0, 0, 1, 1], [], []>} : vector<8x64xf32>, vector<64x32xf32>, vector<8x32xf32> -> vector<8x32xf32>
    %72 = arith.addf %66, %71 : vector<8x32xf32>
    %73 = vector.extract_strided_slice %53 {offsets = [3, 0, 0], sizes = [1, 8, 64], strides = [1, 1, 1]} : vector<4x8x64xf32> to vector<1x8x64xf32>
    %74 = vector.shape_cast %73 : vector<1x8x64xf32> to vector<8x64xf32>
    %c3_34 = arith.constant 3 : index
    %c0_35 = arith.constant 0 : index
    %c0_36 = arith.constant 0 : index
    %75 = vector.load %arg6[%c3_34, %c0_35, %c0_36] : memref<4x64x32xf32, #tpu.memory_space<vmem>>, vector<1x64x32xf32>
    %76 = vector.shape_cast %75 : vector<1x64x32xf32> to vector<64x32xf32>
    %cst_37 = arith.constant dense<0.000000e+00> : vector<8x32xf32>
    %77 = tpu.matmul %74, %76, %cst_37 {dimension_numbers = #tpu.dot_dimension_numbers<[1], [0], [0], [1], [0, 0, 1, 1], [], []>} : vector<8x64xf32>, vector<64x32xf32>, vector<8x32xf32> -> vector<8x32xf32>
    %78 = arith.addf %72, %77 : vector<8x32xf32>
    %c0_38 = arith.constant 0 : index
    %c0_39 = arith.constant 0 : index
    %79 = vector.load %arg7[%c0_38, %c0_39] : memref<1x32xf32, #tpu.memory_space<vmem>>, vector<1x32xf32>
    %80 = vector.broadcast %79 : vector<1x32xf32> to vector<8x32xf32>
    %81 = arith.addf %78, %80 : vector<8x32xf32>
    %cst_40 = arith.constant 0.000000e+00 : f32
    %82 = vector.broadcast %cst_40 : f32 to vector<8x32xf32>
    %83 = arith.maximumf %81, %82 : vector<8x32xf32>
    %c0_41 = arith.constant 0 : index
    %c0_42 = arith.constant 0 : index
    %84 = vector.load %arg8[%c0_41, %c0_42] : memref<32x16xf32, #tpu.memory_space<vmem>>, vector<32x16xf32>
    %cst_43 = arith.constant dense<0.000000e+00> : vector<8x16xf32>
    %85 = tpu.matmul %83, %84, %cst_43 {dimension_numbers = #tpu.dot_dimension_numbers<[1], [0], [0], [1], [0, 0, 1, 1], [], []>} : vector<8x32xf32>, vector<32x16xf32>, vector<8x16xf32> -> vector<8x16xf32>
    %c0_44 = arith.constant 0 : index
    %c0_45 = arith.constant 0 : index
    %86 = vector.load %arg9[%c0_44, %c0_45] : memref<1x16xf32, #tpu.memory_space<vmem>>, vector<1x16xf32>
    %87 = vector.broadcast %86 : vector<1x16xf32> to vector<8x16xf32>
    %88 = arith.addf %85, %87 : vector<8x16xf32>
    %cst_46 = arith.constant 0.000000e+00 : f32
    %89 = vector.broadcast %cst_46 : f32 to vector<8x16xf32>
    %90 = arith.maximumf %88, %89 : vector<8x16xf32>
    %c0_47 = arith.constant 0 : index
    %c0_48 = arith.constant 0 : index
    %91 = vector.load %arg10[%c0_47, %c0_48] : memref<16x128xf32, #tpu.memory_space<vmem>>, vector<16x128xf32>
    %cst_49 = arith.constant dense<0.000000e+00> : vector<8x128xf32>
    %92 = tpu.matmul %90, %91, %cst_49 {dimension_numbers = #tpu.dot_dimension_numbers<[1], [0], [0], [1], [0, 0, 1, 1], [], []>} : vector<8x16xf32>, vector<16x128xf32>, vector<8x128xf32> -> vector<8x128xf32>
    %c0_50 = arith.constant 0 : index
    %c0_51 = arith.constant 0 : index
    %93 = vector.load %arg11[%c0_50, %c0_51] : memref<1x128xf32, #tpu.memory_space<vmem>>, vector<1x128xf32>
    %94 = vector.broadcast %93 : vector<1x128xf32> to vector<8x128xf32>
    %95 = arith.addf %92, %94 : vector<8x128xf32>
    %c0_52 = arith.constant 0 : index
    %c0_53 = arith.constant 0 : index
    %96 = vector.load %arg12[%c0_52, %c0_53] : memref<8x128xf32, #tpu.memory_space<vmem>>, vector<8x128xf32>
    tpu.vector_store %arg12[%c0_52, %c0_53], %95 {strides = array<i32>} : memref<8x128xf32, #tpu.memory_space<vmem>>, vector<8x128xf32>,
    return
  }
  func.func @transform_0(%arg0: i32) -> (i32, i32, i32) {
    %c0_i32 = arith.constant 0 : i32
    %c0_i32_0 = arith.constant 0 : i32
    %c0_i32_1 = arith.constant 0 : i32
    return %c0_i32, %arg0, %c0_i32_0 : i32, i32, i32
  }
  func.func @transform_1(%arg0: i32) -> (i32, i32) {
    %c0_i32 = arith.constant 0 : i32
    %c0_i32_0 = arith.constant 0 : i32
    %c0_i32_1 = arith.constant 0 : i32
    return %c0_i32, %c0_i32_0 : i32, i32
  }
  func.func @transform_2(%arg0: i32) -> (i32, i32) {
    %c0_i32 = arith.constant 0 : i32
    %c0_i32_0 = arith.constant 0 : i32
    %c0_i32_1 = arith.constant 0 : i32
    return %c0_i32, %c0_i32_0 : i32, i32
  }
  func.func @transform_3(%arg0: i32) -> (i32, i32) {
    %c0_i32 = arith.constant 0 : i32
    %c0_i32_0 = arith.constant 0 : i32
    %c0_i32_1 = arith.constant 0 : i32
    return %c0_i32, %c0_i32_0 : i32, i32
  }
  func.func @transform_4(%arg0: i32) -> (i32, i32) {
    %c0_i32 = arith.constant 0 : i32
    %c0_i32_0 = arith.constant 0 : i32
    %c0_i32_1 = arith.constant 0 : i32
    return %c0_i32, %c0_i32_0 : i32, i32
  }
  func.func @transform_5(%arg0: i32) -> (i32, i32, i32) {
    %c0_i32 = arith.constant 0 : i32
    %c0_i32_0 = arith.constant 0 : i32
    %c0_i32_1 = arith.constant 0 : i32
    %c0_i32_2 = arith.constant 0 : i32
    return %c0_i32, %c0_i32_0, %c0_i32_1 : i32, i32, i32
  }
  func.func @transform_6(%arg0: i32) -> (i32, i32) {
    %c0_i32 = arith.constant 0 : i32
    %c0_i32_0 = arith.constant 0 : i32
    %c0_i32_1 = arith.constant 0 : i32
    return %c0_i32, %c0_i32_0 : i32, i32
  }
  func.func @transform_7(%arg0: i32) -> (i32, i32) {
    %c0_i32 = arith.constant 0 : i32
    %c0_i32_0 = arith.constant 0 : i32
    %c0_i32_1 = arith.constant 0 : i32
    return %c0_i32, %c0_i32_0 : i32, i32
  }
  func.func @transform_8(%arg0: i32) -> (i32, i32) {
    %c0_i32 = arith.constant 0 : i32
    %c0_i32_0 = arith.constant 0 : i32
    %c0_i32_1 = arith.constant 0 : i32
    return %c0_i32, %c0_i32_0 : i32, i32
  }
  func.func @transform_9(%arg0: i32) -> (i32, i32) {
    %c0_i32 = arith.constant 0 : i32
    %c0_i32_0 = arith.constant 0 : i32
    %c0_i32_1 = arith.constant 0 : i32
    return %c0_i32, %c0_i32_0 : i32, i32
  }
  func.func @transform_10(%arg0: i32) -> (i32, i32) {
    %c0_i32 = arith.constant 0 : i32
    %c0_i32_0 = arith.constant 0 : i32
    %c0_i32_1 = arith.constant 0 : i32
    return %c0_i32, %c0_i32_0 : i32, i32
  }
  func.func @transform_11(%arg0: i32) -> (i32, i32) {
    %c0_i32 = arith.constant 0 : i32
    %c0_i32_0 = arith.constant 0 : i32
    return %arg0, %c0_i32 : i32, i32
  }
}

</mosaic_0001>

<bundles_post_ra>
// kernel: sparse_lenet_forward.1
= control target key start
LH: loop header
LB: loop body
LE: loop exit
PB: predicated region body
PF: predicated region fallthrough
CT: control target
= control target key end

     0   :  { %16 = vsyncpa [#allocation3], 0  ;;  %s5685_s0 = inlined_call_operand.vmem [shape: f32[28,8,28], index: 0, kind: input, shape index: {}]   ;;  %s5686_s1 = inlined_call_operand.hbm [shape: f32[140,768], index: 1, kind: input, shape index: {}]   ;;  %s5687_s2 = inlined_call_operand.vmem [shape: f32[1,384], index: 2, kind: input, shape index: {}]   ;;  %s5688_s3 = inlined_call_operand.hbm [shape: f32[1920,128], index: 3, kind: input, shape index: {}]   ;;  %s5689_s4 = inlined_call_operand.vmem [shape: f32[1,64], index: 4, kind: input, shape index: {}]   ;;  %s5690_s5 = inlined_call_operand.vmem [shape: f32[4,64,32], index: 5, kind: input, shape index: {}]   ;;  %s5691_s6 = inlined_call_operand.vmem [shape: f32[1,32], index: 6, kind: input, shape index: {}]   ;;  %s5692_s7 = inlined_call_operand.vmem [shape: f32[32,16], index: 7, kind: input, shape index: {}]   ;;  %s5693_s8 = inlined_call_operand.vmem [shape: f32[1,16], index: 8, kind: input, shape index: {}]   ;;  %s5694_s9 = inlined_call_operand.vmem [shape: f32[16,128], index: 9, kind: input, shape index: {}]   ;;  %s5695_s10 = inlined_call_operand.vmem [shape: f32[1,128], index: 10, kind: input, shape index: {}]   ;;  %s5696_s11 = inlined_call_operand.vmem [shape: f32[8,128], index: 11, kind: output, shape index: {}]  }
   0x1   :  { %s24_s19 = sshll.u32 %s5686_s1, 4  ;;  %s25_s19 = int_to_ptr.hbm [resolvable:$true] %s24_s19 }
   0x2   :  { %17 = vsyncpa [#allocation5], 0  ;;  %s3815_s20 = smov [#allocation2]   ;;  %s39_s24 = sshll.u32 %s5688_s3, 4  ;;  %s40_s24 = int_to_ptr.hbm [resolvable:$true] %s39_s24 }
   0x3   :  { %s26_s21 = sshll.u32 %s3815_s20, 4  ;;  %s3816_s25 = smov 768   ;;  %s27_s21 = int_to_ptr.vmem [resolvable:$true] %s26_s21 }
   0x4   :  { %s3817_s26 = smov 48   ;;  %s3818_s27 = smov [#allocation4]  }
   0x5   :  { %32 = dma.hbm_to_vmem [thread:$0]  %s25_s19, 13824, %s27_s21, [#allocation3], %s3816_s25, %s3816_s25, %s3817_s26  }
   0x6   :  { %s41_s28 = sshll.u32 %s3818_s27, 4  ;;  %s3819_s29 = smov 128   ;;  %s42_s28 = int_to_ptr.vmem [resolvable:$true] %s41_s28 }
   0x7   :  { %s3820_s30 = smov 8  }
   0x8   :  { %47 = dma.hbm_to_vmem [thread:$0]  %s40_s24, 30720, %s42_s28, [#allocation5], %s3819_s29, %s3819_s29, %s3820_s30  }
   0x9   :  { %3811 = dma.done.wait [#allocation3], 13824  }
   0xa   :  { %3812 = vsyncadd [#allocation3], 4294953472 }
   0xb   :  { %3813 = dma.done.wait [#allocation5], 30720  }
   0xc   :  { %3814 = vsyncadd [#allocation5], 4294936576  ;;  %v3895_v0 = vld [vmem:[%s5685_s0 + $0x20] sm:$0xff]  ;;  %v3900_v1 = vld [vmem:[%s5685_s0 + $0x10] sm:$0xff]  ;;  %s3821_s16 = smov 112   ;;  %s3822_s21 = smov 56  }
   0xd   :  { %v3905_v2 = vld [vmem:[%s5685_s0 + $0x18] sm:$0xff]  ;;  %506 = vrot.lane.b32.xlu0 %v3895_v0, %s3821_s16  ;;  %v3914_v4 = vld [vmem:[%s5685_s0 + $0x28] sm:$0xff]  ;;  %s3823_s22 = smov 28   ;;  %v3932_v8 = vld [vmem:[%s5685_s0 + $0x30] sm:$0xff]  ;;  %s3824_s25 = smov 84   ;;  %vm835_vm0 = vcmask 1043456  }
   0xe   :  { %v3599_v3 = vpack.i.bf16 %v3905_v2, %v3900_v1  ;;  %v3919_v5 = vld [vmem:[%s5685_s0 + $0x8] sm:$0xff]  ;;  %508 = vrot.lane.b32.xlu2 %v3914_v4, %s3821_s16  ;;  %v3604_v7 = vpack.i.bf16 %v3895_v0, %v3905_v2  ;;  %v3619_v9 = vpack.i.bf16 %v3932_v8, %v3914_v4  ;;  %v3614_v10 = vpack.i.bf16 %v3914_v4, %v3895_v0  ;;  %v3947_v11 = vld [vmem:[%s5685_s0 + $0x38] sm:$0xff]  ;;  %v3952_v12 = vld [vmem:[%s5685_s0 + $0x40] sm:$0xff] }
   0xf   :  { %v3594_v6 = vpack.i.bf16 %v3900_v1, %v3919_v5  ;;  %v3629_v13 = vpack.i.bf16 %v3947_v11, %v3932_v8  ;;  %v3634_v14 = vpack.i.bf16 %v3952_v12, %v3947_v11  ;;  %v3967_v15 = vld [vmem:[%s5685_s0 + $0x48] sm:$0xff]  ;;  %v3975_v16 = vld [vmem:[%s5685_s0 + $0x50] sm:$0xff]  ;;  %v3988_v19 = vld [vmem:[%s5685_s0 + $0x58] sm:$0xff]  ;;  %vm786_vm1 = vcmask 97280  }
  0x10   :  { %3600 = vrot.lane.b32.xlu1 %v3599_v3, %s3822_s21  ;;  %v3644_v17 = vpack.i.bf16 %v3967_v15, %v3952_v12  ;;  %v3649_v18 = vpack.i.bf16 %v3975_v16, %v3967_v15  ;;  %v3994_v20 = vld [vmem:[%s5685_s0 + $0x60] sm:$0xff]  ;;  %v3659_v22 = vpack.i.bf16 %v3988_v19, %v3975_v16  ;;  %v768_v23 = vld [vmem:[#allocation2 + $0x2d0] sm:$0xff]  ;;  %v769_v24 = vld [vmem:[#allocation2 + $0x2d8] sm:$0xff]  ;;  %vm578_vm2 = vcmask 228352  }
  0x11   :  { %v3664_v21 = vpack.i.bf16 %v3994_v20, %v3988_v19  ;;  %v762_v25 = vld [vmem:[#allocation2 + $0x2a0] sm:$0xff]  ;;  %854 = vmatpush.msra.mxu0 %v768_v23  ;;  %v763_v26 = vld [vmem:[#allocation2 + $0x2a8] sm:$0xff]  ;;  %1032 = vmatpush.msra.mxu2 %v769_v24  ;;  %v756_v27 = vld [vmem:[#allocation2 + $0x270] sm:$0xff]  ;;  %vm603_vm3 = vcmask 457728   ;;  %vm628_vm4 = vcmask 687104   ;;  %vm653_vm5 = vcmask 916480  }
  0x12   :  { %v757_v28 = vld [vmem:[#allocation2 + $0x278] sm:$0xff]  ;;  %v750_v29 = vld [vmem:[#allocation2 + $0x240] sm:$0xff]  ;;  %v4010_v30 = vld [vmem:[%s5685_s0 + $0x68] sm:$0xff]  ;;  %vm3118_vm6 = vcmask 523264   ;;  %vm3245_vm7 = vcmask 261120   ;;  %vm3276_vm8 = vcmask 130048  }
  0x13   :  { %855 = vmatpush.msra.mxu0 %v762_v25  ;;  %1033 = vmatpush.msra.mxu2 %v763_v26  ;;  %v751_v31 = vld [vmem:[#allocation2 + $0x248] sm:$0xff]  ;;  %v744_v32 = vld [vmem:[#allocation2 + $0x210] sm:$0xff]  ;;  %v745_v34 = vld [vmem:[#allocation2 + $0x218] sm:$0xff]  ;;  %v3674_v42 = vpack.i.bf16 %v4010_v30, %v3994_v20 }
  0x14   :  { %v4015_v33 = vld [vmem:[%s5685_s0 + $0x70] sm:$0xff]  ;;  %v738_v35 = vld [vmem:[#allocation2 + $0x1e0] sm:$0xff]  ;;  %v739_v36 = vld [vmem:[#allocation2 + $0x1e8] sm:$0xff] }
  0x15   :  { %3595 = vrot.lane.b32.xlu0 %v3594_v6, %s3823_s22  ;;  %856 = vmatpush.msra.mxu0 %v756_v27  ;;  %v732_v37 = vld [vmem:[#allocation2 + $0x1b0] sm:$0xff]  ;;  %v733_v39 = vld [vmem:[#allocation2 + $0x1b8] sm:$0xff]  ;;  %v774_v41 = vld [vmem:[#allocation2 + $0x300] sm:$0xff]  ;;  %v3679_v46 = vpack.i.bf16 %v4015_v33, %v4010_v30 }
  0x16   :  { %510 = vrot.lane.b32.xlu2 %v3932_v8, %s3821_s16  ;;  %1034 = vmatpush.msra.mxu2 %v757_v28  ;;  %v780_v38 = vld [vmem:[#allocation2 + $0x330] sm:$0xf]  ;;  %v781_v40 = vld [vmem:[#allocation2 + $0x338] sm:$0xf]  ;;  %v726_v43 = vld [vmem:[#allocation2 + $0x180] sm:$0xff] }
  0x17   :  { %857 = vmatpush.msra.mxu0 %v750_v29  ;;  %3403 = vmatpush.msk.msra.mxu1 %vm835_vm0, %v780_v38  ;;  %v775_v44 = vld [vmem:[#allocation2 + $0x308] sm:$0xff]  ;;  %v720_v47 = vld [vmem:[#allocation2 + $0x150] sm:$0xff]  ;;  %v721_v48 = vld [vmem:[#allocation2 + $0x158] sm:$0xff] }
  0x18   :  { %3605 = vrot.lane.b32.xlu1 %v3604_v7, %s3824_s25  ;;  %1035 = vmatpush.msra.mxu2 %v751_v31  ;;  %v727_v45 = vld [vmem:[#allocation2 + $0x188] sm:$0xff]  ;;  %v4032_v49 = vld [vmem:[%s5685_s0 + $0x78] sm:$0xff]  ;;  %v4040_v50 = vld [vmem:[%s5685_s0 + $0x80] sm:$0xff] }
  0x19   :  { %858 = vmatpush.msra.mxu0 %v744_v32  ;;  %3428 = vmatpush.msk.msra.mxu3 %vm835_vm0, %v781_v40  ;;  %v714_v51 = vld [vmem:[#allocation2 + $0x120] sm:$0xff]  ;;  %v715_v52 = vld [vmem:[#allocation2 + $0x128] sm:$0xff]  ;;  %v3694_v53 = vpack.i.bf16 %v4040_v50, %v4032_v49  ;;  %v3689_v54 = vpack.i.bf16 %v4032_v49, %v4015_v33  ;;  %v708_v55 = vld [vmem:[#allocation2 + $0xf0] sm:$0xff] }
  0x1a   :  { %1036 = vmatpush.msra.mxu2 %v745_v34  ;;  %958 = vmatpush.msra.mxu1 %v774_v41  ;;  %v709_v56 = vld [vmem:[#allocation2 + $0xf8] sm:$0xff]  ;;  %v702_v57 = vld [vmem:[#allocation2 + $0xc0] sm:$0xff]  ;;  %v703_v58 = vld [vmem:[#allocation2 + $0xc8] sm:$0xff] }
  0x1b   :  { %859 = vmatpush.msra.mxu0 %v738_v35  ;;  %1136 = vmatpush.msra.mxu3 %v775_v44  ;;  %v4052_v59 = vld [vmem:[%s5685_s0 + $0x88] sm:$0xff]  ;;  %v782_v60 = vld [vmem:[#allocation2 + $0x340] sm:$0xf]  ;;  %v696_v61 = vld [vmem:[#allocation2 + $0x90] sm:$0xff] }
  0x1c   :  { %1037 = vmatpush.msra.mxu2 %v739_v36  ;;  %v697_v62 = vld [vmem:[#allocation2 + $0x98] sm:$0xff]  ;;  %v690_v63 = vld [vmem:[#allocation2 + $0x60] sm:$0xff]  ;;  %v691_v3 = vld [vmem:[#allocation2 + $0x68] sm:$0xff] }
  0x1d   :  { %3610 = vrot.lane.b32.xlu0 %v3604_v7, %s3823_s22  ;;  %860 = vmatpush.msra.mxu0 %v732_v37  ;;  %v684_v6 = vld [vmem:[#allocation2 + $0x30] sm:$0xff]  ;;  %v685_v7 = vld [vmem:[#allocation2 + $0x38] sm:$0xff]  ;;  %v4081_v23 = vld [vmem:[%s5685_s0 + $0xa0] sm:$0xff] }
  0x1e   :  { %3620 = vrot.lane.b32.xlu2 %v3619_v9, %s3824_s25  ;;  %1038 = vmatpush.msra.mxu2 %v733_v39  ;;  %v771_v24 = vld [vmem:[#allocation2 + $0x2e8] sm:$0xff]  ;;  %v764_v25 = vld [vmem:[#allocation2 + $0x2b0] sm:$0xff]  ;;  %v765_v34 = vld [vmem:[#allocation2 + $0x2b8] sm:$0xff] }
  0x1f   :  { %861 = vmatpush.msra.mxu0 %v726_v43  ;;  %3453 = vmatpush.msk.msrb.mxu3 %vm835_vm0, %v782_v60  ;;  %v4106_v32 = vld [vmem:[%s5685_s0 + $0xb0] sm:$0xff]  ;;  %v4111_v35 = vld [vmem:[%s5685_s0 + $0xa8] sm:$0xff]  ;;  %v758_v36 = vld [vmem:[#allocation2 + $0x280] sm:$0xff] }
  0x20   :  { %3615 = vrot.lane.b32.xlu1 %v3614_v10, %s3822_s21  ;;  %1039 = vmatpush.msra.mxu2 %v727_v45  ;;  %v4064_v10 = vld [vmem:[%s5685_s0 + $0x90] sm:$0xff]  ;;  %v70_v38 = vld [vmem:[%s5685_s0] sm:$0xff]  ;;  %v3739_v45 = vpack.i.bf16 %v4106_v32, %v4111_v35 }
  0x21   :  { %862 = vmatpush.msra.mxu0 %v720_v47 }
  0x22   :  { %1040 = vmatpush.msra.mxu2 %v721_v48 }
  0x23   :  { %863 = vmatpush.msra.mxu0 %v714_v51 }
  0x24   :  { %1041 = vmatpush.msra.mxu2 %v715_v52 }
  0x25   :  { %512 = vrot.lane.b32.xlu0 %v3947_v11, %s3821_s16  ;;  %864 = vmatpush.msra.mxu0 %v708_v55 }
  0x26   :  { %3625 = vrot.lane.b32.xlu2 %v3619_v9, %s3823_s22  ;;  %1042 = vmatpush.msra.mxu2 %v709_v56  ;;  %v3704_v9 = vpack.i.bf16 %v4052_v59, %v4040_v50 }
  0x27   :  { %865 = vmatpush.msra.mxu0 %v702_v57 }
  0x28   :  { %514 = vrot.lane.b32.xlu1 %v3952_v12, %s3821_s16  ;;  %1043 = vmatpush.msra.mxu2 %v703_v58 }
  0x29   :  { %866 = vmatpush.msra.mxu0 %v696_v61  ;;  %v3734_v61 = vpack.i.bf16 %v4111_v35, %v4081_v23 }
  0x2a   :  { %1044 = vmatpush.msra.mxu2 %v697_v62 }
  0x2b   :  { %867 = vmatpush.msra.mxu0 %v690_v63 }
  0x2c   :  { %1045 = vmatpush.msra.mxu2 %v691_v3  ;;  %v752_v3 = vld [vmem:[#allocation2 + $0x250] sm:$0xff] }
  0x2d   :  { %3630 = vrot.lane.b32.xlu0 %v3629_v13, %s3822_s21  ;;  %868 = vmatpush.msra.mxu0 %v684_v6  ;;  %v770_v13 = vld [vmem:[#allocation2 + $0x2e0] sm:$0xff] }
  0x2e   :  { %516 = vrot.lane.b32.xlu2 %v3967_v15, %s3821_s16  ;;  %1046 = vmatpush.msra.mxu2 %v685_v7 }
  0x2f   :  { %1210 = vmatpush.msrb.mxu1 %v770_v13 }
  0x30   :  { %3635 = vrot.lane.b32.xlu1 %v3634_v14, %s3824_s25 }
  0x31   :  { %1211 = vmatpush.msrb.mxu1 %v764_v25  ;;  %v3399_v25 = vld [vmem:[%s5685_s0 + $0xc0] sm:$0xff] }
  0x33   :  { %1212 = vmatpush.msrb.mxu1 %v758_v36 }
  0x35   :  { %518 = vrot.lane.b32.xlu0 %v3975_v16, %s3821_s16  ;;  %1213 = vmatpush.msrb.mxu1 %v752_v3 }
  0x36   :  { %3645 = vrot.lane.b32.xlu2 %v3644_v17, %s3822_s21  ;;  %v679_v17 = vld [vmem:[#allocation2 + $0x8] sm:$0xff] }
  0x37   :  { %1047 = vmatpush.msra.mxu2 %v679_v17 }
  0x38   :  { %3640 = vrot.lane.b32.xlu1 %v3634_v14, %s3823_s22  ;;  %v678_v14 = vld [vmem:[#allocation2] sm:$0xff] }
  0x39   :  { %869 = vmatpush.msra.mxu0 %v678_v14 }
  0x3b   :  { %1388 = vmatpush.msrb.mxu0 %v771_v24  ;;  %v746_v24 = vld [vmem:[#allocation2 + $0x220] sm:$0xff] }
  0x3c   :  { %1214 = vmatpush.msrb.mxu1 %v746_v24 }
  0x3d   :  { %3650 = vrot.lane.b32.xlu0 %v3649_v18, %s3824_s25  ;;  %1389 = vmatpush.msrb.mxu0 %v765_v34  ;;  %v3400_v34 = vld [vmem:[%s5685_s0 + $0xc8] sm:$0xff] }
  0x3e   :  { %522 = vrot.lane.b32.xlu2 %v3994_v20, %s3821_s16 }
  0x40   :  { %520 = vrot.lane.b32.xlu1 %v3988_v19, %s3821_s16 }
  0x45   :  { %3655 = vrot.lane.b32.xlu0 %v3649_v18, %s3823_s22  ;;  %v783_v18 = vld [vmem:[#allocation2 + $0x348] sm:$0xf] }
  0x46   :  { %3665 = vrot.lane.b32.xlu2 %v3664_v21, %s3824_s25  ;;  %3478 = vmatpush.msk.msrb.mxu2 %vm835_vm0, %v783_v18 }
  0x48   :  { %3660 = vrot.lane.b32.xlu1 %v3659_v22, %s3822_s21  ;;  %v3709_v22 = vpack.i.bf16 %v4064_v10, %v4052_v59 }
  0x4d   :  { %524 = vrot.lane.b32.xlu0 %v4010_v30, %s3821_s16 }
  0x4e   :  { %3670 = vrot.lane.b32.xlu2 %v3664_v21, %s3823_s22  ;;  %v4074_v21 = vld [vmem:[%s5685_s0 + $0x98] sm:$0xff] }
  0x4f   :  { %v3719_v26 = vpack.i.bf16 %v4074_v21, %v4064_v10  ;;  %v3724_v27 = vpack.i.bf16 %v4081_v23, %v4074_v21 }
  0x50   :  { %526 = vrot.lane.b32.xlu1 %v4015_v33, %s3821_s16 }
  0x55   :  { %3675 = vrot.lane.b32.xlu0 %v3674_v42, %s3822_s21  ;;  %v759_v42 = vld [vmem:[#allocation2 + $0x288] sm:$0xff] }
  0x56   :  { %528 = vrot.lane.b32.xlu2 %v4032_v49, %s3821_s16  ;;  %1390 = vmatpush.msrb.mxu0 %v759_v42 }
  0x58   :  { %3680 = vrot.lane.b32.xlu1 %v3679_v46, %s3824_s25 }
  0x5d   :  { %530 = vrot.lane.b32.xlu0 %v4040_v50, %s3821_s16 }
  0x5e   :  { %3690 = vrot.lane.b32.xlu2 %v3689_v54, %s3822_s21 }
  0x60   :  { %3685 = vrot.lane.b32.xlu1 %v3679_v46, %s3823_s22 }
  0x65   :  { %3695 = vrot.lane.b32.xlu0 %v3694_v53, %s3824_s25 }
  0x66   :  { %534 = vrot.lane.b32.xlu2 %v4064_v10, %s3821_s16 }
  0x68   :  { %532 = vrot.lane.b32.xlu1 %v4052_v59, %s3821_s16  ;;  %v4094_v28 = vpop.permute.xlu2 %508 }
  0x6d   :  { %3700 = vrot.lane.b32.xlu0 %v3694_v53, %s3823_s22  ;;  %v4137_v53 = vld [vmem:[%s5685_s0 + $0xb8] sm:$0xff] }
  0x6e   :  { %3710 = vrot.lane.b32.xlu2 %v3709_v22, %s3824_s25  ;;  %v3749_v7 = vpack.i.bf16 %v4137_v53, %v4106_v32 }
  0x70   :  { %3705 = vrot.lane.b32.xlu1 %v3704_v9, %s3822_s21  ;;  %v4125_v41 = vpop.permute.xlu2 %510 }
  0x75   :  { %536 = vrot.lane.b32.xlu0 %v4074_v21, %s3821_s16 }
  0x76   :  { %3715 = vrot.lane.b32.xlu2 %v3709_v22, %s3823_s22 }
  0x78   :  { %538 = vrot.lane.b32.xlu1 %v4081_v23, %s3821_s16  ;;  %v3621_v63 = vpop.permute.xlu2 %3620 }
  0x79   :  { %v3622_v14 = vunpack.i.l.bf16 %v3621_v63 }
  0x7d   :  { %3720 = vrot.lane.b32.xlu0 %v3719_v26, %s3822_s21 }
  0x7e   :  { %540 = vrot.lane.b32.xlu2 %v4111_v35, %s3821_s16 }
  0x7f   :  { %v4096_v29 = vpop.permute.xlu0 %506 }
  0x80   :  { %3725 = vrot.lane.b32.xlu1 %v3724_v27, %s3824_s25  ;;  %3404 = vmatmul.msk.f32.vlgmr.msra.gmra.mxu1 %vm786_vm1, %v4096_v29 }
  0x81   :  { %3429 = vmatmul.msk.f32.vlgmr.msra.gmra.mxu3 %vm786_vm1, %v4096_v29 }
  0x82   :  { %v3601_v31 = vpop.permute.xlu1 %3600 }
  0x83   :  { %v3602_v43 = vunpack.i.l.bf16 %v3601_v31  ;;  %v3603_v54 = vunpack.i.h.bf16 %v3601_v31  ;;  %v3626_v31 = vpop.permute.xlu2 %3625 }
  0x85   :  { %542 = vrot.lane.b32.xlu0 %v4106_v32, %s3821_s16 }
  0x86   :  { %3735 = vrot.lane.b32.xlu2 %v3734_v61, %s3822_s21 }
  0x87   :  { %v3596_v37 = vpop.permute.xlu0 %3595 }
  0x88   :  { %3730 = vrot.lane.b32.xlu1 %v3724_v27, %s3823_s22  ;;  %v3598_v39 = vunpack.i.h.bf16 %v3596_v37  ;;  %v3597_v40 = vunpack.i.l.bf16 %v3596_v37  ;;  %3405 = vmatmul.msk.f32.gmra.mxu1 %vm786_vm1, %v4094_v28 }
  0x89   :  { %3430 = vmatmul.msk.f32.gmra.mxu3 %vm786_vm1, %v4094_v28 }
  0x8a   :  { %v3606_v44 = vpop.permute.xlu1 %3605  ;;  %v579_v46 = vsel %vm578_vm2, %v70_v38, %v3597_v40  ;;  %v580_v51 = vsel %vm578_vm2, %v3919_v5, %v3598_v39  ;;  %v4191_v38 = vld [vmem:[%s5685_s0 + $0xd0] sm:$0xff]  ;;  %v3623_v40 = vunpack.i.h.bf16 %v3621_v63 }
  0x8b   :  { %v3607_v47 = vunpack.i.l.bf16 %v3606_v44  ;;  %v604_v48 = vsel %vm603_vm3, %v579_v46, %v3602_v43  ;;  %v3608_v56 = vunpack.i.h.bf16 %v3606_v44  ;;  %v605_v5 = vsel %vm603_vm3, %v580_v51, %v3603_v54  ;;  %v747_v44 = vld [vmem:[#allocation2 + $0x228] sm:$0xff] }
  0x8d   :  { %v629_v52 = vsel %vm628_vm4, %v604_v48, %v3607_v47  ;;  %3740 = vrot.lane.b32.xlu0 %v3739_v45, %s3824_s25  ;;  %v630_v62 = vsel %vm628_vm4, %v605_v5, %v3608_v56 }
  0x8e   :  { %v4141_v55 = vsel %vm653_vm5, %v629_v52, %v4096_v29  ;;  %v4163_v13 = vsel %vm653_vm5, %v630_v62, %v4094_v28  ;;  %546 = vrot.lane.b32.xlu2 %v3399_v25, %s3821_s16  ;;  %v4212_v52 = vpop.permute.xlu2 %516 }
  0x8f   :  { %870 = vmatmul.f32.vlgmr.msra.gmra.mxu0 %v4141_v55  ;;  %1048 = vmatmul.f32.vlgmr.msra.gmra.mxu2 %v4141_v55  ;;  %v3611_v57 = vpop.permute.xlu0 %3610 }
  0x90   :  { %544 = vrot.lane.b32.xlu1 %v4137_v53, %s3821_s16  ;;  %v3612_v58 = vunpack.i.l.bf16 %v3611_v57  ;;  %3406 = vmatmul.msk.f32.gmra.mxu1 %vm786_vm1, %v4125_v41  ;;  %v3613_v22 = vunpack.i.h.bf16 %v3611_v57  ;;  %v3628_v57 = vunpack.i.h.bf16 %v3626_v31 }
  0x91   :  { %3431 = vmatmul.msk.f32.gmra.mxu3 %vm786_vm1, %v4125_v41 }
  0x92   :  { %v3616_v60 = vpop.permute.xlu1 %3615  ;;  %v581_v9 = vsel %vm578_vm2, %v3900_v1, %v3612_v58  ;;  %v753_v1 = vld [vmem:[#allocation2 + $0x258] sm:$0xff]  ;;  %v582_v37 = vsel %vm578_vm2, %v3905_v2, %v3613_v22  ;;  %v3627_v2 = vunpack.i.l.bf16 %v3626_v31  ;;  %v584_v63 = vsel %vm578_vm2, %v3914_v4, %v3628_v57  ;;  %v734_v4 = vld [vmem:[#allocation2 + $0x1c0] sm:$0xff] }
  0x93   :  { %v3617_v6 = vunpack.i.l.bf16 %v3616_v60  ;;  %1391 = vmatpush.msrb.mxu0 %v753_v1  ;;  %v3618_v36 = vunpack.i.h.bf16 %v3616_v60 }
  0x94   :  { %v583_v51 = vsel %vm578_vm2, %v3895_v0, %v3627_v2  ;;  %v740_v0 = vld [vmem:[#allocation2 + $0x1f0] sm:$0xff] }
  0x95   :  { %3745 = vrot.lane.b32.xlu0 %v3739_v45, %s3823_s22  ;;  %v606_v17 = vsel %vm603_vm3, %v581_v9, %v3617_v6  ;;  %v607_v42 = vsel %vm603_vm3, %v582_v37, %v3618_v36  ;;  %v3754_v45 = vpack.i.bf16 %v3399_v25, %v4137_v53  ;;  %1392 = vmatpush.msrb.mxu0 %v747_v44  ;;  %v741_v9 = vld [vmem:[#allocation2 + $0x1f8] sm:$0xff] }
  0x96   :  { %v631_v27 = vsel %vm628_vm4, %v606_v17, %v3622_v14  ;;  %v632_v46 = vsel %vm628_vm4, %v607_v42, %v3623_v40  ;;  %1215 = vmatpush.msrb.mxu1 %v740_v0  ;;  %v3402_v36 = vld [vmem:[%s5685_s0 + $0xd8] sm:$0xff]  ;;  %v735_v42 = vld [vmem:[#allocation2 + $0x1c8] sm:$0xff] }
  0x97   :  { %873 = vmatmul.f32.gmra.mxu0 %v4163_v13  ;;  %1051 = vmatmul.f32.gmra.mxu2 %v4163_v13  ;;  %v4169_v18 = vpop.permute.xlu0 %512  ;;  %v4195_v39 = vsel %vm653_vm5, %v631_v27, %v4125_v41 }
  0x98   :  { %3750 = vrot.lane.b32.xlu1 %v3749_v7, %s3822_s21  ;;  %3407 = vmatmul.msk.f32.gmra.mxu1 %vm786_vm1, %v4169_v18  ;;  %v4216_v54 = vsel %vm653_vm5, %v632_v46, %v4169_v18  ;;  %v3646_v7 = vpop.permute.xlu2 %3645 }
  0x99   :  { %3432 = vmatmul.msk.f32.gmra.mxu3 %vm786_vm1, %v4169_v18  ;;  %3755 = vrot.lane.b32.xlu2 %v3754_v45, %s3824_s25  ;;  %v3647_v24 = vunpack.i.l.bf16 %v3646_v7  ;;  %v3648_v44 = vunpack.i.h.bf16 %v3646_v7 }
  0x9a   :  { %v4179_v26 = vpop.permute.xlu1 %514  ;;  %1393 = vmatpush.msrb.mxu0 %v741_v9  ;;  %1216 = vmatpush.msrb.mxu1 %v734_v4  ;;  %v722_v9 = vld [vmem:[#allocation2 + $0x160] sm:$0xff] }
  0x9c   :  { %1394 = vmatpush.msrb.mxu0 %v735_v42 }
  0x9d   :  { %548 = vrot.lane.b32.xlu0 %v3400_v34, %s3821_s16 }
  0x9f   :  { %876 = vmatmul.f32.gmra.mxu0 %v4195_v39  ;;  %1054 = vmatmul.f32.gmra.mxu2 %v4195_v39  ;;  %v3631_v43 = vpop.permute.xlu0 %3630 }
  0xa0   :  { %550 = vrot.lane.b32.xlu1 %v4191_v38, %s3821_s16  ;;  %3408 = vmatmul.msk.f32.gmra.mxu1 %vm786_vm1, %v4179_v26  ;;  %v3632_v47 = vunpack.i.l.bf16 %v3631_v43  ;;  %v3633_v61 = vunpack.i.h.bf16 %v3631_v43  ;;  %v4263_v40 = vpop.permute.xlu2 %522 }
  0xa1   :  { %3433 = vmatmul.msk.f32.gmra.mxu3 %vm786_vm1, %v4179_v26  ;;  %262 = vrot.lane.b32.xlu2 %v4137_v53, %s3823_s22 }
  0xa2   :  { %v3636_v48 = vpop.permute.xlu1 %3635  ;;  %v608_v5 = vsel %vm603_vm3, %v583_v51, %v3632_v47  ;;  %v609_v14 = vsel %vm603_vm3, %v584_v63, %v3633_v61 }
  0xa3   :  { %v3637_v56 = vunpack.i.l.bf16 %v3636_v48  ;;  %v3638_v6 = vunpack.i.h.bf16 %v3636_v48  ;;  %v728_v48 = vld [vmem:[#allocation2 + $0x190] sm:$0xff] }
  0xa4   :  { %1217 = vmatpush.msrb.mxu1 %v728_v48 }
  0xa5   :  { %358 = vrot.lane.b32.xlu0 %v3399_v25, %s3822_s21  ;;  %v633_v60 = vsel %vm628_vm4, %v608_v5, %v3637_v56  ;;  %v634_v22 = vsel %vm628_vm4, %v609_v14, %v3638_v6  ;;  %v777_v14 = vld [vmem:[#allocation2 + $0x318] sm:$0xff] }
  0xa6   :  { %v4236_v3 = vsel %vm653_vm5, %v633_v60, %v4179_v26  ;;  %v4254_v31 = vsel %vm653_vm5, %v634_v22, %v4212_v52  ;;  %1218 = vmatpush.msrb.mxu1 %v722_v9  ;;  %1492 = vmatpush.msrb.mxu2 %v777_v14 }
  0xa7   :  { %879 = vmatmul.f32.gmra.mxu0 %v4216_v54  ;;  %1057 = vmatmul.f32.gmra.mxu2 %v4216_v54  ;;  %v4223_v58 = vpop.permute.xlu0 %518 }
  0xa8   :  { %454 = vrot.lane.b32.xlu1 %v3400_v34, %s3824_s25  ;;  %3409 = vmatmul.msk.f32.gmra.mxu1 %vm786_vm1, %v4212_v52  ;;  %v3666_v0 = vpop.permute.xlu2 %3665 }
  0xa9   :  { %3434 = vmatmul.msk.f32.gmra.mxu3 %vm786_vm1, %v4212_v52  ;;  %552 = vrot.lane.b32.xlu2 %v3402_v36, %s3821_s16  ;;  %v3667_v63 = vunpack.i.l.bf16 %v3666_v0 }
  0xaa   :  { %v3641_v62 = vpop.permute.xlu1 %3640 }
  0xab   :  { %v3642_v17 = vunpack.i.l.bf16 %v3641_v62 }
  0xad   :  { %264 = vrot.lane.b32.xlu0 %v3399_v25, %s3823_s22  ;;  %v585_v25 = vsel %vm578_vm2, %v3932_v8, %v3642_v17  ;;  %v3643_v8 = vunpack.i.h.bf16 %v3641_v62 }
  0xae   :  { %v610_v37 = vsel %vm603_vm3, %v585_v25, %v3647_v24 }
  0xaf   :  { %882 = vmatmul.f32.gmra.mxu0 %v4236_v3  ;;  %1060 = vmatmul.f32.gmra.mxu2 %v4236_v3  ;;  %v3651_v1 = vpop.permute.xlu0 %3650  ;;  %v586_v45 = vsel %vm578_vm2, %v3947_v11, %v3643_v8  ;;  %v776_v11 = vld [vmem:[#allocation2 + $0x310] sm:$0xff] }
  0xb0   :  { %360 = vrot.lane.b32.xlu1 %v3400_v34, %s3822_s21  ;;  %3410 = vmatmul.msk.f32.gmra.mxu1 %vm786_vm1, %v4223_v58  ;;  %v3652_v34 = vunpack.i.l.bf16 %v3651_v1  ;;  %v3653_v47 = vunpack.i.h.bf16 %v3651_v1  ;;  %v611_v51 = vsel %vm603_vm3, %v586_v45, %v3648_v44  ;;  %v3671_v22 = vpop.permute.xlu2 %3670 }
  0xb1   :  { %3435 = vmatmul.msk.f32.gmra.mxu3 %vm786_vm1, %v4223_v58  ;;  %456 = vrot.lane.b32.xlu2 %v4191_v38, %s3824_s25  ;;  %v3672_v8 = vunpack.i.l.bf16 %v3671_v22 }
  0xb2   :  { %v4250_v27 = vpop.permute.xlu1 %520  ;;  %v635_v43 = vsel %vm628_vm4, %v610_v37, %v3652_v34  ;;  %1314 = vmatpush.msrb.mxu3 %v776_v11  ;;  %v636_v57 = vsel %vm628_vm4, %v611_v51, %v3653_v47  ;;  %v3668_v34 = vunpack.i.h.bf16 %v3666_v0 }
  0xb3   :  { %v4274_v46 = vsel %vm653_vm5, %v635_v43, %v4223_v58  ;;  %v4292_v38 = vsel %vm653_vm5, %v636_v57, %v4250_v27  ;;  %v589_v44 = vsel %vm578_vm2, %v3975_v16, %v3672_v8  ;;  %v716_v16 = vld [vmem:[#allocation2 + $0x130] sm:$0xff] }
  0xb4   :  { %1219 = vmatpush.msrb.mxu1 %v716_v16 }
  0xb7   :  { %885 = vmatmul.f32.gmra.mxu0 %v4254_v31  ;;  %1063 = vmatmul.f32.gmra.mxu2 %v4254_v31  ;;  %v3656_v2 = vpop.permute.xlu0 %3655 }
  0xb8   :  { %3411 = vmatmul.msk.f32.gmra.mxu1 %vm786_vm1, %v4250_v27  ;;  %v3657_v5 = vunpack.i.l.bf16 %v3656_v2  ;;  %v3658_v7 = vunpack.i.h.bf16 %v3656_v2  ;;  %v4320_v45 = vpop.permute.xlu2 %528 }
  0xb9   :  { %3436 = vmatmul.msk.f32.gmra.mxu3 %vm786_vm1, %v4250_v27 }
  0xba   :  { %v3661_v56 = vpop.permute.xlu1 %3660  ;;  %v587_v61 = vsel %vm578_vm2, %v3952_v12, %v3657_v5  ;;  %v729_v12 = vld [vmem:[#allocation2 + $0x198] sm:$0xff]  ;;  %v588_v24 = vsel %vm578_vm2, %v3967_v15, %v3658_v7  ;;  %v723_v15 = vld [vmem:[#allocation2 + $0x168] sm:$0xff] }
  0xbb   :  { %v3662_v60 = vunpack.i.l.bf16 %v3661_v56  ;;  %1395 = vmatpush.msrb.mxu0 %v729_v12  ;;  %v3663_v1 = vunpack.i.h.bf16 %v3661_v56  ;;  %v3673_v56 = vunpack.i.h.bf16 %v3671_v22  ;;  %v710_v22 = vld [vmem:[#allocation2 + $0x100] sm:$0xff] }
  0xbc   :  { %1220 = vmatpush.msrb.mxu1 %v710_v22 }
  0xbd   :  { %v612_v6 = vsel %vm603_vm3, %v587_v61, %v3662_v60  ;;  %v613_v37 = vsel %vm603_vm3, %v588_v24, %v3663_v1  ;;  %1396 = vmatpush.msrb.mxu0 %v723_v15  ;;  %v590_v60 = vsel %vm578_vm2, %v3988_v19, %v3673_v56  ;;  %v717_v19 = vld [vmem:[#allocation2 + $0x138] sm:$0xff] }
  0xbe   :  { %v637_v4 = vsel %vm628_vm4, %v612_v6, %v3667_v63  ;;  %v638_v42 = vsel %vm628_vm4, %v613_v37, %v3668_v34 }
  0xbf   :  { %888 = vmatmul.f32.gmra.mxu0 %v4274_v46  ;;  %1066 = vmatmul.f32.gmra.mxu2 %v4274_v46  ;;  %v4288_v62 = vpop.permute.xlu0 %524  ;;  %v4308_v25 = vsel %vm653_vm5, %v637_v4, %v4263_v40 }
  0xc0   :  { %3412 = vmatmul.msk.f32.gmra.mxu1 %vm786_vm1, %v4263_v40  ;;  %v4324_v47 = vsel %vm653_vm5, %v638_v42, %v4288_v62  ;;  %v3691_v6 = vpop.permute.xlu2 %3690  ;;  %1397 = vmatpush.msrb.mxu0 %v717_v19 }
  0xc1   :  { %3437 = vmatmul.msk.f32.gmra.mxu3 %vm786_vm1, %v4263_v40  ;;  %v3692_v4 = vunpack.i.l.bf16 %v3691_v6 }
  0xc2   :  { %v4301_v17 = vpop.permute.xlu1 %526 }
  0xc7   :  { %891 = vmatmul.f32.gmra.mxu0 %v4292_v38  ;;  %1069 = vmatmul.f32.gmra.mxu2 %v4292_v38  ;;  %v3676_v36 = vpop.permute.xlu0 %3675 }
  0xc8   :  { %3413 = vmatmul.msk.f32.gmra.mxu1 %vm786_vm1, %v4288_v62  ;;  %v3677_v43 = vunpack.i.l.bf16 %v3676_v36  ;;  %v3678_v57 = vunpack.i.h.bf16 %v3676_v36  ;;  %v4361_v15 = vpop.permute.xlu2 %534 }
  0xc9   :  { %3438 = vmatmul.msk.f32.gmra.mxu3 %vm786_vm1, %v4288_v62  ;;  %5727 = vst [vmem:[#allocation9_spill] sm:$0xff] %v4361_v15 }
  0xca   :  { %v3681_v2 = vpop.permute.xlu1 %3680  ;;  %v614_v51 = vsel %vm603_vm3, %v589_v44, %v3677_v43  ;;  %v615_v7 = vsel %vm603_vm3, %v590_v60, %v3678_v57  ;;  %v3693_v43 = vunpack.i.h.bf16 %v3691_v6  ;;  %v711_v44 = vld [vmem:[#allocation2 + $0x108] sm:$0xff] }
  0xcb   :  { %v3682_v48 = vunpack.i.l.bf16 %v3681_v2  ;;  %v3683_v63 = vunpack.i.h.bf16 %v3681_v2  ;;  %1398 = vmatpush.msrb.mxu0 %v711_v44 }
  0xcd   :  { %v639_v11 = vsel %vm628_vm4, %v614_v51, %v3682_v48  ;;  %v640_v9 = vsel %vm628_vm4, %v615_v7, %v3683_v63 }
  0xce   :  { %v4340_v61 = vsel %vm653_vm5, %v639_v11, %v4301_v17  ;;  %v4356_v34 = vsel %vm653_vm5, %v640_v9, %v4320_v45 }
  0xcf   :  { %894 = vmatmul.f32.gmra.mxu0 %v4308_v25  ;;  %1072 = vmatmul.f32.gmra.mxu2 %v4308_v25  ;;  %v4329_v5 = vpop.permute.xlu0 %530 }
  0xd0   :  { %3414 = vmatmul.msk.f32.gmra.mxu1 %vm786_vm1, %v4301_v17 }
  0xd1   :  { %3439 = vmatmul.msk.f32.gmra.mxu3 %vm786_vm1, %v4301_v17 }
  0xd2   :  { %v3686_v0 = vpop.permute.xlu1 %3685 }
  0xd3   :  { %v3687_v12 = vunpack.i.l.bf16 %v3686_v0  ;;  %v3688_v8 = vunpack.i.h.bf16 %v3686_v0  ;;  %v3711_v0 = vpop.permute.xlu2 %3710 }
  0xd5   :  { %v591_v1 = vsel %vm578_vm2, %v3994_v20, %v3687_v12  ;;  %v592_v2 = vsel %vm578_vm2, %v4010_v30, %v3688_v8  ;;  %v704_v30 = vld [vmem:[#allocation2 + $0xd0] sm:$0xff]  ;;  %v3712_v12 = vunpack.i.l.bf16 %v3711_v0 }
  0xd6   :  { %v616_v37 = vsel %vm603_vm3, %v591_v1, %v3692_v4  ;;  %v617_v56 = vsel %vm603_vm3, %v592_v2, %v3693_v43  ;;  %1221 = vmatpush.msrb.mxu1 %v704_v30 }
  0xd7   :  { %897 = vmatmul.f32.gmra.mxu0 %v4324_v47  ;;  %1075 = vmatmul.f32.gmra.mxu2 %v4324_v47  ;;  %v3696_v14 = vpop.permute.xlu0 %3695 }
  0xd8   :  { %3415 = vmatmul.msk.f32.gmra.mxu1 %vm786_vm1, %v4320_v45  ;;  %v3697_v36 = vunpack.i.l.bf16 %v3696_v14  ;;  %v3698_v51 = vunpack.i.h.bf16 %v3696_v14 }
  0xd9   :  { %3440 = vmatmul.msk.f32.gmra.mxu3 %vm786_vm1, %v4320_v45 }
  0xda   :  { %v4352_v24 = vpop.permute.xlu1 %532  ;;  %v641_v20 = vsel %vm628_vm4, %v616_v37, %v3697_v36  ;;  %v642_v57 = vsel %vm628_vm4, %v617_v56, %v3698_v51  ;;  %v698_v37 = vld [vmem:[#allocation2 + $0xa0] sm:$0xff] }
  0xdb   :  { %5726 = vst [vmem:[#allocation8_spill] sm:$0xff] %v4352_v24  ;;  %v4372_v48 = vsel %vm653_vm5, %v641_v20, %v4329_v5  ;;  %v4388_v7 = vsel %vm653_vm5, %v642_v57, %v4352_v24  ;;  %v3716_v22 = vpop.permute.xlu2 %3715  ;;  %1222 = vmatpush.msrb.mxu1 %v698_v37  ;;  %v699_v57 = vld [vmem:[#allocation2 + $0xa8] sm:$0xff] }
  0xdc   :  { %v3717_v44 = vunpack.i.l.bf16 %v3716_v22 }
  0xdf   :  { %900 = vmatmul.f32.gmra.mxu0 %v4340_v61  ;;  %1078 = vmatmul.f32.gmra.mxu2 %v4340_v61  ;;  %v3701_v42 = vpop.permute.xlu0 %3700 }
  0xe0   :  { %3416 = vmatmul.msk.f32.gmra.mxu1 %vm786_vm1, %v4329_v5  ;;  %v3702_v11 = vunpack.i.l.bf16 %v3701_v42  ;;  %v3703_v9 = vunpack.i.h.bf16 %v3701_v42  ;;  %v3713_v42 = vunpack.i.h.bf16 %v3711_v0 }
  0xe1   :  { %3441 = vmatmul.msk.f32.gmra.mxu3 %vm786_vm1, %v4329_v5 }
  0xe2   :  { %v3706_v16 = vpop.permute.xlu1 %3705  ;;  %v593_v63 = vsel %vm578_vm2, %v4015_v33, %v3702_v11  ;;  %v705_v33 = vld [vmem:[#allocation2 + $0xd8] sm:$0xff]  ;;  %v594_v36 = vsel %vm578_vm2, %v4032_v49, %v3703_v9  ;;  %v595_v11 = vsel %vm578_vm2, %v4040_v50, %v3717_v44  ;;  %v692_v50 = vld [vmem:[#allocation2 + $0x70] sm:$0xff] }
  0xe3   :  { %v3707_v60 = vunpack.i.l.bf16 %v3706_v16  ;;  %1399 = vmatpush.msrb.mxu0 %v705_v33  ;;  %v3708_v1 = vunpack.i.h.bf16 %v3706_v16  ;;  %v4418_v30 = vpop.permute.xlu2 %540  ;;  %1223 = vmatpush.msrb.mxu1 %v692_v50 }
  0xe4   :  { %5732 = vst [vmem:[#allocation14_spill] sm:$0xff] %v4418_v30 }
  0xe5   :  { %v618_v19 = vsel %vm603_vm3, %v593_v63, %v3707_v60  ;;  %v619_v2 = vsel %vm603_vm3, %v594_v36, %v3708_v1  ;;  %1400 = vmatpush.msrb.mxu0 %v699_v57 }
  0xe6   :  { %v643_v4 = vsel %vm628_vm4, %v618_v19, %v3712_v12  ;;  %v644_v49 = vsel %vm628_vm4, %v619_v2, %v3713_v42  ;;  %v3718_v19 = vunpack.i.h.bf16 %v3716_v22 }
  0xe7   :  { %903 = vmatmul.f32.gmra.mxu0 %v4356_v34  ;;  %1081 = vmatmul.f32.gmra.mxu2 %v4356_v34  ;;  %v4384_v6 = vpop.permute.xlu0 %536  ;;  %v4406_v20 = vsel %vm653_vm5, %v643_v4, %v4361_v15 }
  0xe8   :  { %3417 = vmatmul.msk.f32.gmra.mxu1 %vm786_vm1, %v4352_v24  ;;  %5728 = vst [vmem:[#allocation10_spill] sm:$0xff] %v4384_v6  ;;  %v4424_v60 = vsel %vm653_vm5, %v644_v49, %v4384_v6  ;;  %v596_v37 = vsel %vm578_vm2, %v4052_v59, %v3718_v19  ;;  %v693_v59 = vld [vmem:[#allocation2 + $0x78] sm:$0xff] }
  0xe9   :  { %3442 = vmatmul.msk.f32.gmra.mxu3 %vm786_vm1, %v4352_v24  ;;  %5731 = vst [vmem:[#allocation13_spill] sm:$0xff] %v4406_v20  ;;  %1401 = vmatpush.msrb.mxu0 %v693_v59 }
  0xea   :  { %v4397_v14 = vpop.permute.xlu1 %538  ;;  %5734 = vst [vmem:[#allocation16_spill] sm:$0xff] %v4424_v60 }
  0xeb   :  { %5729 = vst [vmem:[#allocation11_spill] sm:$0xff] %v4397_v14  ;;  %v3736_v49 = vpop.permute.xlu2 %3735 }
  0xef   :  { %906 = vmatmul.f32.gmra.mxu0 %v4372_v48  ;;  %1084 = vmatmul.f32.gmra.mxu2 %v4372_v48  ;;  %v3721_v43 = vpop.permute.xlu0 %3720 }
  0xf0   :  { %3418 = vmatmul.msk.f32.gmra.mxu1 %vm786_vm1, %v4361_v15  ;;  %v3722_v51 = vunpack.i.l.bf16 %v3721_v43  ;;  %v3723_v4 = vunpack.i.h.bf16 %v3721_v43 }
  0xf1   :  { %3443 = vmatmul.msk.f32.gmra.mxu3 %vm786_vm1, %v4361_v15 }
  0xf2   :  { %v3726_v56 = vpop.permute.xlu1 %3725  ;;  %v620_v12 = vsel %vm603_vm3, %v595_v11, %v3722_v51  ;;  %v621_v43 = vsel %vm603_vm3, %v596_v37, %v3723_v4  ;;  %v686_v4 = vld [vmem:[#allocation2 + $0x40] sm:$0xff] }
  0xf3   :  { %v3727_v63 = vunpack.i.l.bf16 %v3726_v56  ;;  %v3728_v44 = vunpack.i.h.bf16 %v3726_v56  ;;  %1224 = vmatpush.msrb.mxu1 %v686_v4  ;;  %v3738_v4 = vunpack.i.h.bf16 %v3736_v49 }
  0xf5   :  { %v645_v33 = vsel %vm628_vm4, %v620_v12, %v3727_v63  ;;  %v646_v57 = vsel %vm628_vm4, %v621_v43, %v3728_v44  ;;  %v3737_v12 = vunpack.i.l.bf16 %v3736_v49 }
  0xf6   :  { %v4444_v2 = vsel %vm653_vm5, %v645_v33, %v4397_v14 }
  0xf7   :  { %909 = vmatmul.f32.gmra.mxu0 %v4388_v7  ;;  %1087 = vmatmul.f32.gmra.mxu2 %v4388_v7  ;;  %v4429_v9 = vpop.permute.xlu0 %542  ;;  %5737 = vst [vmem:[#allocation19_spill] sm:$0xff] %v4444_v2 }
  0xf8   :  { %3419 = vmatmul.msk.f32.gmra.mxu1 %vm786_vm1, %v4384_v6  ;;  %5735 = vst [vmem:[#allocation17_spill] sm:$0xff] %v4429_v9 }
  0xf9   :  { %3444 = vmatmul.msk.f32.gmra.mxu3 %vm786_vm1, %v4384_v6 }
  0xfa   :  { %v3731_v22 = vpop.permute.xlu1 %3730 }
  0xfb   :  { %v3732_v51 = vunpack.i.l.bf16 %v3731_v22  ;;  %v3733_v43 = vunpack.i.h.bf16 %v3731_v22 }
  0xfd   :  { %v4402_v8 = vpop.f32.mrf.mxu1  ;;  %v597_v33 = vsel %vm578_vm2, %v4064_v10, %v3732_v51  ;;  %v598_v22 = vsel %vm578_vm2, %v4074_v21, %v3733_v43 }
  0xfe   :  { %5730 = vst [vmem:[#allocation12_spill] sm:$0xff] %v4402_v8  ;;  %v623_v49 = vsel %vm603_vm3, %v598_v22, %v3738_v4 }
  0xff   :  { %912 = vmatmul.f32.gmra.mxu0 %v4406_v20  ;;  %1090 = vmatmul.f32.gmra.mxu2 %v4406_v20  ;;  %v3741_v56 = vpop.permute.xlu0 %3740 }
 0x100   :  { %3420 = vmatmul.msk.f32.gmra.mxu1 %vm786_vm1, %v4397_v14  ;;  %v3742_v59 = vunpack.i.l.bf16 %v3741_v56  ;;  %v3743_v8 = vunpack.i.h.bf16 %v3741_v56 }
 0x101   :  { %3445 = vmatmul.msk.f32.gmra.mxu3 %vm786_vm1, %v4397_v14 }
 0x102   :  { %v4466_v44 = vpop.permute.xlu1 %544  ;;  %v648_v43 = vsel %vm628_vm4, %v623_v49, %v3743_v8  ;;  %v784_v8 = vld [vmem:[#allocation2 + $0x350] sm:$0xf] }
 0x103   :  { %5742 = vst [vmem:[#allocation24_spill] sm:$0xff] %v4466_v44  ;;  %3503 = vmatpush.msk.msra.mxu3 %vm835_vm0, %v784_v8 }
 0x104   :  { %v1138_v16 = vpop.f32.mrf.mxu3 }
 0x105   :  { %v4420_v0 = vpop.f32.mrf.mxu1 }
 0x106   :  { %5733 = vst [vmem:[#allocation15_spill] sm:$0xff] %v4420_v0 }
 0x107   :  { %915 = vmatmul.f32.gmra.mxu0 %v4424_v60  ;;  %1093 = vmatmul.f32.gmra.mxu2 %v4424_v60 }
 0x108   :  { %3421 = vmatmul.msk.f32.gmra.mxu1 %vm786_vm1, %v4418_v30 }
 0x109   :  { %3446 = vmatmul.msk.f32.gmra.mxu3 %vm786_vm1, %v4418_v30 }
 0x10a   :  { %v3751_v21 = vpop.permute.xlu1 %3750 }
 0x10c   :  { %v4436_v1 = vpop.f32.mrf.mxu0  ;;  %v1141_v36 = vpop.f32.mrf.mxu3 }
 0x10d   :  { %v4440_v42 = vpop.f32.mrf.mxu1 }
 0x10e   :  { %5736 = vst [vmem:[#allocation18_spill] sm:$0xff] %v4440_v42  ;;  %v4464_v42 = vsel %vm653_vm5, %v646_v57, %v4418_v30 }
 0x10f   :  { %918 = vmatmul.f32.gmra.mxu0 %v4444_v2  ;;  %1096 = vmatmul.f32.gmra.mxu2 %v4444_v2  ;;  %5741 = vst [vmem:[#allocation23_spill] sm:$0xff] %v4464_v42 }
 0x110   :  { %3422 = vmatmul.msk.f32.gmra.mxu1 %vm786_vm1, %v4429_v9 }
 0x111   :  { %3447 = vmatmul.msk.f32.gmra.mxu3 %vm786_vm1, %v4429_v9 }
 0x112   :  { %v1049_v11 = vpop.f32.mrf.mxu2 }
 0x113   :  { %v4454_v63 = vadd.f32 %v1138_v16, %v1049_v11  ;;  %v622_v16 = vsel %vm603_vm3, %v597_v33, %v3737_v12  ;;  %v4471_v11 = vpop.permute.xlu2 %546  ;;  %v687_v12 = vld [vmem:[#allocation2 + $0x48] sm:$0xff]  ;;  %v3746_v33 = vpop.permute.xlu0 %3745 }
 0x114   :  { %v4456_v19 = vpop.f32.mrf.mxu0  ;;  %v1144_v50 = vpop.f32.mrf.mxu3  ;;  %v647_v51 = vsel %vm628_vm4, %v622_v16, %v3742_v59  ;;  %1402 = vmatpush.msrb.mxu0 %v687_v12  ;;  %v3747_v59 = vunpack.i.l.bf16 %v3746_v33  ;;  %v3748_v49 = vunpack.i.h.bf16 %v3746_v33 }
 0x115   :  { %5738 = vst [vmem:[#allocation20_spill] sm:$0xff] %v4454_v63  ;;  %v4460_v37 = vpop.f32.mrf.mxu1 }
 0x116   :  { %5739 = vst [vmem:[#allocation21_spill] sm:$0xff] %v4456_v19  ;;  %v4488_v19 = vsel %vm653_vm5, %v647_v51, %v4429_v9  ;;  %v3752_v51 = vunpack.i.l.bf16 %v3751_v21  ;;  %v599_v4 = vsel %vm578_vm2, %v4081_v23, %v3747_v59  ;;  %v4520_v23 = vpop.permute.xlu1 %550  ;;  %v681_v59 = vld [vmem:[#allocation2 + $0x18] sm:$0xff]  ;;  %v600_v8 = vsel %vm578_vm2, %v4111_v35, %v3748_v49 }
 0x117   :  { %5740 = vst [vmem:[#allocation22_spill] sm:$0xff] %v4460_v37  ;;  %921 = vmatmul.f32.gmra.mxu0 %v4464_v42  ;;  %1099 = vmatmul.f32.gmra.mxu2 %v4464_v42 }
 0x118   :  { %3423 = vmatmul.msk.f32.gmra.mxu1 %vm786_vm1, %v4466_v44  ;;  %1403 = vmatpush.msrb.mxu0 %v681_v59 }
 0x119   :  { %3448 = vmatmul.msk.f32.gmra.mxu3 %vm786_vm1, %v4466_v44 }
 0x11a   :  { %v1052_v10 = vpop.f32.mrf.mxu2 }
 0x11b   :  { %v4478_v57 = vadd.f32 %v1141_v36, %v1052_v10  ;;  %v680_v36 = vld [vmem:[#allocation2 + $0x10] sm:$0xff]  ;;  %v3756_v56 = vpop.permute.xlu2 %3755 }
 0x11c   :  { %v4480_v63 = vpop.f32.mrf.mxu0  ;;  %v1147_v37 = vpop.f32.mrf.mxu3  ;;  %1225 = vmatpush.msrb.mxu1 %v680_v36  ;;  %v4508_v36 = vsel %vm653_vm5, %v648_v43, %v4466_v44  ;;  %v3758_v59 = vunpack.i.h.bf16 %v3756_v56 }
 0x11d   :  { %5743 = vst [vmem:[#allocation25_spill] sm:$0xff] %v4478_v57  ;;  %v4484_v0 = vpop.f32.mrf.mxu1 }
 0x11e   :  { %5744 = vst [vmem:[#allocation26_spill] sm:$0xff] %v4480_v63  ;;  %v3757_v63 = vunpack.i.l.bf16 %v3756_v56  ;;  %v455_v56 = vpop.permute.xlu1 %454 }
 0x11f   :  { %5745 = vst [vmem:[#allocation27_spill] sm:$0xff] %v4484_v0  ;;  %924 = vmatmul.f32.gmra.mxu0 %v4488_v19  ;;  %1102 = vmatmul.f32.gmra.mxu2 %v4488_v19  ;;  %v4510_v0 = vpop.permute.xlu0 %548 }
 0x120   :  { %3424 = vmatmul.msk.f32.gmra.mxu1 %vm786_vm1, %v4471_v11  ;;  %5749 = vst [vmem:[#allocation31_spill] sm:$0xff] %v4508_v36 }
 0x121   :  { %3449 = vmatmul.msk.f32.gmra.mxu3 %vm786_vm1, %v4471_v11 }
 0x122   :  { %v1055_v16 = vpop.f32.mrf.mxu2 }
 0x123   :  { %v4498_v10 = vadd.f32 %v1144_v50, %v1055_v16  ;;  %v624_v50 = vsel %vm603_vm3, %v599_v4, %v3752_v51  ;;  %v3753_v51 = vunpack.i.h.bf16 %v3751_v21 }
 0x124   :  { %v4500_v12 = vpop.f32.mrf.mxu0  ;;  %v1150_v57 = vpop.f32.mrf.mxu3  ;;  %v649_v43 = vsel %vm628_vm4, %v624_v50, %v3757_v63  ;;  %v785_v63 = vld [vmem:[#allocation2 + $0x358] sm:$0xf] }
 0x125   :  { %5746 = vst [vmem:[#allocation28_spill] sm:$0xff] %v4498_v10  ;;  %v4504_v22 = vpop.f32.mrf.mxu1  ;;  %3528 = vmatpush.msk.msra.mxu2 %vm835_vm0, %v785_v63 }
 0x126   :  { %5747 = vst [vmem:[#allocation29_spill] sm:$0xff] %v4500_v12  ;;  %v772_v12 = vld [vmem:[#allocation2 + $0x2f0] sm:$0xff] }
 0x127   :  { %5748 = vst [vmem:[#allocation30_spill] sm:$0xff] %v4504_v22  ;;  %927 = vmatmul.f32.gmra.mxu0 %v4508_v36  ;;  %1105 = vmatmul.f32.gmra.mxu2 %v4508_v36  ;;  %v263_v22 = vpop.permute.xlu2 %262  ;;  %v4533_v36 = vsel %vm653_vm5, %v649_v43, %v4471_v11  ;;  %v359_v21 = vpop.permute.xlu0 %358 }
 0x128   :  { %3425 = vmatmul.msk.f32.gmra.mxu1 %vm786_vm1, %v4510_v0  ;;  %v601_v43 = vsel %vm578_vm2, %v4106_v32, %v263_v22  ;;  %v766_v32 = vld [vmem:[#allocation2 + $0x2c0] sm:$0xff] }
 0x129   :  { %3450 = vmatmul.msk.f32.gmra.mxu3 %vm786_vm1, %v4510_v0  ;;  %1566 = vmatpush.msra.mxu1 %v772_v12 }
 0x12a   :  { %v1058_v16 = vpop.f32.mrf.mxu2 }
 0x12b   :  { %v4523_v10 = vadd.f32 %v1147_v37, %v1058_v16  ;;  %v625_v37 = vsel %vm603_vm3, %v600_v8, %v3753_v51  ;;  %v773_v51 = vld [vmem:[#allocation2 + $0x2f8] sm:$0xff]  ;;  %1567 = vmatpush.msra.mxu1 %v766_v32 }
 0x12c   :  { %v4525_v4 = vpop.f32.mrf.mxu0  ;;  %v1153_v33 = vpop.f32.mrf.mxu3  ;;  %v650_v12 = vsel %vm628_vm4, %v625_v37, %v3758_v59  ;;  %1744 = vmatpush.msra.mxu0 %v773_v51 }
 0x12d   :  { %5750 = vst [vmem:[#allocation32_spill] sm:$0xff] %v4523_v10  ;;  %v4529_v44 = vpop.f32.mrf.mxu1  ;;  %v4556_v10 = vsel %vm653_vm5, %v650_v12, %v4510_v0 }
 0x12f   :  { %930 = vmatmul.f32.gmra.mxu0 %v4533_v36  ;;  %1108 = vmatmul.f32.gmra.mxu2 %v4533_v36  ;;  %v4550_v8 = vpop.permute.xlu2 %552  ;;  %v265_v22 = vpop.permute.xlu0 %264 }
 0x130   :  { %3426 = vmatmul.msk.f32.gmra.mxu1 %vm786_vm1, %v4520_v23 }
 0x131   :  { %3451 = vmatmul.msk.f32.gmra.mxu3 %vm786_vm1, %v4520_v23 }
 0x132   :  { %v1061_v35 = vpop.f32.mrf.mxu2 }
 0x133   :  { %v4544_v50 = vadd.f32 %v1150_v57, %v1061_v35  ;;  %v626_v57 = vsel %vm603_vm3, %v601_v43, %v359_v21  ;;  %v602_v21 = vsel %vm578_vm2, %v4137_v53, %v265_v22  ;;  %v361_v43 = vpop.permute.xlu1 %360  ;;  %v767_v53 = vld [vmem:[#allocation2 + $0x2c8] sm:$0xff] }
 0x134   :  { %v4546_v49 = vpop.f32.mrf.mxu0  ;;  %v1156_v16 = vpop.f32.mrf.mxu3  ;;  %v651_v37 = vsel %vm628_vm4, %v626_v57, %v455_v56  ;;  %1745 = vmatpush.msra.mxu0 %v767_v53 }
 0x135   :  { %5751 = vst [vmem:[#allocation33_spill] sm:$0xff] %v4544_v50  ;;  %v4552_v63 = vpop.f32.mrf.mxu1  ;;  %v4574_v50 = vsel %vm653_vm5, %v651_v37, %v4520_v23 }
 0x136   :  { %5752 = vst [vmem:[#allocation34_spill] sm:$0xff] %v4552_v63 }
 0x137   :  { %933 = vmatmul.f32.gmra.mxu0 %v4556_v10  ;;  %1111 = vmatmul.f32.gmra.mxu2 %v4556_v10  ;;  %v457_v56 = vpop.permute.xlu2 %456 }
 0x138   :  { %3427 = vmatmul.msk.f32.gmra.mxu1 %vm786_vm1, %v4550_v8 }
 0x139   :  { %3452 = vmatmul.msk.f32.gmra.mxu3 %vm786_vm1, %v4550_v8 }
 0x13a   :  { %v1064_v59 = vpop.f32.mrf.mxu2 }
 0x13b   :  { %v4566_v35 = vadd.f32 %v1153_v33, %v1064_v59  ;;  %v627_v33 = vsel %vm603_vm3, %v602_v21, %v361_v43 }
 0x13c   :  { %v4568_v12 = vpop.f32.mrf.mxu0  ;;  %v1159_v51 = vpop.f32.mrf.mxu3  ;;  %v652_v32 = vsel %vm628_vm4, %v627_v33, %v457_v56 }
 0x13d   :  { %5753 = vst [vmem:[#allocation35_spill] sm:$0xff] %v4566_v35  ;;  %v4576_v63 = vpop.f32.mrf.mxu1  ;;  %v760_v35 = vld [vmem:[#allocation2 + $0x290] sm:$0xff]  ;;  %v4591_v21 = vsel %vm653_vm5, %v652_v32, %v4550_v8 }
 0x13e   :  { %1568 = vmatpush.msra.mxu1 %v760_v35  ;;  %v754_v35 = vld [vmem:[#allocation2 + $0x260] sm:$0xff] }
 0x13f   :  { %936 = vmatmul.f32.gmra.mxu0 %v4574_v50  ;;  %1114 = vmatmul.f32.gmra.mxu2 %v4574_v50 }
 0x140   :  { %1226 = vmatmul.f32.vlgmr.msrb.gmra.mxu1 %v4141_v55 }
 0x141   :  { %3454 = vmatmul.msk.f32.vlgmr.msrb.gmra.mxu3 %vm786_vm1, %v4096_v29  ;;  %1569 = vmatpush.msra.mxu1 %v754_v35 }
 0x142   :  { %v1067_v57 = vpop.f32.mrf.mxu2 }
 0x143   :  { %v4585_v22 = vadd.f32 %v1156_v16, %v1067_v57  ;;  %v761_v57 = vld [vmem:[#allocation2 + $0x298] sm:$0xff] }
 0x144   :  { %v4587_v59 = vpop.f32.mrf.mxu0  ;;  %v1162_v37 = vpop.f32.mrf.mxu3  ;;  %1746 = vmatpush.msra.mxu0 %v761_v57  ;;  %v755_v57 = vld [vmem:[#allocation2 + $0x268] sm:$0xff] }
 0x145   :  { %5754 = vst [vmem:[#allocation36_spill] sm:$0xff] %v4585_v22  ;;  %v4593_v43 = vpop.f32.mrf.mxu1 }
 0x146   :  { %5755 = vst [vmem:[#allocation37_spill] sm:$0xff] %v4593_v43  ;;  %1747 = vmatpush.msra.mxu0 %v755_v57 }
 0x147   :  { %939 = vmatmul.f32.gmra.mxu0 %v4591_v21  ;;  %1117 = vmatmul.f32.gmra.mxu2 %v4591_v21 }
 0x148   :  { %1229 = vmatmul.f32.gmra.mxu1 %v4163_v13 }
 0x149   :  { %3455 = vmatmul.msk.f32.gmra.mxu3 %vm786_vm1, %v4094_v28 }
 0x14a   :  { %v1070_v16 = vpop.f32.mrf.mxu2 }
 0x14b   :  { %v4600_v33 = vadd.f32 %v1159_v51, %v1070_v16 }
 0x14c   :  { %v4602_v56 = vpop.f32.mrf.mxu0  ;;  %v1165_v53 = vpop.f32.mrf.mxu3 }
 0x14d   :  { %5756 = vst [vmem:[#allocation38_spill] sm:$0xff] %v4600_v33  ;;  %v4604_v32 = vpop.f32.mrf.mxu1 }
 0x14e   :  { %5757 = vst [vmem:[#allocation39_spill] sm:$0xff] %v4604_v32 }
 0x14f   :  { %1404 = vmatmul.f32.vlgmr.msrb.gmra.mxu0 %v4141_v55  ;;  %3479 = vmatmul.msk.f32.vlgmr.msrb.gmra.mxu2 %vm786_vm1, %v4096_v29 }
 0x150   :  { %1232 = vmatmul.f32.gmra.mxu1 %v4195_v39 }
 0x151   :  { %3456 = vmatmul.msk.f32.gmra.mxu3 %vm786_vm1, %v4125_v41 }
 0x152   :  { %v1073_v51 = vpop.f32.mrf.mxu2 }
 0x153   :  { %v4612_v16 = vadd.f32 %v1162_v37, %v1073_v51 }
 0x154   :  { %v4614_v33 = vpop.f32.mrf.mxu0  ;;  %v1168_v22 = vpop.f32.mrf.mxu3 }
 0x155   :  { %5758 = vst [vmem:[#allocation40_spill] sm:$0xff] %v4612_v16  ;;  %v4616_v32 = vpop.f32.mrf.mxu1  ;;  %v748_v16 = vld [vmem:[#allocation2 + $0x230] sm:$0xff] }
 0x156   :  { %5759 = vst [vmem:[#allocation41_spill] sm:$0xff] %v4614_v33  ;;  %1570 = vmatpush.msra.mxu1 %v748_v16  ;;  %v742_v16 = vld [vmem:[#allocation2 + $0x200] sm:$0xff] }
 0x157   :  { %5760 = vst [vmem:[#allocation42_spill] sm:$0xff] %v4616_v32  ;;  %1407 = vmatmul.f32.gmra.mxu0 %v4163_v13  ;;  %3480 = vmatmul.msk.f32.gmra.mxu2 %vm786_vm1, %v4094_v28 }
 0x158   :  { %1235 = vmatmul.f32.gmra.mxu1 %v4216_v54 }
 0x159   :  { %3457 = vmatmul.msk.f32.gmra.mxu3 %vm786_vm1, %v4169_v18  ;;  %1571 = vmatpush.msra.mxu1 %v742_v16 }
 0x15a   :  { %v1076_v43 = vpop.f32.mrf.mxu2 }
 0x15b   :  { %v4624_v37 = vadd.f32 %v1165_v53, %v1076_v43 }
 0x15c   :  { %v4626_v35 = vpop.f32.mrf.mxu0  ;;  %v1171_v51 = vpop.f32.mrf.mxu3 }
 0x15d   :  { %5761 = vst [vmem:[#allocation43_spill] sm:$0xff] %v4624_v37  ;;  %v4628_v32 = vpop.f32.mrf.mxu1 }
 0x15e   :  { %5762 = vst [vmem:[#allocation44_spill] sm:$0xff] %v4626_v35  ;;  %v749_v35 = vld [vmem:[#allocation2 + $0x238] sm:$0xff] }
 0x15f   :  { %5763 = vst [vmem:[#allocation45_spill] sm:$0xff] %v4628_v32  ;;  %1410 = vmatmul.f32.gmra.mxu0 %v4195_v39  ;;  %3481 = vmatmul.msk.f32.gmra.mxu2 %vm786_vm1, %v4125_v41 }
 0x160   :  { %1238 = vmatmul.f32.gmra.mxu1 %v4236_v3  ;;  %1748 = vmatpush.msra.mxu0 %v749_v35  ;;  %v743_v35 = vld [vmem:[#allocation2 + $0x208] sm:$0xff] }
 0x161   :  { %3458 = vmatmul.msk.f32.gmra.mxu3 %vm786_vm1, %v4179_v26 }
 0x162   :  { %v1079_v57 = vpop.f32.mrf.mxu2  ;;  %1749 = vmatpush.msra.mxu0 %v743_v35 }
 0x163   :  { %v4636_v43 = vadd.f32 %v1168_v22, %v1079_v57 }
 0x164   :  { %v4638_v53 = vpop.f32.mrf.mxu0  ;;  %v1174_v37 = vpop.f32.mrf.mxu3 }
 0x165   :  { %5764 = vst [vmem:[#allocation46_spill] sm:$0xff] %v4636_v43  ;;  %v4640_v33 = vpop.f32.mrf.mxu1 }
 0x166   :  { %5765 = vst [vmem:[#allocation47_spill] sm:$0xff] %v4638_v53 }
 0x167   :  { %5766 = vst [vmem:[#allocation48_spill] sm:$0xff] %v4640_v33  ;;  %1413 = vmatmul.f32.gmra.mxu0 %v4216_v54  ;;  %3482 = vmatmul.msk.f32.gmra.mxu2 %vm786_vm1, %v4169_v18 }
 0x168   :  { %1241 = vmatmul.f32.gmra.mxu1 %v4254_v31 }
 0x169   :  { %3459 = vmatmul.msk.f32.gmra.mxu3 %vm786_vm1, %v4212_v52 }
 0x16a   :  { %v1082_v22 = vpop.f32.mrf.mxu2 }
 0x16b   :  { %v4648_v57 = vadd.f32 %v1171_v51, %v1082_v22 }
 0x16c   :  { %v4650_v43 = vpop.f32.mrf.mxu0  ;;  %v1177_v32 = vpop.f32.mrf.mxu3 }
 0x16d   :  { %5767 = vst [vmem:[#allocation49_spill] sm:$0xff] %v4648_v57  ;;  %v4652_v33 = vpop.f32.mrf.mxu1  ;;  %v736_v57 = vld [vmem:[#allocation2 + $0x1d0] sm:$0xff] }
 0x16e   :  { %5768 = vst [vmem:[#allocation50_spill] sm:$0xff] %v4650_v43  ;;  %1572 = vmatpush.msra.mxu1 %v736_v57  ;;  %v730_v57 = vld [vmem:[#allocation2 + $0x1a0] sm:$0xff] }
 0x16f   :  { %5769 = vst [vmem:[#allocation51_spill] sm:$0xff] %v4652_v33  ;;  %1416 = vmatmul.f32.gmra.mxu0 %v4236_v3  ;;  %3483 = vmatmul.msk.f32.gmra.mxu2 %vm786_vm1, %v4179_v26 }
 0x170   :  { %1244 = vmatmul.f32.gmra.mxu1 %v4274_v46 }
 0x171   :  { %3460 = vmatmul.msk.f32.gmra.mxu3 %vm786_vm1, %v4223_v58  ;;  %1573 = vmatpush.msra.mxu1 %v730_v57  ;;  %v731_v57 = vld [vmem:[#allocation2 + $0x1a8] sm:$0xff] }
 0x172   :  { %v1085_v53 = vpop.f32.mrf.mxu2 }
 0x173   :  { %v4660_v51 = vadd.f32 %v1174_v37, %v1085_v53 }
 0x174   :  { %v4662_v16 = vpop.f32.mrf.mxu0  ;;  %v1180_v22 = vpop.f32.mrf.mxu3 }
 0x175   :  { %5770 = vst [vmem:[#allocation52_spill] sm:$0xff] %v4660_v51  ;;  %v4664_v33 = vpop.f32.mrf.mxu1 }
 0x176   :  { %5771 = vst [vmem:[#allocation53_spill] sm:$0xff] %v4662_v16  ;;  %v737_v16 = vld [vmem:[#allocation2 + $0x1d8] sm:$0xff] }
 0x177   :  { %5772 = vst [vmem:[#allocation54_spill] sm:$0xff] %v4664_v33  ;;  %1419 = vmatmul.f32.gmra.mxu0 %v4254_v31  ;;  %3484 = vmatmul.msk.f32.gmra.mxu2 %vm786_vm1, %v4212_v52 }
 0x178   :  { %1247 = vmatmul.f32.gmra.mxu1 %v4292_v38  ;;  %1750 = vmatpush.msra.mxu0 %v737_v16  ;;  %v778_v16 = vld [vmem:[#allocation2 + $0x320] sm:$0xff] }
 0x179   :  { %3461 = vmatmul.msk.f32.gmra.mxu3 %vm786_vm1, %v4250_v27 }
 0x17a   :  { %v1088_v35 = vpop.f32.mrf.mxu2  ;;  %1670 = vmatpush.msra.mxu3 %v778_v16  ;;  %1751 = vmatpush.msra.mxu0 %v731_v57  ;;  %v779_v16 = vld [vmem:[#allocation2 + $0x328] sm:$0xff] }
 0x17b   :  { %v4672_v37 = vadd.f32 %v1177_v32, %v1088_v35  ;;  %1848 = vmatpush.msra.mxu2 %v779_v16  ;;  %v718_v16 = vld [vmem:[#allocation2 + $0x140] sm:$0xff] }
 0x17c   :  { %v4674_v53 = vpop.f32.mrf.mxu0  ;;  %v1183_v51 = vpop.f32.mrf.mxu3 }
 0x17d   :  { %5773 = vst [vmem:[#allocation55_spill] sm:$0xff] %v4672_v37  ;;  %v4676_v43 = vpop.f32.mrf.mxu1 }
 0x17e   :  { %5774 = vst [vmem:[#allocation56_spill] sm:$0xff] %v4674_v53 }
 0x17f   :  { %5775 = vst [vmem:[#allocation57_spill] sm:$0xff] %v4676_v43  ;;  %1422 = vmatmul.f32.gmra.mxu0 %v4274_v46  ;;  %3485 = vmatmul.msk.f32.gmra.mxu2 %vm786_vm1, %v4223_v58 }
 0x180   :  { %1250 = vmatmul.f32.gmra.mxu1 %v4308_v25 }
 0x181   :  { %3462 = vmatmul.msk.f32.gmra.mxu3 %vm786_vm1, %v4263_v40 }
 0x182   :  { %v1091_v32 = vpop.f32.mrf.mxu2 }
 0x183   :  { %v4684_v35 = vadd.f32 %v1180_v22, %v1091_v32 }
 0x184   :  { %v4686_v37 = vpop.f32.mrf.mxu0  ;;  %v1186_v33 = vpop.f32.mrf.mxu3 }
 0x185   :  { %5776 = vst [vmem:[#allocation58_spill] sm:$0xff] %v4684_v35  ;;  %v4688_v43 = vpop.f32.mrf.mxu1 }
 0x186   :  { %5777 = vst [vmem:[#allocation59_spill] sm:$0xff] %v4686_v37  ;;  %v724_v37 = vld [vmem:[#allocation2 + $0x170] sm:$0xff] }
 0x187   :  { %5778 = vst [vmem:[#allocation60_spill] sm:$0xff] %v4688_v43  ;;  %1425 = vmatmul.f32.gmra.mxu0 %v4292_v38  ;;  %3486 = vmatmul.msk.f32.gmra.mxu2 %vm786_vm1, %v4250_v27 }
 0x188   :  { %1253 = vmatmul.f32.gmra.mxu1 %v4324_v47 }
 0x189   :  { %3463 = vmatmul.msk.f32.gmra.mxu3 %vm786_vm1, %v4288_v62  ;;  %1574 = vmatpush.msra.mxu1 %v724_v37 }
 0x18a   :  { %v1094_v22 = vpop.f32.mrf.mxu2 }
 0x18b   :  { %v4696_v32 = vadd.f32 %v1183_v51, %v1094_v22  ;;  %1575 = vmatpush.msra.mxu1 %v718_v16 }
 0x18c   :  { %v4698_v35 = vpop.f32.mrf.mxu0  ;;  %v1189_v43 = vpop.f32.mrf.mxu3 }
 0x18d   :  { %5779 = vst [vmem:[#allocation61_spill] sm:$0xff] %v4696_v32  ;;  %v4700_v53 = vpop.f32.mrf.mxu1 }
 0x18e   :  { %5780 = vst [vmem:[#allocation62_spill] sm:$0xff] %v4698_v35 }
 0x18f   :  { %5781 = vst [vmem:[#allocation63_spill] sm:$0xff] %v4700_v53  ;;  %1428 = vmatmul.f32.gmra.mxu0 %v4308_v25  ;;  %3487 = vmatmul.msk.f32.gmra.mxu2 %vm786_vm1, %v4263_v40  ;;  %v725_v53 = vld [vmem:[#allocation2 + $0x178] sm:$0xff] }
 0x190   :  { %1256 = vmatmul.f32.gmra.mxu1 %v4340_v61  ;;  %1752 = vmatpush.msra.mxu0 %v725_v53  ;;  %v719_v53 = vld [vmem:[#allocation2 + $0x148] sm:$0xff] }
 0x191   :  { %3464 = vmatmul.msk.f32.gmra.mxu3 %vm786_vm1, %v4301_v17 }
 0x192   :  { %v1097_v51 = vpop.f32.mrf.mxu2  ;;  %1753 = vmatpush.msra.mxu0 %v719_v53 }
 0x193   :  { %v4708_v57 = vadd.f32 %v1186_v33, %v1097_v51 }
 0x194   :  { %v4710_v22 = vpop.f32.mrf.mxu0  ;;  %v1192_v32 = vpop.f32.mrf.mxu3 }
 0x195   :  { %5782 = vst [vmem:[#allocation64_spill] sm:$0xff] %v4708_v57  ;;  %v4712_v37 = vpop.f32.mrf.mxu1 }
 0x196   :  { %5783 = vst [vmem:[#allocation65_spill] sm:$0xff] %v4710_v22 }
 0x197   :  { %5784 = vst [vmem:[#allocation66_spill] sm:$0xff] %v4712_v37  ;;  %1431 = vmatmul.f32.gmra.mxu0 %v4324_v47  ;;  %3488 = vmatmul.msk.f32.gmra.mxu2 %vm786_vm1, %v4288_v62 }
 0x198   :  { %1259 = vmatmul.f32.gmra.mxu1 %v4356_v34 }
 0x199   :  { %3465 = vmatmul.msk.f32.gmra.mxu3 %vm786_vm1, %v4320_v45 }
 0x19a   :  { %v1100_v33 = vpop.f32.mrf.mxu2 }
 0x19b   :  { %v4720_v51 = vadd.f32 %v1189_v43, %v1100_v33 }
 0x19c   :  { %v4722_v57 = vpop.f32.mrf.mxu0  ;;  %v1195_v22 = vpop.f32.mrf.mxu3 }
 0x19d   :  { %5785 = vst [vmem:[#allocation67_spill] sm:$0xff] %v4720_v51  ;;  %v4724_v37 = vpop.f32.mrf.mxu1  ;;  %v712_v51 = vld [vmem:[#allocation2 + $0x110] sm:$0xff] }
 0x19e   :  { %5786 = vst [vmem:[#allocation68_spill] sm:$0xff] %v4722_v57  ;;  %1576 = vmatpush.msra.mxu1 %v712_v51  ;;  %v706_v51 = vld [vmem:[#allocation2 + $0xe0] sm:$0xff] }
 0x19f   :  { %5787 = vst [vmem:[#allocation69_spill] sm:$0xff] %v4724_v37  ;;  %1434 = vmatmul.f32.gmra.mxu0 %v4340_v61  ;;  %3489 = vmatmul.msk.f32.gmra.mxu2 %vm786_vm1, %v4301_v17 }
 0x1a0   :  { %1262 = vmatmul.f32.gmra.mxu1 %v4372_v48 }
 0x1a1   :  { %3466 = vmatmul.msk.f32.gmra.mxu3 %vm786_vm1, %v4329_v5  ;;  %1577 = vmatpush.msra.mxu1 %v706_v51 }
 0x1a2   :  { %v1103_v35 = vpop.f32.mrf.mxu2 }
 0x1a3   :  { %v4732_v43 = vadd.f32 %v1192_v32, %v1103_v35 }
 0x1a4   :  { %v4734_v16 = vpop.f32.mrf.mxu0  ;;  %v1198_v33 = vpop.f32.mrf.mxu3 }
 0x1a5   :  { %5788 = vst [vmem:[#allocation70_spill] sm:$0xff] %v4732_v43  ;;  %v4736_v37 = vpop.f32.mrf.mxu1 }
 0x1a6   :  { %5789 = vst [vmem:[#allocation71_spill] sm:$0xff] %v4734_v16  ;;  %v713_v16 = vld [vmem:[#allocation2 + $0x118] sm:$0xff] }
 0x1a7   :  { %5790 = vst [vmem:[#allocation72_spill] sm:$0xff] %v4736_v37  ;;  %1437 = vmatmul.f32.gmra.mxu0 %v4356_v34  ;;  %3490 = vmatmul.msk.f32.gmra.mxu2 %vm786_vm1, %v4320_v45 }
 0x1a8   :  { %1265 = vmatmul.f32.gmra.mxu1 %v4388_v7  ;;  %1754 = vmatpush.msra.mxu0 %v713_v16  ;;  %v707_v16 = vld [vmem:[#allocation2 + $0xe8] sm:$0xff] }
 0x1a9   :  { %3467 = vmatmul.msk.f32.gmra.mxu3 %vm786_vm1, %v4352_v24 }
 0x1aa   :  { %v1106_v53 = vpop.f32.mrf.mxu2  ;;  %1755 = vmatpush.msra.mxu0 %v707_v16  ;;  %v700_v16 = vld [vmem:[#allocation2 + $0xb0] sm:$0xff] }
 0x1ab   :  { %v4744_v35 = vadd.f32 %v1195_v22, %v1106_v53  ;;  %1578 = vmatpush.msra.mxu1 %v700_v16 }
 0x1ac   :  { %v4746_v32 = vpop.f32.mrf.mxu0  ;;  %v1201_v43 = vpop.f32.mrf.mxu3 }
 0x1ad   :  { %5791 = vst [vmem:[#allocation73_spill] sm:$0xff] %v4744_v35  ;;  %v4748_v57 = vpop.f32.mrf.mxu1 }
 0x1ae   :  { %5792 = vst [vmem:[#allocation74_spill] sm:$0xff] %v4746_v32 }
 0x1af   :  { %5793 = vst [vmem:[#allocation75_spill] sm:$0xff] %v4748_v57  ;;  %1440 = vmatmul.f32.gmra.mxu0 %v4372_v48  ;;  %3491 = vmatmul.msk.f32.gmra.mxu2 %vm786_vm1, %v4329_v5 }
 0x1b0   :  { %1268 = vmatmul.f32.gmra.mxu1 %v4406_v20 }
 0x1b1   :  { %3468 = vmatmul.msk.f32.gmra.mxu3 %vm786_vm1, %v4361_v15 }
 0x1b2   :  { %v1109_v22 = vpop.f32.mrf.mxu2 }
 0x1b3   :  { %v4756_v53 = vadd.f32 %v1198_v33, %v1109_v22 }
 0x1b4   :  { %v4758_v35 = vpop.f32.mrf.mxu0  ;;  %v1204_v37 = vpop.f32.mrf.mxu3 }
 0x1b5   :  { %5794 = vst [vmem:[#allocation76_spill] sm:$0xff] %v4756_v53  ;;  %v4760_v57 = vpop.f32.mrf.mxu1 }
 0x1b6   :  { %5795 = vst [vmem:[#allocation77_spill] sm:$0xff] %v4758_v35 }
 0x1b7   :  { %5796 = vst [vmem:[#allocation78_spill] sm:$0xff] %v4760_v57  ;;  %1443 = vmatmul.f32.gmra.mxu0 %v4388_v7  ;;  %3492 = vmatmul.msk.f32.gmra.mxu2 %vm786_vm1, %v4352_v24  ;;  %v682_v24 = vld [vmem:[#allocation2 + $0x20] sm:$0xff] }
 0x1b8   :  { %1271 = vmatmul.f32.gmra.mxu1 %v4424_v60 }
 0x1b9   :  { %3469 = vmatmul.msk.f32.gmra.mxu3 %vm786_vm1, %v4384_v6 }
 0x1ba   :  { %v1112_v32 = vpop.f32.mrf.mxu2 }
 0x1bb   :  { %v4768_v33 = vadd.f32 %v1201_v43, %v1112_v32 }
 0x1bc   :  { %v4770_v51 = vpop.f32.mrf.mxu0  ;;  %v1207_v22 = vpop.f32.mrf.mxu3 }
 0x1bd   :  { %5797 = vst [vmem:[#allocation79_spill] sm:$0xff] %v4768_v33  ;;  %v1227_v53 = vpop.f32.mrf.mxu1 }
 0x1be   :  { %5798 = vst [vmem:[#allocation80_spill] sm:$0xff] %v4770_v51 }
 0x1bf   :  { %1446 = vmatmul.f32.gmra.mxu0 %v4406_v20  ;;  %3493 = vmatmul.msk.f32.gmra.mxu2 %vm786_vm1, %v4361_v15  ;;  %v701_v15 = vld [vmem:[#allocation2 + $0xb8] sm:$0xff] }
 0x1c0   :  { %1274 = vmatmul.f32.gmra.mxu1 %v4444_v2  ;;  %1756 = vmatpush.msra.mxu0 %v701_v15  ;;  %v695_v15 = vld [vmem:[#allocation2 + $0x88] sm:$0xff]  ;;  %v689_v20 = vld [vmem:[#allocation2 + $0x58] sm:$0xff] }
 0x1c1   :  { %3470 = vmatmul.msk.f32.gmra.mxu3 %vm786_vm1, %v4397_v14 }
 0x1c2   :  { %v1115_v57 = vpop.f32.mrf.mxu2  ;;  %1757 = vmatpush.msra.mxu0 %v695_v15  ;;  %v688_v15 = vld [vmem:[#allocation2 + $0x50] sm:$0xff] }
 0x1c3   :  { %v4778_v35 = vadd.f32 %v1204_v37, %v1115_v57  ;;  %v694_v57 = vld [vmem:[#allocation2 + $0x80] sm:$0xff] }
 0x1c4   :  { %v4780_v43 = vpop.f32.mrf.mxu0  ;;  %v1316_v32 = vpop.f32.mrf.mxu3  ;;  %1579 = vmatpush.msra.mxu1 %v694_v57  ;;  %1758 = vmatpush.msra.mxu0 %v689_v20  ;;  %v5815_v20 = vld [vmem:[#allocation29_spill] sm:$0xff] }
 0x1c5   :  { %5799 = vst [vmem:[#allocation81_spill] sm:$0xff] %v4778_v35  ;;  %v4782_v33 = vadd.f32 %v1316_v32, %v1227_v53  ;;  %v1230_v51 = vpop.f32.mrf.mxu1 }
 0x1c6   :  { %5800 = vst [vmem:[#allocation82_spill] sm:$0xff] %v4780_v43  ;;  %1580 = vmatpush.msra.mxu1 %v688_v15 }
 0x1c7   :  { %5801 = vst [vmem:[#allocation83_spill] sm:$0xff] %v4782_v33  ;;  %1449 = vmatmul.f32.gmra.mxu0 %v4424_v60  ;;  %3494 = vmatmul.msk.f32.gmra.mxu2 %vm786_vm1, %v4384_v6 }
 0x1c8   :  { %1277 = vmatmul.f32.gmra.mxu1 %v4464_v42 }
 0x1c9   :  { %3471 = vmatmul.msk.f32.gmra.mxu3 %vm786_vm1, %v4418_v30  ;;  %1581 = vmatpush.msra.mxu1 %v682_v24 }
 0x1ca   :  { %v1118_v37 = vpop.f32.mrf.mxu2 }
 0x1cb   :  { %v4790_v35 = vadd.f32 %v1207_v22, %v1118_v37  ;;  %v5804_v22 = vld [vmem:[#allocation12_spill] sm:$0xff] }
 0x1cc   :  { %v1319_v53 = vpop.f32.mrf.mxu3  ;;  %v1405_v16 = vpop.f32.mrf.mxu0  ;;  %v961_v57 = vadd.f32 %v5804_v22, %v4436_v1  ;;  %v5809_v22 = vld [vmem:[#allocation21_spill] sm:$0xff] }
 0x1cd   :  { %5802 = vst [vmem:[#allocation84_spill] sm:$0xff] %v4790_v35  ;;  %v4792_v32 = vadd.f32 %v1319_v53, %v1230_v51  ;;  %v1233_v33 = vpop.f32.mrf.mxu1 }
 0x1cf   :  { %5803 = vst [vmem:[#allocation85_spill] sm:$0xff] %v4792_v32  ;;  %1452 = vmatmul.f32.gmra.mxu0 %v4444_v2  ;;  %3495 = vmatmul.msk.f32.gmra.mxu2 %vm786_vm1, %v4397_v14  ;;  %v4807_v14 = vld [vmem:[%s5687_s2] sm:$0x7]  ;;  %s3825_s2 = smov 64  }
 0x1d0   :  { %1280 = vmatmul.f32.gmra.mxu1 %v4488_v19  ;;  %5806 = vst [vmem:[#allocation86_spill] sm:$0xff] %v4807_v14  ;;  %v4813_v1 = vperm.slane %v4807_v14, 0 }
 0x1d1   :  { %3472 = vmatmul.msk.f32.gmra.mxu3 %vm786_vm1, %v4429_v9 }
 0x1d2   :  { %v1494_v43 = vpop.f32.mrf.mxu2 }
 0x1d3   :  { %v1495_v37 = vadd.f32 %v1494_v43, %v1405_v16  ;;  %v5807_v43 = vld [vmem:[#allocation31_spill] sm:$0xff] }
 0x1d4   :  { %v1322_v51 = vpop.f32.mrf.mxu3  ;;  %v1408_v53 = vpop.f32.mrf.mxu0 }
 0x1d5   :  { %v1922_v35 = vmax.f32 %v961_v57, %v1495_v37  ;;  %v4802_v32 = vadd.f32 %v1322_v51, %v1233_v33  ;;  %v1236_v2 = vpop.f32.mrf.mxu1  ;;  %v5808_v33 = vld [vmem:[#allocation24_spill] sm:$0xff]  ;;  %v5810_v57 = vld [vmem:[#allocation15_spill] sm:$0xff] }
 0x1d6   :  { %v964_v37 = vadd.f32 %v5810_v57, %v5809_v22 }
 0x1d7   :  { %5805 = vst [vmem:[#allocation12_spill] sm:$0xff] %v4802_v32  ;;  %1455 = vmatmul.f32.gmra.mxu0 %v4464_v42  ;;  %3496 = vmatmul.msk.f32.gmra.mxu2 %vm786_vm1, %v4418_v30  ;;  %v2002_v6 = vadd.f32 %v4813_v1, %v1922_v35  ;;  %v5812_v35 = vld [vmem:[#allocation26_spill] sm:$0xff] }
 0x1d8   :  { %1283 = vmatmul.f32.gmra.mxu1 %v5807_v43 }
 0x1d9   :  { %3473 = vmatmul.msk.f32.gmra.mxu3 %vm786_vm1, %v5808_v33 }
 0x1da   :  { %v1497_v16 = vpop.f32.mrf.mxu2 }
 0x1db   :  { %v1498_v51 = vadd.f32 %v1497_v16, %v1408_v53  ;;  %v2074_v53 = vmax.f32 %v2002_v6, 0.0  ;;  %v683_v6 = vld [vmem:[#allocation2 + $0x28] sm:$0xff] }
 0x1dc   :  { %v1325_v32 = vpop.f32.mrf.mxu3  ;;  %v1411_v42 = vpop.f32.mrf.mxu0  ;;  %1759 = vmatpush.msra.mxu0 %v683_v6 }
 0x1dd   :  { %v1925_v30 = vmax.f32 %v964_v37, %v1498_v51  ;;  %v4821_v60 = vadd.f32 %v1325_v32, %v1236_v2  ;;  %v1239_v15 = vpop.f32.mrf.mxu1  ;;  %v5813_v32 = vld [vmem:[#allocation18_spill] sm:$0xff] }
 0x1df   :  { %5811 = vst [vmem:[#allocation31_spill] sm:$0xff] %v4821_v60  ;;  %v2005_v14 = vadd.f32 %v4813_v1, %v1925_v30  ;;  %1458 = vmatmul.f32.gmra.mxu0 %v4488_v19  ;;  %3497 = vmatmul.msk.f32.gmra.mxu2 %vm786_vm1, %v4429_v9  ;;  %v967_v30 = vadd.f32 %v5813_v32, %v5812_v35 }
 0x1e0   :  { %1286 = vmatmul.f32.gmra.mxu1 %v4533_v36 }
 0x1e1   :  { %v2077_v16 = vmax.f32 %v2005_v14, 0.0  ;;  %3474 = vmatmul.msk.f32.gmra.mxu3 %vm786_vm1, %v4471_v11 }
 0x1e2   :  { %v1500_v2 = vpop.f32.mrf.mxu2 }
 0x1e3   :  { %v4832_v22 = vmax.f32 %v2074_v53, %v2077_v16  ;;  %v1501_v57 = vadd.f32 %v1500_v2, %v1411_v42  ;;  %v5816_v42 = vld [vmem:[#allocation22_spill] sm:$0xff] }
 0x1e4   :  { %v1328_v37 = vpop.f32.mrf.mxu3  ;;  %v1414_v51 = vpop.f32.mrf.mxu0  ;;  %v970_v53 = vadd.f32 %v5816_v42, %v5815_v20 }
 0x1e5   :  { %5814 = vst [vmem:[#allocation24_spill] sm:$0xff] %v4832_v22  ;;  %v1928_v60 = vmax.f32 %v967_v30, %v1501_v57  ;;  %v4834_v9 = vadd.f32 %v1328_v37, %v1239_v15  ;;  %v1242_v24 = vpop.f32.mrf.mxu1 }
 0x1e7   :  { %1461 = vmatmul.f32.gmra.mxu0 %v5807_v43  ;;  %3498 = vmatmul.msk.f32.gmra.mxu2 %vm786_vm1, %v5808_v33  ;;  %v2008_v35 = vadd.f32 %v4813_v1, %v1928_v60  ;;  %v5817_v60 = vld [vmem:[#allocation27_spill] sm:$0xff] }
 0x1e8   :  { %1289 = vmatmul.f32.gmra.mxu1 %v4556_v10 }
 0x1e9   :  { %3475 = vmatmul.msk.f32.gmra.mxu3 %vm786_vm1, %v4510_v0 }
 0x1ea   :  { %v1503_v14 = vpop.f32.mrf.mxu2 }
 0x1eb   :  { %v1504_v16 = vadd.f32 %v1503_v14, %v1414_v51  ;;  %v2080_v51 = vmax.f32 %v2008_v35, 0.0 }
 0x1ec   :  { %v1331_v15 = vpop.f32.mrf.mxu3  ;;  %v1417_v2 = vpop.f32.mrf.mxu0 }
 0x1ed   :  { %v1931_v32 = vmax.f32 %v970_v53, %v1504_v16  ;;  %v4845_v30 = vadd.f32 %v1331_v15, %v1242_v24  ;;  %v1245_v57 = vpop.f32.mrf.mxu1  ;;  %v973_v24 = vadd.f32 %v5817_v60, %v4525_v4  ;;  %v2213_v4 = vld [vmem:[#allocation4 + $0xf8] sm:$0xff] }
 0x1ee   :  { %2463 = vmatpush.msrb.mxu3 %v2213_v4 }
 0x1ef   :  { %v2011_v37 = vadd.f32 %v4813_v1, %v1931_v32  ;;  %1464 = vmatmul.f32.gmra.mxu0 %v4533_v36  ;;  %3499 = vmatmul.msk.f32.gmra.mxu2 %vm786_vm1, %v4471_v11 }
 0x1f0   :  { %1292 = vmatmul.f32.gmra.mxu1 %v4574_v50 }
 0x1f1   :  { %3476 = vmatmul.msk.f32.gmra.mxu3 %vm786_vm1, %v4520_v23  ;;  %v2083_v6 = vmax.f32 %v2011_v37, 0.0  ;;  %v5819_v37 = vld [vmem:[#allocation30_spill] sm:$0xff] }
 0x1f2   :  { %v1506_v14 = vpop.f32.mrf.mxu2 }
 0x1f3   :  { %v1507_v20 = vadd.f32 %v1506_v14, %v1417_v2  ;;  %v4856_v42 = vmax.f32 %v2080_v51, %v2083_v6  ;;  %v2197_v2 = vld [vmem:[#allocation4 + $0x78] sm:$0xff] }
 0x1f4   :  { %v1334_v53 = vpop.f32.mrf.mxu3  ;;  %v1420_v16 = vpop.f32.mrf.mxu0  ;;  %2422 = vmatpush.msrb.mxu1 %v2197_v2  ;;  %v2229_v2 = vld [vmem:[#allocation4 + $0x178] sm:$0xff] }
 0x1f5   :  { %5818 = vst [vmem:[#allocation21_spill] sm:$0xff] %v4856_v42  ;;  %v1934_v15 = vmax.f32 %v973_v24, %v1507_v20  ;;  %v4858_v32 = vadd.f32 %v1334_v53, %v1245_v57  ;;  %v1248_v22 = vpop.f32.mrf.mxu1  ;;  %v976_v57 = vadd.f32 %v5819_v37, %v4546_v49  ;;  %2504 = vmatpush.msrb.mxu0 %v2229_v2 }
 0x1f7   :  { %1467 = vmatmul.f32.gmra.mxu0 %v4556_v10  ;;  %3500 = vmatmul.msk.f32.gmra.mxu2 %vm786_vm1, %v4510_v0  ;;  %v2014_v60 = vadd.f32 %v4813_v1, %v1934_v15 }
 0x1f8   :  { %1295 = vmatmul.f32.gmra.mxu1 %v4591_v21 }
 0x1f9   :  { %3477 = vmatmul.msk.f32.gmra.mxu3 %vm786_vm1, %v4550_v8  ;;  %v2086_v49 = vmax.f32 %v2014_v60, 0.0 }
 0x1fa   :  { %v1509_v35 = vpop.f32.mrf.mxu2 }
 0x1fb   :  { %v1510_v51 = vadd.f32 %v1509_v35, %v1420_v16  ;;  %v2212_v35 = vld [vmem:[#allocation4 + $0xf0] sm:$0xff] }
 0x1fc   :  { %v1337_v6 = vpop.f32.mrf.mxu3  ;;  %v1423_v14 = vpop.f32.mrf.mxu0  ;;  %2464 = vmatpush.msrb.mxu3 %v2212_v35 }
 0x1fd   :  { %v1937_v24 = vmax.f32 %v976_v57, %v1510_v51  ;;  %v4869_v20 = vadd.f32 %v1337_v6, %v1248_v22  ;;  %v1251_v53 = vpop.f32.mrf.mxu1  ;;  %v979_v22 = vadd.f32 %v4529_v44, %v4568_v12  ;;  %v2196_v44 = vld [vmem:[#allocation4 + $0x70] sm:$0xff] }
 0x1fe   :  { %v2228_v12 = vld [vmem:[#allocation4 + $0x170] sm:$0xff]  ;;  %2423 = vmatpush.msrb.mxu1 %v2196_v44 }
 0x1ff   :  { %5820 = vst [vmem:[#allocation15_spill] sm:$0xff] %v4869_v20  ;;  %v2017_v42 = vadd.f32 %v4813_v1, %v1937_v24  ;;  %1470 = vmatmul.f32.gmra.mxu0 %v4574_v50  ;;  %3501 = vmatmul.msk.f32.gmra.mxu2 %vm786_vm1, %v4520_v23 }
 0x200   :  { %1582 = vmatmul.f32.vlgmr.msra.gmra.mxu1 %v4141_v55  ;;  %2505 = vmatpush.msrb.mxu0 %v2228_v12  ;;  %v2195_v12 = vld [vmem:[#allocation4 + $0x68] sm:$0xff] }
 0x201   :  { %3504 = vmatmul.msk.f32.vlgmr.msra.gmra.mxu3 %vm786_vm1, %v4096_v29  ;;  %v2089_v16 = vmax.f32 %v2017_v42, 0.0  ;;  %2424 = vmatpush.msrb.mxu1 %v2195_v12 }
 0x202   :  { %v1512_v4 = vpop.f32.mrf.mxu2 }
 0x203   :  { %v1513_v15 = vadd.f32 %v1512_v4, %v1423_v14  ;;  %v4880_v37 = vmax.f32 %v2086_v49, %v2089_v16  ;;  %v5821_v14 = vld [vmem:[#allocation34_spill] sm:$0xff] }
 0x204   :  { %v1340_v57 = vpop.f32.mrf.mxu3  ;;  %v1426_v51 = vpop.f32.mrf.mxu0  ;;  %v982_v60 = vadd.f32 %v5821_v14, %v4587_v59 }
 0x205   :  { %v1940_v6 = vmax.f32 %v979_v22, %v1513_v15  ;;  %v4882_v24 = vadd.f32 %v1340_v57, %v1251_v53  ;;  %v1254_v20 = vpop.f32.mrf.mxu1 }
 0x207   :  { %1473 = vmatmul.f32.gmra.mxu0 %v4591_v21  ;;  %3502 = vmatmul.msk.f32.gmra.mxu2 %vm786_vm1, %v4550_v8  ;;  %v2020_v4 = vadd.f32 %v4813_v1, %v1940_v6  ;;  %v2211_v6 = vld [vmem:[#allocation4 + $0xe8] sm:$0xff] }
 0x208   :  { %1585 = vmatmul.f32.gmra.mxu1 %v4163_v13  ;;  %2465 = vmatpush.msrb.mxu3 %v2211_v6 }
 0x209   :  { %3505 = vmatmul.msk.f32.gmra.mxu3 %vm786_vm1, %v4094_v28  ;;  %v2092_v57 = vmax.f32 %v2020_v4, 0.0  ;;  %v5823_v4 = vld [vmem:[#allocation37_spill] sm:$0xff] }
 0x20a   :  { %v1515_v42 = vpop.f32.mrf.mxu2 }
 0x20b   :  { %v1516_v53 = vadd.f32 %v1515_v42, %v1426_v51 }
 0x20c   :  { %v1343_v49 = vpop.f32.mrf.mxu3  ;;  %v1429_v16 = vpop.f32.mrf.mxu0 }
 0x20d   :  { %v1943_v22 = vmax.f32 %v982_v60, %v1516_v53  ;;  %v4893_v15 = vadd.f32 %v1343_v49, %v1254_v20  ;;  %v1257_v2 = vpop.f32.mrf.mxu1  ;;  %v985_v20 = vadd.f32 %v4576_v63, %v4602_v56  ;;  %v2227_v63 = vld [vmem:[#allocation4 + $0x168] sm:$0xff]  ;;  %v2210_v56 = vld [vmem:[#allocation4 + $0xe0] sm:$0xff] }
 0x20e   :  { %2506 = vmatpush.msrb.mxu0 %v2227_v63  ;;  %2466 = vmatpush.msrb.mxu3 %v2210_v56  ;;  %v2194_v56 = vld [vmem:[#allocation4 + $0x60] sm:$0xff] }
 0x20f   :  { %v2023_v35 = vadd.f32 %v4813_v1, %v1943_v22  ;;  %1760 = vmatmul.f32.vlgmr.msra.gmra.mxu0 %v4141_v55  ;;  %3529 = vmatmul.msk.f32.vlgmr.msra.gmra.mxu2 %vm786_vm1, %v4096_v29 }
 0x210   :  { %1588 = vmatmul.f32.gmra.mxu1 %v4195_v39 }
 0x211   :  { %v2095_v44 = vmax.f32 %v2023_v35, 0.0  ;;  %3506 = vmatmul.msk.f32.gmra.mxu3 %vm786_vm1, %v4125_v41  ;;  %2425 = vmatpush.msrb.mxu1 %v2194_v56 }
 0x212   :  { %v1518_v59 = vpop.f32.mrf.mxu2 }
 0x213   :  { %v1519_v51 = vadd.f32 %v1518_v59, %v1429_v16  ;;  %v4904_v42 = vmax.f32 %v2092_v57, %v2095_v44  ;;  %v5822_v16 = vld [vmem:[#allocation41_spill] sm:$0xff] }
 0x214   :  { %v1346_v55 = vpop.f32.mrf.mxu3  ;;  %v1432_v14 = vpop.f32.mrf.mxu0  ;;  %v988_v22 = vadd.f32 %v5823_v4, %v5822_v16 }
 0x215   :  { %v1946_v29 = vmax.f32 %v985_v20, %v1519_v51  ;;  %v4906_v60 = vadd.f32 %v1346_v55, %v1257_v2  ;;  %v1260_v53 = vpop.f32.mrf.mxu1  ;;  %v5824_v55 = vld [vmem:[#allocation44_spill] sm:$0xff] }
 0x217   :  { %1763 = vmatmul.f32.gmra.mxu0 %v4163_v13  ;;  %3530 = vmatmul.msk.f32.gmra.mxu2 %vm786_vm1, %v4094_v28  ;;  %v2026_v13 = vadd.f32 %v4813_v1, %v1946_v29 }
 0x218   :  { %1591 = vmatmul.f32.gmra.mxu1 %v4216_v54 }
 0x219   :  { %3507 = vmatmul.msk.f32.gmra.mxu3 %vm786_vm1, %v4169_v18  ;;  %v2098_v51 = vmax.f32 %v2026_v13, 0.0  ;;  %v5826_v13 = vld [vmem:[#allocation47_spill] sm:$0xff] }
 0x21a   :  { %v1521_v49 = vpop.f32.mrf.mxu2 }
 0x21b   :  { %v1522_v2 = vadd.f32 %v1521_v49, %v1432_v14  ;;  %v5825_v14 = vld [vmem:[#allocation39_spill] sm:$0xff]  ;;  %v2226_v49 = vld [vmem:[#allocation4 + $0x160] sm:$0xff] }
 0x21c   :  { %v1349_v35 = vpop.f32.mrf.mxu3  ;;  %v1435_v57 = vpop.f32.mrf.mxu0  ;;  %v991_v29 = vadd.f32 %v5825_v14, %v5824_v55  ;;  %2507 = vmatpush.msrb.mxu0 %v2226_v49  ;;  %v5828_v49 = vld [vmem:[#allocation50_spill] sm:$0xff] }
 0x21d   :  { %v1949_v44 = vmax.f32 %v988_v22, %v1522_v2  ;;  %v4917_v28 = vadd.f32 %v1349_v35, %v1260_v53  ;;  %v1263_v59 = vpop.f32.mrf.mxu1  ;;  %v2209_v2 = vld [vmem:[#allocation4 + $0xd8] sm:$0xff] }
 0x21e   :  { %v2193_v35 = vld [vmem:[#allocation4 + $0x58] sm:$0xff]  ;;  %2467 = vmatpush.msrb.mxu3 %v2209_v2 }
 0x21f   :  { %v2029_v20 = vadd.f32 %v4813_v1, %v1949_v44  ;;  %1766 = vmatmul.f32.gmra.mxu0 %v4195_v39  ;;  %3531 = vmatmul.msk.f32.gmra.mxu2 %vm786_vm1, %v4125_v41  ;;  %v5827_v44 = vld [vmem:[#allocation42_spill] sm:$0xff]  ;;  %v2225_v2 = vld [vmem:[#allocation4 + $0x158] sm:$0xff] }
 0x220   :  { %1594 = vmatmul.f32.gmra.mxu1 %v4236_v3  ;;  %2508 = vmatpush.msrb.mxu0 %v2225_v2  ;;  %v2207_v2 = vld [vmem:[#allocation4 + $0xc8] sm:$0xff] }
 0x221   :  { %v2101_v6 = vmax.f32 %v2029_v20, 0.0  ;;  %3508 = vmatmul.msk.f32.gmra.mxu3 %vm786_vm1, %v4179_v26  ;;  %2426 = vmatpush.msrb.mxu1 %v2193_v35  ;;  %v2208_v35 = vld [vmem:[#allocation4 + $0xd0] sm:$0xff] }
 0x222   :  { %v1524_v12 = vpop.f32.mrf.mxu2  ;;  %2468 = vmatpush.msrb.mxu3 %v2208_v35  ;;  %v2244_v35 = vld [vmem:[#allocation4 + $0x1f0] sm:$0xff] }
 0x223   :  { %v4928_v53 = vmax.f32 %v2098_v51, %v2101_v6  ;;  %v1525_v63 = vadd.f32 %v1524_v12, %v1435_v57 }
 0x224   :  { %v1352_v39 = vpop.f32.mrf.mxu3  ;;  %v1438_v16 = vpop.f32.mrf.mxu0  ;;  %2469 = vmatpush.msrb.mxu3 %v2207_v2 }
 0x225   :  { %v1952_v41 = vmax.f32 %v991_v29, %v1525_v63  ;;  %v4930_v4 = vadd.f32 %v1352_v39, %v1263_v59  ;;  %v1266_v22 = vpop.f32.mrf.mxu1  ;;  %v994_v59 = vadd.f32 %v5827_v44, %v5826_v13  ;;  %v5829_v39 = vld [vmem:[#allocation45_spill] sm:$0xff] }
 0x227   :  { %1769 = vmatmul.f32.gmra.mxu0 %v4216_v54  ;;  %3532 = vmatmul.msk.f32.gmra.mxu2 %vm786_vm1, %v4169_v18  ;;  %v2032_v54 = vadd.f32 %v4813_v1, %v1952_v41 }
 0x228   :  { %1597 = vmatmul.f32.gmra.mxu1 %v4254_v31 }
 0x229   :  { %3509 = vmatmul.msk.f32.gmra.mxu3 %vm786_vm1, %v4212_v52  ;;  %v2104_v29 = vmax.f32 %v2032_v54, 0.0  ;;  %v5830_v54 = vld [vmem:[#allocation53_spill] sm:$0xff] }
 0x22a   :  { %v1527_v57 = vpop.f32.mrf.mxu2 }
 0x22b   :  { %v1528_v20 = vadd.f32 %v1527_v57, %v1438_v16  ;;  %v997_v16 = vadd.f32 %v5829_v39, %v5828_v49 }
 0x22c   :  { %v1355_v51 = vpop.f32.mrf.mxu3  ;;  %v1441_v6 = vpop.f32.mrf.mxu0 }
 0x22d   :  { %v1955_v12 = vmax.f32 %v994_v59, %v1528_v20  ;;  %v4941_v18 = vadd.f32 %v1355_v51, %v1266_v22  ;;  %v1269_v55 = vpop.f32.mrf.mxu1  ;;  %v2192_v20 = vld [vmem:[#allocation4 + $0x50] sm:$0xff] }
 0x22e   :  { %v2224_v51 = vld [vmem:[#allocation4 + $0x150] sm:$0xff]  ;;  %2427 = vmatpush.msrb.mxu1 %v2192_v20 }
 0x22f   :  { %v2035_v14 = vadd.f32 %v4813_v1, %v1955_v12  ;;  %1772 = vmatmul.f32.gmra.mxu0 %v4236_v3  ;;  %3533 = vmatmul.msk.f32.gmra.mxu2 %vm786_vm1, %v4179_v26  ;;  %v2245_v3 = vld [vmem:[#allocation4 + $0x1f8] sm:$0xff]  ;;  %v5831_v12 = vld [vmem:[#allocation48_spill] sm:$0xff] }
 0x230   :  { %1600 = vmatmul.f32.gmra.mxu1 %v4274_v46  ;;  %2545 = vmatpush.msrb.mxu2 %v2245_v3  ;;  %v2191_v3 = vld [vmem:[#allocation4 + $0x48] sm:$0xff] }
 0x231   :  { %v2107_v63 = vmax.f32 %v2035_v14, 0.0  ;;  %3510 = vmatmul.msk.f32.gmra.mxu3 %vm786_vm1, %v4223_v58  ;;  %2509 = vmatpush.msrb.mxu0 %v2224_v51 }
 0x232   :  { %v1530_v56 = vpop.f32.mrf.mxu2  ;;  %2546 = vmatpush.msrb.mxu2 %v2244_v35  ;;  %2428 = vmatpush.msrb.mxu1 %v2191_v3 }
 0x233   :  { %v4952_v41 = vmax.f32 %v2104_v29, %v2107_v63  ;;  %v1531_v22 = vadd.f32 %v1530_v56, %v1441_v6 }
 0x234   :  { %v1358_v57 = vpop.f32.mrf.mxu3  ;;  %v1444_v13 = vpop.f32.mrf.mxu0 }
 0x235   :  { %v1958_v26 = vmax.f32 %v997_v16, %v1531_v22  ;;  %v4954_v44 = vadd.f32 %v1358_v57, %v1269_v55  ;;  %v1272_v59 = vpop.f32.mrf.mxu1  ;;  %v1000_v55 = vadd.f32 %v5831_v12, %v5830_v54 }
 0x237   :  { %1775 = vmatmul.f32.gmra.mxu0 %v4254_v31  ;;  %3534 = vmatmul.msk.f32.gmra.mxu2 %vm786_vm1, %v4212_v52  ;;  %v2038_v31 = vadd.f32 %v4813_v1, %v1958_v26  ;;  %v5833_v26 = vld [vmem:[#allocation51_spill] sm:$0xff] }
 0x238   :  { %1603 = vmatmul.f32.gmra.mxu1 %v4292_v38 }
 0x239   :  { %3511 = vmatmul.msk.f32.gmra.mxu3 %vm786_vm1, %v4250_v27  ;;  %v2110_v16 = vmax.f32 %v2038_v31, 0.0  ;;  %v5834_v31 = vld [vmem:[#allocation59_spill] sm:$0xff] }
 0x23a   :  { %v1533_v6 = vpop.f32.mrf.mxu2 }
 0x23b   :  { %v1534_v14 = vadd.f32 %v1533_v6, %v1444_v13  ;;  %v5832_v13 = vld [vmem:[#allocation56_spill] sm:$0xff] }
 0x23c   :  { %v1361_v29 = vpop.f32.mrf.mxu3  ;;  %v1447_v63 = vpop.f32.mrf.mxu0 }
 0x23d   :  { %v1961_v56 = vmax.f32 %v1000_v55, %v1534_v14  ;;  %v4965_v52 = vadd.f32 %v1361_v29, %v1272_v59  ;;  %v1275_v49 = vpop.f32.mrf.mxu1  ;;  %v1003_v59 = vadd.f32 %v5833_v26, %v5832_v13  ;;  %v2223_v55 = vld [vmem:[#allocation4 + $0x148] sm:$0xff]  ;;  %v2206_v14 = vld [vmem:[#allocation4 + $0xc0] sm:$0xff] }
 0x23e   :  { %2510 = vmatpush.msrb.mxu0 %v2223_v55  ;;  %v2243_v29 = vld [vmem:[#allocation4 + $0x1e8] sm:$0xff]  ;;  %2470 = vmatpush.msrb.mxu3 %v2206_v14 }
 0x23f   :  { %v2041_v39 = vadd.f32 %v4813_v1, %v1961_v56  ;;  %1778 = vmatmul.f32.gmra.mxu0 %v4274_v46  ;;  %3535 = vmatmul.msk.f32.gmra.mxu2 %vm786_vm1, %v4223_v58  ;;  %v5835_v56 = vld [vmem:[#allocation54_spill] sm:$0xff] }
 0x240   :  { %1606 = vmatmul.f32.gmra.mxu1 %v4308_v25  ;;  %2547 = vmatpush.msrb.mxu2 %v2243_v29 }
 0x241   :  { %v2113_v22 = vmax.f32 %v2041_v39, 0.0  ;;  %3512 = vmatmul.msk.f32.gmra.mxu3 %vm786_vm1, %v4263_v40 }
 0x242   :  { %v1536_v57 = vpop.f32.mrf.mxu2 }
 0x243   :  { %v4976_v46 = vmax.f32 %v2110_v16, %v2113_v22  ;;  %v1537_v20 = vadd.f32 %v1536_v57, %v1447_v63  ;;  %v2190_v57 = vld [vmem:[#allocation4 + $0x40] sm:$0xff] }
 0x244   :  { %v1364_v58 = vpop.f32.mrf.mxu3  ;;  %v1450_v51 = vpop.f32.mrf.mxu0  ;;  %2429 = vmatpush.msrb.mxu1 %v2190_v57 }
 0x245   :  { %v1964_v6 = vmax.f32 %v1003_v59, %v1537_v20  ;;  %v4978_v54 = vadd.f32 %v1364_v58, %v1275_v49  ;;  %v1278_v12 = vpop.f32.mrf.mxu1  ;;  %v1006_v49 = vadd.f32 %v5835_v56, %v5834_v31  ;;  %v2222_v59 = vld [vmem:[#allocation4 + $0x140] sm:$0xff]  ;;  %v5836_v58 = vld [vmem:[#allocation62_spill] sm:$0xff]  ;;  %v2205_v31 = vld [vmem:[#allocation4 + $0xb8] sm:$0xff] }
 0x246   :  { %2511 = vmatpush.msrb.mxu0 %v2222_v59  ;;  %v2242_v56 = vld [vmem:[#allocation4 + $0x1e0] sm:$0xff]  ;;  %2471 = vmatpush.msrb.mxu3 %v2205_v31  ;;  %v2221_v59 = vld [vmem:[#allocation4 + $0x138] sm:$0xff] }
 0x247   :  { %1781 = vmatmul.f32.gmra.mxu0 %v4292_v38  ;;  %3536 = vmatmul.msk.f32.gmra.mxu2 %vm786_vm1, %v4250_v27  ;;  %v2044_v27 = vadd.f32 %v4813_v1, %v1964_v6 }
 0x248   :  { %1609 = vmatmul.f32.gmra.mxu1 %v4324_v47  ;;  %2548 = vmatpush.msrb.mxu2 %v2242_v56 }
 0x249   :  { %3513 = vmatmul.msk.f32.gmra.mxu3 %vm786_vm1, %v4288_v62  ;;  %v2116_v13 = vmax.f32 %v2044_v27, 0.0  ;;  %2512 = vmatpush.msrb.mxu0 %v2221_v59 }
 0x24a   :  { %v1539_v63 = vpop.f32.mrf.mxu2 }
 0x24b   :  { %v1540_v39 = vadd.f32 %v1539_v63, %v1450_v51  ;;  %v5837_v51 = vld [vmem:[#allocation57_spill] sm:$0xff] }
 0x24c   :  { %v1367_v38 = vpop.f32.mrf.mxu3  ;;  %v1453_v16 = vpop.f32.mrf.mxu0  ;;  %v1009_v6 = vadd.f32 %v5837_v51, %v5836_v58  ;;  %v2204_v51 = vld [vmem:[#allocation4 + $0xb0] sm:$0xff] }
 0x24d   :  { %v1967_v22 = vmax.f32 %v1006_v49, %v1540_v39  ;;  %v4989_v2 = vadd.f32 %v1367_v38, %v1278_v12  ;;  %v1281_v35 = vpop.f32.mrf.mxu1  ;;  %v2189_v49 = vld [vmem:[#allocation4 + $0x38] sm:$0xff]  ;;  %v5838_v38 = vld [vmem:[#allocation65_spill] sm:$0xff]  ;;  %2472 = vmatpush.msrb.mxu3 %v2204_v51 }
 0x24e   :  { %2430 = vmatpush.msrb.mxu1 %v2189_v49  ;;  %v5845_v51 = vld [vmem:[#allocation13_spill] sm:$0xff] }
 0x24f   :  { %v2047_v3 = vadd.f32 %v4813_v1, %v1967_v22  ;;  %1784 = vmatmul.f32.gmra.mxu0 %v4308_v25  ;;  %3537 = vmatmul.msk.f32.gmra.mxu2 %vm786_vm1, %v4263_v40 }
 0x250   :  { %1612 = vmatmul.f32.gmra.mxu1 %v4340_v61 }
 0x251   :  { %v2119_v26 = vmax.f32 %v2047_v3, 0.0  ;;  %3514 = vmatmul.msk.f32.gmra.mxu3 %vm786_vm1, %v4301_v17 }
 0x252   :  { %v1542_v20 = vpop.f32.mrf.mxu2 }
 0x253   :  { %v5000_v12 = vmax.f32 %v2116_v13, %v2119_v26  ;;  %v1543_v25 = vadd.f32 %v1542_v20, %v1453_v16  ;;  %v5839_v16 = vld [vmem:[#allocation60_spill] sm:$0xff] }
 0x254   :  { %v1370_v55 = vpop.f32.mrf.mxu3  ;;  %v1456_v40 = vpop.f32.mrf.mxu0  ;;  %v1012_v27 = vadd.f32 %v5839_v16, %v5838_v38  ;;  %v5842_v38 = vld [vmem:[#allocation8_spill] sm:$0xff] }
 0x255   :  { %v1970_v14 = vmax.f32 %v1009_v6, %v1543_v25  ;;  %v5002_v29 = vadd.f32 %v1370_v55, %v1281_v35  ;;  %v1284_v63 = vpop.f32.mrf.mxu1  ;;  %v2241_v6 = vld [vmem:[#allocation4 + $0x1d8] sm:$0xff]  ;;  %v5840_v55 = vld [vmem:[#allocation68_spill] sm:$0xff] }
 0x256   :  { %2549 = vmatpush.msrb.mxu2 %v2241_v6  ;;  %v5846_v6 = vld [vmem:[#allocation9_spill] sm:$0xff] }
 0x257   :  { %1787 = vmatmul.f32.gmra.mxu0 %v4324_v47  ;;  %3538 = vmatmul.msk.f32.gmra.mxu2 %vm786_vm1, %v4288_v62  ;;  %v2050_v62 = vadd.f32 %v4813_v1, %v1970_v14 }
 0x258   :  { %1615 = vmatmul.f32.gmra.mxu1 %v4356_v34 }
 0x259   :  { %3515 = vmatmul.msk.f32.gmra.mxu3 %vm786_vm1, %v4320_v45  ;;  %v2122_v20 = vmax.f32 %v2050_v62, 0.0  ;;  %v2188_v62 = vld [vmem:[#allocation4 + $0x30] sm:$0xff] }
 0x25a   :  { %v1545_v39 = vpop.f32.mrf.mxu2  ;;  %2431 = vmatpush.msrb.mxu1 %v2188_v62  ;;  %v5850_v62 = vld [vmem:[#allocation16_spill] sm:$0xff] }
 0x25b   :  { %v1546_v22 = vadd.f32 %v1545_v39, %v1456_v40  ;;  %v5841_v40 = vld [vmem:[#allocation63_spill] sm:$0xff] }
 0x25c   :  { %v1373_v47 = vpop.f32.mrf.mxu3  ;;  %v1459_v35 = vpop.f32.mrf.mxu0 }
 0x25d   :  { %v1973_v3 = vmax.f32 %v1012_v27, %v1546_v22  ;;  %v5013_v57 = vadd.f32 %v1373_v47, %v1284_v63  ;;  %v1287_v13 = vpop.f32.mrf.mxu1  ;;  %v5843_v27 = vld [vmem:[#allocation71_spill] sm:$0xff]  ;;  %v5844_v22 = vld [vmem:[#allocation66_spill] sm:$0xff] }
 0x25e   :  { %v1018_v47 = vadd.f32 %v5844_v22, %v5843_v27  ;;  %v2240_v22 = vld [vmem:[#allocation4 + $0x1d0] sm:$0xff] }
 0x25f   :  { %v2053_v26 = vadd.f32 %v4813_v1, %v1973_v3  ;;  %1790 = vmatmul.f32.gmra.mxu0 %v4340_v61  ;;  %3539 = vmatmul.msk.f32.gmra.mxu2 %vm786_vm1, %v4301_v17  ;;  %v1015_v61 = vadd.f32 %v5841_v40, %v5840_v55  ;;  %v2220_v3 = vld [vmem:[#allocation4 + $0x130] sm:$0xff] }
 0x260   :  { %1618 = vmatmul.f32.gmra.mxu1 %v4372_v48  ;;  %2513 = vmatpush.msrb.mxu0 %v2220_v3  ;;  %v5851_v3 = vld [vmem:[#allocation10_spill] sm:$0xff] }
 0x261   :  { %v2125_v58 = vmax.f32 %v2053_v26, 0.0  ;;  %3516 = vmatmul.msk.f32.gmra.mxu3 %vm786_vm1, %v4329_v5  ;;  %2550 = vmatpush.msrb.mxu2 %v2240_v22 }
 0x262   :  { %v1548_v25 = vpop.f32.mrf.mxu2 }
 0x263   :  { %v1549_v14 = vadd.f32 %v1548_v25, %v1459_v35  ;;  %v5024_v63 = vmax.f32 %v2122_v20, %v2125_v58 }
 0x264   :  { %v1376_v17 = vpop.f32.mrf.mxu3  ;;  %v1462_v31 = vpop.f32.mrf.mxu0 }
 0x265   :  { %v1976_v56 = vmax.f32 %v1015_v61, %v1549_v14  ;;  %v5026_v49 = vadd.f32 %v1376_v17, %v1287_v13  ;;  %v1290_v39 = vpop.f32.mrf.mxu1  ;;  %v5847_v61 = vld [vmem:[#allocation74_spill] sm:$0xff]  ;;  %v5848_v14 = vld [vmem:[#allocation69_spill] sm:$0xff] }
 0x266   :  { %v1021_v17 = vadd.f32 %v5848_v14, %v5847_v61 }
 0x267   :  { %1793 = vmatmul.f32.gmra.mxu0 %v4356_v34  ;;  %3540 = vmatmul.msk.f32.gmra.mxu2 %vm786_vm1, %v4320_v45  ;;  %v2056_v34 = vadd.f32 %v4813_v1, %v1976_v56 }
 0x268   :  { %1621 = vmatmul.f32.gmra.mxu1 %v4388_v7 }
 0x269   :  { %3517 = vmatmul.msk.f32.gmra.mxu3 %vm786_vm1, %v5842_v38  ;;  %v2128_v25 = vmax.f32 %v2056_v34, 0.0  ;;  %v2239_v34 = vld [vmem:[#allocation4 + $0x1c8] sm:$0xff] }
 0x26a   :  { %v1551_v16 = vpop.f32.mrf.mxu2  ;;  %2551 = vmatpush.msrb.mxu2 %v2239_v34  ;;  %v2186_v34 = vld [vmem:[#allocation4 + $0x20] sm:$0xff] }
 0x26b   :  { %v1552_v35 = vadd.f32 %v1551_v16, %v1462_v31 }
 0x26c   :  { %v1379_v13 = vpop.f32.mrf.mxu3  ;;  %v1465_v26 = vpop.f32.mrf.mxu0 }
 0x26d   :  { %v1979_v59 = vmax.f32 %v1018_v47, %v1552_v35  ;;  %v5037_v45 = vadd.f32 %v1379_v13, %v1290_v39  ;;  %v1293_v20 = vpop.f32.mrf.mxu1  ;;  %v2187_v47 = vld [vmem:[#allocation4 + $0x28] sm:$0xff] }
 0x26e   :  { %2432 = vmatpush.msrb.mxu1 %v2187_v47  ;;  %v2219_v13 = vld [vmem:[#allocation4 + $0x128] sm:$0xff] }
 0x26f   :  { %v2059_v58 = vadd.f32 %v4813_v1, %v1979_v59  ;;  %1796 = vmatmul.f32.gmra.mxu0 %v4372_v48  ;;  %3541 = vmatmul.msk.f32.gmra.mxu2 %vm786_vm1, %v4329_v5  ;;  %v2203_v5 = vld [vmem:[#allocation4 + $0xa8] sm:$0xff] }
 0x270   :  { %1624 = vmatmul.f32.gmra.mxu1 %v5845_v51  ;;  %2473 = vmatpush.msrb.mxu3 %v2203_v5  ;;  %v5856_v5 = vld [vmem:[#allocation11_spill] sm:$0xff] }
 0x271   :  { %3518 = vmatmul.msk.f32.gmra.mxu3 %vm786_vm1, %v5846_v6  ;;  %v2131_v55 = vmax.f32 %v2059_v58, 0.0  ;;  %2514 = vmatpush.msrb.mxu0 %v2219_v13  ;;  %v5853_v58 = vld [vmem:[#allocation72_spill] sm:$0xff]  ;;  %v5858_v13 = vld [vmem:[#allocation75_spill] sm:$0xff] }
 0x272   :  { %v1554_v40 = vpop.f32.mrf.mxu2  ;;  %2433 = vmatpush.msrb.mxu1 %v2186_v34 }
 0x273   :  { %v1555_v31 = vadd.f32 %v1554_v40, %v1465_v26  ;;  %v5048_v56 = vmax.f32 %v2128_v25, %v2131_v55  ;;  %v2202_v26 = vld [vmem:[#allocation4 + $0xa0] sm:$0xff] }
 0x274   :  { %v1382_v39 = vpop.f32.mrf.mxu3  ;;  %v1468_v16 = vpop.f32.mrf.mxu0  ;;  %2474 = vmatpush.msrb.mxu3 %v2202_v26 }
 0x275   :  { %5849 = vst [vmem:[#allocation26_spill] sm:$0xff] %v5048_v56  ;;  %v1982_v48 = vmax.f32 %v1021_v17, %v1555_v31  ;;  %v5050_v27 = vadd.f32 %v1382_v39, %v1293_v20  ;;  %v1296_v35 = vpop.f32.mrf.mxu1  ;;  %v5852_v20 = vld [vmem:[#allocation77_spill] sm:$0xff]  ;;  %v5855_v39 = vld [vmem:[#allocation19_spill] sm:$0xff] }
 0x276   :  { %v1024_v25 = vadd.f32 %v5853_v58, %v5852_v20 }
 0x277   :  { %1799 = vmatmul.f32.gmra.mxu0 %v4388_v7  ;;  %3542 = vmatmul.msk.f32.gmra.mxu2 %vm786_vm1, %v5842_v38  ;;  %v2062_v38 = vadd.f32 %v4813_v1, %v1982_v48  ;;  %v5857_v48 = vld [vmem:[#allocation80_spill] sm:$0xff] }
 0x278   :  { %1627 = vmatmul.f32.gmra.mxu1 %v5850_v62 }
 0x279   :  { %3519 = vmatmul.msk.f32.gmra.mxu3 %vm786_vm1, %v5851_v3 }
 0x27a   :  { %v1557_v59 = vpop.f32.mrf.mxu2 }
 0x27b   :  { %v1558_v55 = vadd.f32 %v1557_v59, %v1468_v16  ;;  %v2134_v16 = vmax.f32 %v2062_v38, 0.0  ;;  %v2218_v59 = vld [vmem:[#allocation4 + $0x120] sm:$0xff]  ;;  %v5861_v38 = vld [vmem:[#allocation14_spill] sm:$0xff] }
 0x27c   :  { %v1385_v7 = vpop.f32.mrf.mxu3  ;;  %v1471_v40 = vpop.f32.mrf.mxu0  ;;  %2515 = vmatpush.msrb.mxu0 %v2218_v59 }
 0x27d   :  { %v1985_v61 = vmax.f32 %v1024_v25, %v1558_v55  ;;  %v5061_v14 = vadd.f32 %v1385_v7, %v1296_v35  ;;  %v1583_v17 = vpop.f32.mrf.mxu1  ;;  %v1027_v35 = vadd.f32 %v5858_v13, %v5857_v48  ;;  %v5860_v7 = vld [vmem:[#allocation23_spill] sm:$0xff] }
 0x27f   :  { %5854 = vst [vmem:[#allocation18_spill] sm:$0xff] %v5061_v14  ;;  %v2065_v31 = vadd.f32 %v4813_v1, %v1985_v61  ;;  %1802 = vmatmul.f32.gmra.mxu0 %v5845_v51  ;;  %3543 = vmatmul.msk.f32.gmra.mxu2 %vm786_vm1, %v5846_v6  ;;  %v2238_v61 = vld [vmem:[#allocation4 + $0x1c0] sm:$0xff]  ;;  %v5866_v14 = vld [vmem:[#allocation25_spill] sm:$0xff] }
 0x280   :  { %1630 = vmatmul.f32.gmra.mxu1 %v5855_v39  ;;  %2552 = vmatpush.msrb.mxu2 %v2238_v61 }
 0x281   :  { %3520 = vmatmul.msk.f32.gmra.mxu3 %vm786_vm1, %v5856_v5  ;;  %v2137_v22 = vmax.f32 %v2065_v31, 0.0  ;;  %v2185_v31 = vld [vmem:[#allocation4 + $0x18] sm:$0xff] }
 0x282   :  { %v1560_v47 = vpop.f32.mrf.mxu2  ;;  %2434 = vmatpush.msrb.mxu1 %v2185_v31  ;;  %v2237_v31 = vld [vmem:[#allocation4 + $0x1b8] sm:$0xff] }
 0x283   :  { %v1561_v26 = vadd.f32 %v1560_v47, %v1471_v40  ;;  %v5072_v20 = vmax.f32 %v2134_v16, %v2137_v22  ;;  %v2201_v40 = vld [vmem:[#allocation4 + $0x98] sm:$0xff]  ;;  %v5862_v22 = vld [vmem:[#allocation82_spill] sm:$0xff]  ;;  %2553 = vmatpush.msrb.mxu2 %v2237_v31  ;;  %v5870_v31 = vld [vmem:[#allocation85_spill] sm:$0xff] }
 0x284   :  { %v1474_v51 = vpop.f32.mrf.mxu0  ;;  %v1672_v58 = vpop.f32.mrf.mxu3  ;;  %2475 = vmatpush.msrb.mxu3 %v2201_v40  ;;  %v5863_v47 = vld [vmem:[#allocation78_spill] sm:$0xff] }
 0x285   :  { %5859 = vst [vmem:[#allocation29_spill] sm:$0xff] %v5072_v20  ;;  %v1988_v6 = vmax.f32 %v1027_v35, %v1561_v26  ;;  %v1586_v25 = vpop.f32.mrf.mxu1  ;;  %v1673_v55 = vadd.f32 %v1672_v58, %v1583_v17  ;;  %v1030_v48 = vadd.f32 %v5863_v47, %v5862_v22  ;;  %v5864_v17 = vld [vmem:[#allocation20_spill] sm:$0xff] }
 0x287   :  { %1805 = vmatmul.f32.gmra.mxu0 %v5850_v62  ;;  %3544 = vmatmul.msk.f32.gmra.mxu2 %vm786_vm1, %v5851_v3  ;;  %v1923_v13 = vmax.f32 %v5864_v17, %v1673_v55  ;;  %v5865_v62 = vld [vmem:[#allocation86_spill] sm:$0xff]  ;;  %v2068_v59 = vadd.f32 %v4813_v1, %v1988_v6  ;;  %v5867_v55 = vld [vmem:[#allocation17_spill] sm:$0xff]  ;;  %v2217_v6 = vld [vmem:[#allocation4 + $0x118] sm:$0xff] }
 0x288   :  { %1633 = vmatmul.f32.gmra.mxu1 %v5860_v7  ;;  %v5084_v35 = vperm.slane %v5865_v62, 1  ;;  %2516 = vmatpush.msrb.mxu0 %v2217_v6  ;;  %v2216_v6 = vld [vmem:[#allocation4 + $0x110] sm:$0xff] }
 0x289   :  { %3521 = vmatmul.msk.f32.gmra.mxu3 %vm786_vm1, %v5861_v38 }
 0x28a   :  { %v1563_v16 = vpop.f32.mrf.mxu2  ;;  %v2003_v40 = vadd.f32 %v5084_v35, %v1923_v13  ;;  %2517 = vmatpush.msrb.mxu0 %v2216_v6 }
 0x28b   :  { %v1564_v3 = vadd.f32 %v1563_v16, %v1474_v51  ;;  %v2140_v16 = vmax.f32 %v2068_v59, 0.0  ;;  %v5868_v59 = vld [vmem:[#allocation83_spill] sm:$0xff] }
 0x28c   :  { %v1675_v26 = vpop.f32.mrf.mxu3  ;;  %v1761_v34 = vpop.f32.mrf.mxu0 }
 0x28d   :  { %v1991_v58 = vmax.f32 %v1030_v48, %v1564_v3  ;;  %v1676_v20 = vadd.f32 %v1675_v26, %v1586_v25  ;;  %v1589_v56 = vpop.f32.mrf.mxu1  ;;  %v2200_v25 = vld [vmem:[#allocation4 + $0x90] sm:$0xff] }
 0x28e   :  { %2476 = vmatpush.msrb.mxu3 %v2200_v25 }
 0x28f   :  { %v2071_v61 = vadd.f32 %v4813_v1, %v1991_v58  ;;  %v1926_v22 = vmax.f32 %v5866_v14, %v1676_v20  ;;  %1808 = vmatmul.f32.gmra.mxu0 %v5855_v39  ;;  %3545 = vmatmul.msk.f32.gmra.mxu2 %vm786_vm1, %v5856_v5  ;;  %v2075_v14 = vmax.f32 %v2003_v40, 0.0  ;;  %v5106_v40 = vperm.slane %v5865_v62, 2 }
 0x290   :  { %1636 = vmatmul.f32.gmra.mxu1 %v4488_v19 }
 0x291   :  { %v2006_v51 = vadd.f32 %v5084_v35, %v1926_v22  ;;  %3522 = vmatmul.msk.f32.gmra.mxu3 %vm786_vm1, %v5867_v55  ;;  %v2143_v47 = vmax.f32 %v2071_v61, 0.0  ;;  %v5869_v22 = vld [vmem:[#allocation28_spill] sm:$0xff] }
 0x292   :  { %v1850_v1 = vpop.f32.mrf.mxu2 }
 0x293   :  { %v2078_v39 = vmax.f32 %v2006_v51, 0.0  ;;  %v5097_v20 = vmax.f32 %v2140_v16, %v2143_v47  ;;  %v1851_v13 = vadd.f32 %v1850_v1, %v1761_v34  ;;  %v2199_v47 = vld [vmem:[#allocation4 + $0x88] sm:$0xff] }
 0x294   :  { %v1678_v5 = vpop.f32.mrf.mxu3  ;;  %v1764_v48 = vpop.f32.mrf.mxu0  ;;  %v2183_v1 = vld [vmem:[#allocation4 + $0x8] sm:$0xff]  ;;  %2477 = vmatpush.msrb.mxu3 %v2199_v47 }
 0x295   :  { %v5099_v17 = vmax.f32 %v2075_v14, %v2078_v39  ;;  %v1592_v3 = vpop.f32.mrf.mxu1  ;;  %v1679_v26 = vadd.f32 %v1678_v5, %v1589_v56  ;;  %v1924_v58 = vmax.f32 %v5868_v59, %v1851_v13  ;;  %v2184_v56 = vld [vmem:[#allocation4 + $0x10] sm:$0xff]  ;;  %v2198_v59 = vld [vmem:[#allocation4 + $0x80] sm:$0xff] }
 0x296   :  { %2435 = vmatpush.msrb.mxu1 %v2184_v56  ;;  %2478 = vmatpush.msrb.mxu3 %v2198_v59  ;;  %v2215_v59 = vld [vmem:[#allocation4 + $0x108] sm:$0xff] }
 0x297   :  { %1811 = vmatmul.f32.gmra.mxu0 %v5860_v7  ;;  %3546 = vmatmul.msk.f32.gmra.mxu2 %vm786_vm1, %v5861_v38  ;;  %v1929_v34 = vmax.f32 %v5869_v22, %v1679_v26  ;;  %v2004_v38 = vadd.f32 %v5106_v40, %v1924_v58  ;;  %v2182_v26 = vld [vmem:[#allocation4] sm:$0xff]  ;;  %v2236_v22 = vld [vmem:[#allocation4 + $0x1b0] sm:$0xff] }
 0x298   :  { %1639 = vmatmul.f32.gmra.mxu1 %v5807_v43  ;;  %2554 = vmatpush.msrb.mxu2 %v2236_v22 }
 0x299   :  { %3523 = vmatmul.msk.f32.gmra.mxu3 %vm786_vm1, %v5808_v33  ;;  %2436 = vmatpush.msrb.mxu1 %v2183_v1  ;;  %v2009_v39 = vadd.f32 %v5084_v35, %v1929_v34  ;;  %v2233_v1 = vld [vmem:[#allocation4 + $0x198] sm:$0xff] }
 0x29a   :  { %v1853_v61 = vpop.f32.mrf.mxu2  ;;  %2518 = vmatpush.msrb.mxu0 %v2215_v59 }
 0x29b   :  { %v1854_v51 = vadd.f32 %v1853_v61, %v1764_v48  ;;  %v5871_v48 = vld [vmem:[#allocation32_spill] sm:$0xff]  ;;  %2437 = vmatpush.msrb.mxu1 %v2182_v26 }
 0x29c   :  { %v1681_v7 = vpop.f32.mrf.mxu3  ;;  %v1767_v25 = vpop.f32.mrf.mxu0 }
 0x29d   :  { %v1927_v62 = vmax.f32 %v5870_v31, %v1854_v51  ;;  %v1682_v16 = vadd.f32 %v1681_v7, %v1592_v3  ;;  %v1595_v14 = vpop.f32.mrf.mxu1  ;;  %v2076_v3 = vmax.f32 %v2004_v38, 0.0  ;;  %v2235_v51 = vld [vmem:[#allocation4 + $0x1a8] sm:$0xff]  ;;  %v2234_v31 = vld [vmem:[#allocation4 + $0x1a0] sm:$0xff] }
 0x29e   :  { %2555 = vmatpush.msrb.mxu2 %v2235_v51  ;;  %v2214_v51 = vld [vmem:[#allocation4 + $0x100] sm:$0xff] }
 0x29f   :  { %v2007_v5 = vadd.f32 %v5106_v40, %v1927_v62  ;;  %v1932_v13 = vmax.f32 %v5871_v48, %v1682_v16  ;;  %1814 = vmatmul.f32.gmra.mxu0 %v4488_v19  ;;  %3547 = vmatmul.msk.f32.gmra.mxu2 %vm786_vm1, %v5867_v55  ;;  %v2081_v55 = vmax.f32 %v2009_v39, 0.0 }
 0x2a0   :  { %1642 = vmatmul.f32.gmra.mxu1 %v4533_v36  ;;  %2556 = vmatpush.msrb.mxu2 %v2234_v31 }
 0x2a1   :  { %v2079_v58 = vmax.f32 %v2007_v5, 0.0  ;;  %v2012_v61 = vadd.f32 %v5084_v35, %v1932_v13  ;;  %3524 = vmatmul.msk.f32.gmra.mxu3 %vm786_vm1, %v4471_v11  ;;  %v5872_v5 = vld [vmem:[#allocation12_spill] sm:$0xff]  ;;  %v5873_v13 = vld [vmem:[#allocation33_spill] sm:$0xff]  ;;  %2519 = vmatpush.msrb.mxu0 %v2214_v51  ;;  %v2276_v51 = vld [vmem:[#allocation4 + $0x2f0] sm:$0xff] }
 0x2a2   :  { %v1856_v34 = vpop.f32.mrf.mxu2  ;;  %2557 = vmatpush.msrb.mxu2 %v2233_v1 }
 0x2a3   :  { %v5124_v19 = vmax.f32 %v2076_v3, %v2079_v58  ;;  %v2084_v56 = vmax.f32 %v2012_v61, 0.0  ;;  %v1857_v38 = vadd.f32 %v1856_v34, %v1767_v25  ;;  %v2232_v25 = vld [vmem:[#allocation4 + $0x190] sm:$0xff]  ;;  %v5874_v61 = vld [vmem:[#allocation31_spill] sm:$0xff] }
 0x2a4   :  { %v1684_v6 = vpop.f32.mrf.mxu3  ;;  %v1770_v7 = vpop.f32.mrf.mxu0  ;;  %2558 = vmatpush.msrb.mxu2 %v2232_v25 }
 0x2a5   :  { %v5126_v62 = vmax.f32 %v2081_v55, %v2084_v56  ;;  %v1598_v16 = vpop.f32.mrf.mxu1  ;;  %v1685_v47 = vadd.f32 %v1684_v6, %v1595_v14  ;;  %v1930_v39 = vmax.f32 %v5872_v5, %v1857_v38  ;;  %v2230_v55 = vld [vmem:[#allocation4 + $0x180] sm:$0xff]  ;;  %v5875_v38 = vld [vmem:[#allocation35_spill] sm:$0xff] }
 0x2a7   :  { %1817 = vmatmul.f32.gmra.mxu0 %v5807_v43  ;;  %3548 = vmatmul.msk.f32.gmra.mxu2 %vm786_vm1, %v5808_v33  ;;  %v1935_v26 = vmax.f32 %v5873_v13, %v1685_v47  ;;  %v2231_v43 = vld [vmem:[#allocation4 + $0x188] sm:$0xff]  ;;  %v2010_v33 = vadd.f32 %v5106_v40, %v1930_v39 }
 0x2a8   :  { %1645 = vmatmul.f32.gmra.mxu1 %v4556_v10  ;;  %2559 = vmatpush.msrb.mxu2 %v2231_v43 }
 0x2a9   :  { %3525 = vmatmul.msk.f32.gmra.mxu3 %vm786_vm1, %v4510_v0  ;;  %v2015_v6 = vadd.f32 %v5084_v35, %v1935_v26 }
 0x2aa   :  { %v1859_v48 = vpop.f32.mrf.mxu2  ;;  %2560 = vmatpush.msrb.mxu2 %v2230_v55 }
 0x2ab   :  { %v1860_v14 = vadd.f32 %v1859_v48, %v1770_v7  ;;  %v2087_v39 = vmax.f32 %v2015_v6, 0.0 }
 0x2ac   :  { %v1687_v3 = vpop.f32.mrf.mxu3  ;;  %v1773_v58 = vpop.f32.mrf.mxu0 }
 0x2ad   :  { %v1933_v22 = vmax.f32 %v5874_v61, %v1860_v14  ;;  %v1688_v34 = vadd.f32 %v1687_v3, %v1598_v16  ;;  %v1601_v56 = vpop.f32.mrf.mxu1  ;;  %v2082_v16 = vmax.f32 %v2010_v33, 0.0  ;;  %v5876_v33 = vld [vmem:[#allocation36_spill] sm:$0xff] }
 0x2af   :  { %v2013_v7 = vadd.f32 %v5106_v40, %v1933_v22  ;;  %v1938_v31 = vmax.f32 %v5875_v38, %v1688_v34  ;;  %1820 = vmatmul.f32.gmra.mxu0 %v4533_v36  ;;  %3549 = vmatmul.msk.f32.gmra.mxu2 %vm786_vm1, %v4471_v11  ;;  %v2277_v22 = vld [vmem:[#allocation4 + $0x2f8] sm:$0xff] }
 0x2b0   :  { %1648 = vmatmul.f32.gmra.mxu1 %v4574_v50  ;;  %v2261_v34 = vld [vmem:[#allocation4 + $0x278] sm:$0xff]  ;;  %2627 = vmatpush.msra.mxu3 %v2277_v22  ;;  %v2292_v22 = vld [vmem:[#allocation4 + $0x370] sm:$0xff] }
 0x2b1   :  { %v2018_v47 = vadd.f32 %v5084_v35, %v1938_v31  ;;  %3526 = vmatmul.msk.f32.gmra.mxu3 %vm786_vm1, %v4520_v23  ;;  %v2085_v1 = vmax.f32 %v2013_v7, 0.0  ;;  %2586 = vmatpush.msra.mxu1 %v2261_v34  ;;  %v5877_v31 = vld [vmem:[#allocation38_spill] sm:$0xff]  ;;  %v2258_v34 = vld [vmem:[#allocation4 + $0x260] sm:$0xff] }
 0x2b2   :  { %v1862_v5 = vpop.f32.mrf.mxu2  ;;  %2628 = vmatpush.msra.mxu3 %v2276_v51 }
 0x2b3   :  { %v2090_v25 = vmax.f32 %v2018_v47, 0.0  ;;  %v5148_v48 = vmax.f32 %v2082_v16, %v2085_v1  ;;  %v1863_v36 = vadd.f32 %v1862_v5, %v1773_v58  ;;  %v5878_v1 = vld [vmem:[#allocation24_spill] sm:$0xff] }
 0x2b4   :  { %v1690_v13 = vpop.f32.mrf.mxu3  ;;  %v1776_v26 = vpop.f32.mrf.mxu0 }
 0x2b5   :  { %v5150_v14 = vmax.f32 %v2087_v39, %v2090_v25  ;;  %v1604_v11 = vpop.f32.mrf.mxu1  ;;  %v1691_v59 = vadd.f32 %v1690_v13, %v1601_v56  ;;  %v1936_v43 = vmax.f32 %v4834_v9, %v1863_v36 }
 0x2b7   :  { %1823 = vmatmul.f32.gmra.mxu0 %v4556_v10  ;;  %3550 = vmatmul.msk.f32.gmra.mxu2 %vm786_vm1, %v4510_v0  ;;  %v1941_v61 = vmax.f32 %v5876_v33, %v1691_v59  ;;  %v2016_v0 = vadd.f32 %v5106_v40, %v1936_v43  ;;  %v2259_v33 = vld [vmem:[#allocation4 + $0x268] sm:$0xff] }
 0x2b8   :  { %1651 = vmatmul.f32.gmra.mxu1 %v4591_v21 }
 0x2b9   :  { %3527 = vmatmul.msk.f32.gmra.mxu3 %vm786_vm1, %v4550_v8  ;;  %v2021_v7 = vadd.f32 %v5084_v35, %v1941_v61 }
 0x2ba   :  { %v1865_v3 = vpop.f32.mrf.mxu2 }
 0x2bb   :  { %v1866_v58 = vadd.f32 %v1865_v3, %v1776_v26  ;;  %v2093_v25 = vmax.f32 %v2021_v7, 0.0  ;;  %v2260_v26 = vld [vmem:[#allocation4 + $0x270] sm:$0xff]  ;;  %v2293_v3 = vld [vmem:[#allocation4 + $0x378] sm:$0xff]  ;;  %v2291_v7 = vld [vmem:[#allocation4 + $0x368] sm:$0xff] }
 0x2bc   :  { %v1693_v55 = vpop.f32.mrf.mxu3  ;;  %v1779_v56 = vpop.f32.mrf.mxu0  ;;  %2587 = vmatpush.msra.mxu1 %v2260_v26  ;;  %2668 = vmatpush.msra.mxu0 %v2293_v3  ;;  %v5882_v26 = vld [vmem:[#allocation43_spill] sm:$0xff] }
 0x2bd   :  { %v1939_v9 = vmax.f32 %v4845_v30, %v1866_v58  ;;  %v1694_v10 = vadd.f32 %v1693_v55, %v1604_v11  ;;  %v1607_v6 = vpop.f32.mrf.mxu1  ;;  %v2088_v30 = vmax.f32 %v2016_v0, 0.0  ;;  %v5879_v55 = vld [vmem:[#allocation21_spill] sm:$0xff]  ;;  %v2257_v0 = vld [vmem:[#allocation4 + $0x258] sm:$0xff] }
 0x2be   :  { %2588 = vmatpush.msra.mxu1 %v2259_v33  ;;  %2669 = vmatpush.msra.mxu0 %v2292_v22 }
 0x2bf   :  { %v2019_v38 = vadd.f32 %v5106_v40, %v1939_v9  ;;  %v1944_v47 = vmax.f32 %v5877_v31, %v1694_v10  ;;  %1826 = vmatmul.f32.gmra.mxu0 %v4574_v50  ;;  %3551 = vmatmul.msk.f32.gmra.mxu2 %vm786_vm1, %v4520_v23  ;;  %v2275_v23 = vld [vmem:[#allocation4 + $0x2e8] sm:$0xff]  ;;  %v5880_v9 = vld [vmem:[#allocation40_spill] sm:$0xff] }
 0x2c0   :  { %2438 = vmatmul.f32.vlgmr.msrb.gmra.mxu1 %v5878_v1  ;;  %2629 = vmatpush.msra.mxu3 %v2275_v23 }
 0x2c1   :  { %v2024_v16 = vadd.f32 %v5084_v35, %v1944_v47  ;;  %2479 = vmatmul.f32.vlgmr.msrb.gmra.mxu3 %v5099_v17  ;;  %v2091_v5 = vmax.f32 %v2019_v38, 0.0  ;;  %v2274_v17 = vld [vmem:[#allocation4 + $0x2e0] sm:$0xff]  ;;  %2589 = vmatpush.msra.mxu1 %v2258_v34 }
 0x2c2   :  { %v1868_v39 = vpop.f32.mrf.mxu2  ;;  %2630 = vmatpush.msra.mxu3 %v2274_v17  ;;  %2670 = vmatpush.msra.mxu0 %v2291_v7  ;;  %v2290_v47 = vld [vmem:[#allocation4 + $0x360] sm:$0xff]  ;;  %v2308_v17 = vld [vmem:[#allocation4 + $0x3f0] sm:$0xff] }
 0x2c3   :  { %v2096_v13 = vmax.f32 %v2024_v16, 0.0  ;;  %v5171_v36 = vmax.f32 %v2088_v30, %v2091_v5  ;;  %v1869_v50 = vadd.f32 %v1868_v39, %v1779_v56  ;;  %v5881_v16 = vld [vmem:[#allocation15_spill] sm:$0xff]  ;;  %2590 = vmatpush.msra.mxu1 %v2257_v0  ;;  %v2256_v5 = vld [vmem:[#allocation4 + $0x250] sm:$0xff] }
 0x2c4   :  { %v1696_v11 = vpop.f32.mrf.mxu3  ;;  %v1782_v59 = vpop.f32.mrf.mxu0  ;;  %2671 = vmatpush.msra.mxu0 %v2290_v47  ;;  %v2253_v47 = vld [vmem:[#allocation4 + $0x238] sm:$0xff] }
 0x2c5   :  { %v5173_v43 = vmax.f32 %v2093_v25, %v2096_v13  ;;  %v1610_v61 = vpop.f32.mrf.mxu1  ;;  %v1697_v58 = vadd.f32 %v1696_v11, %v1607_v6  ;;  %v1942_v51 = vmax.f32 %v4858_v32, %v1869_v50  ;;  %v2273_v6 = vld [vmem:[#allocation4 + $0x2d8] sm:$0xff]  ;;  %2591 = vmatpush.msra.mxu1 %v2256_v5 }
 0x2c6   :  { %2631 = vmatpush.msra.mxu3 %v2273_v6  ;;  %v2309_v50 = vld [vmem:[#allocation4 + $0x3f8] sm:$0xff]  ;;  %v2270_v6 = vld [vmem:[#allocation4 + $0x2c0] sm:$0xff] }
 0x2c7   :  { %1829 = vmatmul.f32.gmra.mxu0 %v4591_v21  ;;  %3552 = vmatmul.msk.f32.gmra.mxu2 %vm786_vm1, %v4550_v8  ;;  %v1947_v10 = vmax.f32 %v5880_v9, %v1697_v58  ;;  %v2272_v8 = vld [vmem:[#allocation4 + $0x2d0] sm:$0xff]  ;;  %v2022_v32 = vadd.f32 %v5106_v40, %v1942_v51  ;;  %v2307_v51 = vld [vmem:[#allocation4 + $0x3e8] sm:$0xff]  ;;  %v2305_v5 = vld [vmem:[#allocation4 + $0x3d8] sm:$0xff] }
 0x2c8   :  { %2441 = vmatmul.f32.gmra.mxu1 %v5879_v55  ;;  %2632 = vmatpush.msra.mxu3 %v2272_v8  ;;  %v2288_v8 = vld [vmem:[#allocation4 + $0x350] sm:$0xff] }
 0x2c9   :  { %2482 = vmatmul.f32.gmra.mxu3 %v5126_v62  ;;  %v2027_v25 = vadd.f32 %v5084_v35, %v1947_v10  ;;  %2709 = vmatpush.msra.mxu2 %v2309_v50  ;;  %v2094_v23 = vmax.f32 %v2022_v32, 0.0  ;;  %v2271_v10 = vld [vmem:[#allocation4 + $0x2c8] sm:$0xff]  ;;  %v2306_v32 = vld [vmem:[#allocation4 + $0x3e0] sm:$0xff] }
 0x2ca   :  { %v1871_v56 = vpop.f32.mrf.mxu2  ;;  %2633 = vmatpush.msra.mxu3 %v2271_v10 }
 0x2cb   :  { %v1872_v21 = vadd.f32 %v1871_v56, %v1782_v59  ;;  %v2255_v59 = vld [vmem:[#allocation4 + $0x248] sm:$0xff]  ;;  %2710 = vmatpush.msra.mxu2 %v2308_v17  ;;  %v2286_v17 = vld [vmem:[#allocation4 + $0x340] sm:$0xff] }
 0x2cc   :  { %v1699_v38 = vpop.f32.mrf.mxu3  ;;  %v1785_v31 = vpop.f32.mrf.mxu0  ;;  %2592 = vmatpush.msra.mxu1 %v2255_v59  ;;  %2634 = vmatpush.msra.mxu3 %v2270_v6  ;;  %v2268_v59 = vld [vmem:[#allocation4 + $0x2b0] sm:$0xff] }
 0x2cd   :  { %v1945_v1 = vmax.f32 %v5881_v16, %v1872_v21  ;;  %v1700_v30 = vadd.f32 %v1699_v38, %v1610_v61  ;;  %v1613_v39 = vpop.f32.mrf.mxu1  ;;  %v2254_v61 = vld [vmem:[#allocation4 + $0x240] sm:$0xff]  ;;  %2711 = vmatpush.msra.mxu2 %v2307_v51  ;;  %v2289_v21 = vld [vmem:[#allocation4 + $0x358] sm:$0xff]  ;;  %v5884_v51 = vld [vmem:[#allocation49_spill] sm:$0xff] }
 0x2ce   :  { %2593 = vmatpush.msra.mxu1 %v2254_v61  ;;  %2672 = vmatpush.msra.mxu0 %v2289_v21  ;;  %v2250_v61 = vld [vmem:[#allocation4 + $0x220] sm:$0xff]  ;;  %v2248_v6 = vld [vmem:[#allocation4 + $0x210] sm:$0xff] }
 0x2cf   :  { %v2025_v13 = vadd.f32 %v5106_v40, %v1945_v1  ;;  %v1950_v11 = vmax.f32 %v5882_v26, %v1700_v30  ;;  %2520 = vmatmul.f32.vlgmr.msrb.gmra.mxu0 %v5124_v19  ;;  %2561 = vmatmul.f32.vlgmr.msrb.gmra.mxu2 %v5879_v55  ;;  %v2099_v19 = vmax.f32 %v2027_v25, 0.0  ;;  %v2251_v30 = vld [vmem:[#allocation4 + $0x228] sm:$0xff]  ;;  %v2269_v26 = vld [vmem:[#allocation4 + $0x2b8] sm:$0xff] }
 0x2d0   :  { %2444 = vmatmul.f32.gmra.mxu1 %v4880_v37  ;;  %2673 = vmatpush.msra.mxu0 %v2288_v8 }
 0x2d1   :  { %v2097_v3 = vmax.f32 %v2025_v13, 0.0  ;;  %v2030_v33 = vadd.f32 %v5084_v35, %v1950_v11  ;;  %2485 = vmatmul.f32.gmra.mxu3 %v5150_v14  ;;  %2594 = vmatpush.msra.mxu1 %v2253_v47  ;;  %v2287_v11 = vld [vmem:[#allocation4 + $0x348] sm:$0xff] }
 0x2d2   :  { %v1874_v58 = vpop.f32.mrf.mxu2  ;;  %2712 = vmatpush.msra.mxu2 %v2306_v32  ;;  %2635 = vmatpush.msra.mxu3 %v2269_v26  ;;  %v2246_v26 = vld [vmem:[#allocation4 + $0x200] sm:$0xff] }
 0x2d3   :  { %v2102_v22 = vmax.f32 %v2030_v33, 0.0  ;;  %v5192_v34 = vmax.f32 %v2094_v23, %v2097_v3  ;;  %v1875_v9 = vadd.f32 %v1874_v58, %v1785_v31  ;;  %v2252_v31 = vld [vmem:[#allocation4 + $0x230] sm:$0xff]  ;;  %2674 = vmatpush.msra.mxu0 %v2287_v11 }
 0x2d4   :  { %v1702_v55 = vpop.f32.mrf.mxu3  ;;  %v1788_v56 = vpop.f32.mrf.mxu0  ;;  %2595 = vmatpush.msra.mxu1 %v2252_v31  ;;  %2713 = vmatpush.msra.mxu2 %v2305_v5 }
 0x2d5   :  { %v5194_v0 = vmax.f32 %v2099_v19, %v2102_v22  ;;  %v1616_v7 = vpop.f32.mrf.mxu1  ;;  %v1703_v38 = vadd.f32 %v1702_v55, %v1613_v39  ;;  %v1948_v16 = vmax.f32 %v4882_v24, %v1875_v9  ;;  %v5883_v39 = vld [vmem:[#allocation46_spill] sm:$0xff]  ;;  %2636 = vmatpush.msra.mxu3 %v2268_v59  ;;  %2675 = vmatpush.msra.mxu0 %v2286_v17 }
 0x2d6   :  { %2596 = vmatpush.msra.mxu1 %v2251_v30  ;;  %v2267_v30 = vld [vmem:[#allocation4 + $0x2a8] sm:$0xff] }
 0x2d7   :  { %2523 = vmatmul.f32.gmra.mxu0 %v5148_v48  ;;  %2564 = vmatmul.f32.gmra.mxu2 %v4880_v37  ;;  %v1953_v25 = vmax.f32 %v5883_v39, %v1703_v38  ;;  %v2028_v24 = vadd.f32 %v5106_v40, %v1948_v16  ;;  %v2247_v16 = vld [vmem:[#allocation4 + $0x208] sm:$0xff] }
 0x2d8   :  { %2447 = vmatmul.f32.gmra.mxu1 %v4904_v42  ;;  %2637 = vmatpush.msra.mxu3 %v2267_v30  ;;  %v2297_v30 = vld [vmem:[#allocation4 + $0x398] sm:$0xff] }
 0x2d9   :  { %2488 = vmatmul.f32.gmra.mxu3 %v5173_v43  ;;  %v2033_v19 = vadd.f32 %v5084_v35, %v1953_v25  ;;  %2597 = vmatpush.msra.mxu1 %v2250_v61  ;;  %v2100_v9 = vmax.f32 %v2028_v24, 0.0  ;;  %v2285_v25 = vld [vmem:[#allocation4 + $0x338] sm:$0xff]  ;;  %v2266_v24 = vld [vmem:[#allocation4 + $0x2a0] sm:$0xff] }
 0x2da   :  { %v1877_v1 = vpop.f32.mrf.mxu2  ;;  %2676 = vmatpush.msra.mxu0 %v2285_v25  ;;  %v2265_v61 = vld [vmem:[#allocation4 + $0x298] sm:$0xff]  ;;  %2638 = vmatpush.msra.mxu3 %v2266_v24 }
 0x2db   :  { %v1878_v13 = vadd.f32 %v1877_v1, %v1788_v56  ;;  %v2249_v56 = vld [vmem:[#allocation4 + $0x218] sm:$0xff]  ;;  %v2105_v38 = vmax.f32 %v2033_v19, 0.0 }
 0x2dc   :  { %v1705_v50 = vpop.f32.mrf.mxu3  ;;  %v1791_v23 = vpop.f32.mrf.mxu0  ;;  %2598 = vmatpush.msra.mxu1 %v2249_v56  ;;  %v2264_v56 = vld [vmem:[#allocation4 + $0x290] sm:$0xff]  ;;  %2639 = vmatpush.msra.mxu3 %v2265_v61 }
 0x2dd   :  { %v1951_v3 = vmax.f32 %v4893_v15, %v1878_v13  ;;  %v1706_v33 = vadd.f32 %v1705_v50, %v1616_v7  ;;  %v1619_v58 = vpop.f32.mrf.mxu1  ;;  %v2304_v15 = vld [vmem:[#allocation4 + $0x3d0] sm:$0xff]  ;;  %v2303_v7 = vld [vmem:[#allocation4 + $0x3c8] sm:$0xff]  ;;  %v2302_v13 = vld [vmem:[#allocation4 + $0x3c0] sm:$0xff] }
 0x2de   :  { %2714 = vmatpush.msra.mxu2 %v2304_v15  ;;  %2599 = vmatpush.msra.mxu1 %v2248_v6  ;;  %v2301_v50 = vld [vmem:[#allocation4 + $0x3b8] sm:$0xff]  ;;  %v2298_v6 = vld [vmem:[#allocation4 + $0x3a0] sm:$0xff] }
 0x2df   :  { %v2031_v22 = vadd.f32 %v5106_v40, %v1951_v3  ;;  %v1956_v55 = vmax.f32 %v5884_v51, %v1706_v33  ;;  %2526 = vmatmul.f32.gmra.mxu0 %v5171_v36  ;;  %2567 = vmatmul.f32.gmra.mxu2 %v4904_v42  ;;  %v2284_v3 = vld [vmem:[#allocation4 + $0x330] sm:$0xff]  ;;  %v2299_v51 = vld [vmem:[#allocation4 + $0x3a8] sm:$0xff] }
 0x2e0   :  { %2450 = vmatmul.f32.gmra.mxu1 %v4928_v53  ;;  %2715 = vmatpush.msra.mxu2 %v2303_v7  ;;  %v2282_v7 = vld [vmem:[#allocation4 + $0x320] sm:$0xff] }
 0x2e1   :  { %v2103_v10 = vmax.f32 %v2031_v22, 0.0  ;;  %v2036_v21 = vadd.f32 %v5084_v35, %v1956_v55  ;;  %2491 = vmatmul.f32.gmra.mxu3 %v5194_v0  ;;  %2600 = vmatpush.msra.mxu1 %v2247_v16  ;;  %v2283_v55 = vld [vmem:[#allocation4 + $0x328] sm:$0xff] }
 0x2e2   :  { %v1880_v8 = vpop.f32.mrf.mxu2  ;;  %2716 = vmatpush.msra.mxu2 %v2302_v13  ;;  %2677 = vmatpush.msra.mxu0 %v2284_v3  ;;  %v2295_v3 = vld [vmem:[#allocation4 + $0x388] sm:$0xff] }
 0x2e3   :  { %v5212_v47 = vmax.f32 %v2100_v9, %v2103_v10  ;;  %v2108_v32 = vmax.f32 %v2036_v21, 0.0  ;;  %v1881_v39 = vadd.f32 %v1880_v8, %v1791_v23  ;;  %2601 = vmatpush.msra.mxu1 %v2246_v26  ;;  %v2300_v23 = vld [vmem:[#allocation4 + $0x3b0] sm:$0xff]  ;;  %2640 = vmatpush.msra.mxu3 %v2264_v56 }
 0x2e4   :  { %v1708_v31 = vpop.f32.mrf.mxu3  ;;  %v1794_v1 = vpop.f32.mrf.mxu0  ;;  %2717 = vmatpush.msra.mxu2 %v2301_v50  ;;  %2678 = vmatpush.msra.mxu0 %v2283_v55  ;;  %v2296_v26 = vld [vmem:[#allocation4 + $0x390] sm:$0xff] }
 0x2e5   :  { %v5214_v5 = vmax.f32 %v2105_v38, %v2108_v32  ;;  %v1622_v11 = vpop.f32.mrf.mxu1  ;;  %v1709_v59 = vadd.f32 %v1708_v31, %v1619_v58  ;;  %v1954_v33 = vmax.f32 %v4906_v60, %v1881_v39  ;;  %v5885_v58 = vld [vmem:[#allocation52_spill] sm:$0xff]  ;;  %v2263_v38 = vld [vmem:[#allocation4 + $0x288] sm:$0xff]  ;;  %v5886_v31 = vld [vmem:[#allocation55_spill] sm:$0xff] }
 0x2e6   :  { %2718 = vmatpush.msra.mxu2 %v2300_v23  ;;  %2679 = vmatpush.msra.mxu0 %v2282_v7  ;;  %v2280_v23 = vld [vmem:[#allocation4 + $0x310] sm:$0xff] }
 0x2e7   :  { %2529 = vmatmul.f32.gmra.mxu0 %v5192_v34  ;;  %2570 = vmatmul.f32.gmra.mxu2 %v4928_v53  ;;  %v1959_v19 = vmax.f32 %v5885_v58, %v1709_v59  ;;  %v2034_v60 = vadd.f32 %v5106_v40, %v1954_v33  ;;  %v2281_v33 = vld [vmem:[#allocation4 + $0x318] sm:$0xff]  ;;  %v5887_v7 = vld [vmem:[#allocation58_spill] sm:$0xff] }
 0x2e8   :  { %2453 = vmatmul.f32.gmra.mxu1 %v4952_v41  ;;  %2719 = vmatpush.msra.mxu2 %v2299_v51  ;;  %v2294_v51 = vld [vmem:[#allocation4 + $0x380] sm:$0xff] }
 0x2e9   :  { %2494 = vmatmul.f32.gmra.mxu3 %v5214_v5  ;;  %v2039_v32 = vadd.f32 %v5084_v35, %v1959_v19  ;;  %v2106_v39 = vmax.f32 %v2034_v60, 0.0  ;;  %2680 = vmatpush.msra.mxu0 %v2281_v33  ;;  %v2341_v60 = vld [vmem:[#allocation4 + $0x4f8] sm:$0xff] }
 0x2ea   :  { %v1883_v17 = vpop.f32.mrf.mxu2  ;;  %2720 = vmatpush.msra.mxu2 %v2298_v6  ;;  %2641 = vmatpush.msra.mxu3 %v2263_v38  ;;  %v2340_v6 = vld [vmem:[#allocation4 + $0x4f0] sm:$0xff]  ;;  %v2357_v33 = vld [vmem:[#allocation4 + $0x578] sm:$0xff] }
 0x2eb   :  { %v1884_v22 = vadd.f32 %v1883_v17, %v1794_v1  ;;  %v2111_v59 = vmax.f32 %v2039_v32, 0.0  ;;  %2681 = vmatpush.msra.mxu0 %v2280_v23  ;;  %v2323_v23 = vld [vmem:[#allocation4 + $0x468] sm:$0xff] }
 0x2ec   :  { %v1711_v15 = vpop.f32.mrf.mxu3  ;;  %v1797_v9 = vpop.f32.mrf.mxu0  ;;  %2721 = vmatpush.msra.mxu2 %v2297_v30 }
 0x2ed   :  { %v1957_v10 = vmax.f32 %v4917_v28, %v1884_v22  ;;  %v1712_v21 = vadd.f32 %v1711_v15, %v1622_v11  ;;  %v1625_v8 = vpop.f32.mrf.mxu1  ;;  %v2262_v28 = vld [vmem:[#allocation4 + $0x280] sm:$0xff]  ;;  %v2279_v15 = vld [vmem:[#allocation4 + $0x308] sm:$0xff] }
 0x2ee   :  { %2642 = vmatpush.msra.mxu3 %v2262_v28  ;;  %2722 = vmatpush.msra.mxu2 %v2296_v26 }
 0x2ef   :  { %v2037_v16 = vadd.f32 %v5106_v40, %v1957_v10  ;;  %v1962_v1 = vmax.f32 %v5886_v31, %v1712_v21  ;;  %2532 = vmatmul.f32.gmra.mxu0 %v5212_v47  ;;  %2573 = vmatmul.f32.gmra.mxu2 %v4952_v41  ;;  %v2278_v10 = vld [vmem:[#allocation4 + $0x300] sm:$0xff]  ;;  %v2325_v21 = vld [vmem:[#allocation4 + $0x478] sm:$0xff] }
 0x2f0   :  { %2456 = vmatmul.f32.gmra.mxu1 %v4976_v46  ;;  %2723 = vmatpush.msra.mxu2 %v2295_v3  ;;  %v2339_v3 = vld [vmem:[#allocation4 + $0x4e8] sm:$0xff] }
 0x2f1   :  { %v2109_v25 = vmax.f32 %v2037_v16, 0.0  ;;  %v2042_v13 = vadd.f32 %v5084_v35, %v1962_v1  ;;  %2682 = vmatpush.msra.mxu0 %v2279_v15  ;;  %2791 = vmatpush.msrb.mxu3 %v2341_v60 }
 0x2f2   :  { %v1886_v11 = vpop.f32.mrf.mxu2  ;;  %2724 = vmatpush.msra.mxu2 %v2294_v51  ;;  %2750 = vmatpush.msrb.mxu1 %v2325_v21  ;;  %v2356_v51 = vld [vmem:[#allocation4 + $0x570] sm:$0xff] }
 0x2f3   :  { %v5231_v50 = vmax.f32 %v2106_v39, %v2109_v25  ;;  %v2114_v24 = vmax.f32 %v2042_v13, 0.0  ;;  %v1887_v19 = vadd.f32 %v1886_v11, %v1797_v9  ;;  %2683 = vmatpush.msra.mxu0 %v2278_v10  ;;  %2792 = vmatpush.msrb.mxu3 %v2340_v6  ;;  %v5888_v25 = vld [vmem:[#allocation61_spill] sm:$0xff]  ;;  %v2337_v6 = vld [vmem:[#allocation4 + $0x4d8] sm:$0xff] }
 0x2f4   :  { %v1714_v61 = vpop.f32.mrf.mxu3  ;;  %v1800_v17 = vpop.f32.mrf.mxu0 }
 0x2f5   :  { %v5233_v58 = vmax.f32 %v2111_v59, %v2114_v24  ;;  %v1628_v22 = vpop.f32.mrf.mxu1  ;;  %v1715_v55 = vadd.f32 %v1714_v61, %v1625_v8  ;;  %v1960_v56 = vmax.f32 %v4930_v4, %v1887_v19  ;;  %v2324_v24 = vld [vmem:[#allocation4 + $0x470] sm:$0xff]  ;;  %2793 = vmatpush.msrb.mxu3 %v2339_v3  ;;  %v2338_v61 = vld [vmem:[#allocation4 + $0x4e0] sm:$0xff]  ;;  %2832 = vmatpush.msrb.mxu0 %v2357_v33  ;;  %v5890_v3 = vld [vmem:[#allocation67_spill] sm:$0xff] }
 0x2f6   :  { %2751 = vmatpush.msrb.mxu1 %v2324_v24 }
 0x2f7   :  { %2497 = vmatmul.f32.gmra.mxu3 %v5233_v58  ;;  %2535 = vmatmul.f32.gmra.mxu0 %v5231_v50  ;;  %v1965_v8 = vmax.f32 %v5887_v7, %v1715_v55  ;;  %v2040_v4 = vadd.f32 %v5106_v40, %v1960_v56  ;;  %v2355_v7 = vld [vmem:[#allocation4 + $0x568] sm:$0xff] }
 0x2f8   :  { %2576 = vmatmul.f32.gmra.mxu2 %v4976_v46  ;;  %2459 = vmatmul.f32.gmra.mxu1 %v5000_v12 }
 0x2f9   :  { %v2045_v28 = vadd.f32 %v5084_v35, %v1965_v8  ;;  %v2112_v26 = vmax.f32 %v2040_v4, 0.0  ;;  %2752 = vmatpush.msrb.mxu1 %v2323_v23  ;;  %2794 = vmatpush.msrb.mxu3 %v2338_v61  ;;  %v2321_v8 = vld [vmem:[#allocation4 + $0x458] sm:$0xff]  ;;  %v5889_v4 = vld [vmem:[#allocation64_spill] sm:$0xff] }
 0x2fa   :  { %v1889_v9 = vpop.f32.mrf.mxu2  ;;  %2833 = vmatpush.msrb.mxu0 %v2356_v51  ;;  %v2373_v23 = vld [vmem:[#allocation4 + $0x5f8] sm:$0xff] }
 0x2fb   :  { %v1890_v38 = vadd.f32 %v1889_v9, %v1800_v17  ;;  %v2117_v17 = vmax.f32 %v2045_v28, 0.0  ;;  %v2322_v9 = vld [vmem:[#allocation4 + $0x460] sm:$0xff]  ;;  %2795 = vmatpush.msrb.mxu3 %v2337_v6  ;;  %v2353_v51 = vld [vmem:[#allocation4 + $0x558] sm:$0xff]  ;;  %2873 = vmatpush.msrb.mxu2 %v2373_v23 }
 0x2fc   :  { %v1717_v32 = vpop.f32.mrf.mxu3  ;;  %v1803_v16 = vpop.f32.mrf.mxu0  ;;  %2753 = vmatpush.msrb.mxu1 %v2322_v9  ;;  %2834 = vmatpush.msrb.mxu0 %v2355_v7  ;;  %v2316_v7 = vld [vmem:[#allocation4 + $0x430] sm:$0xff] }
 0x2fd   :  { %v1963_v31 = vmax.f32 %v4941_v18, %v1890_v38  ;;  %v1718_v1 = vadd.f32 %v1717_v32, %v1628_v22  ;;  %v1631_v30 = vpop.f32.mrf.mxu1  ;;  %v2336_v32 = vld [vmem:[#allocation4 + $0x4d0] sm:$0xff] }
 0x2fe   :  { %2754 = vmatpush.msrb.mxu1 %v2321_v8  ;;  %2796 = vmatpush.msrb.mxu3 %v2336_v32  ;;  %v2371_v8 = vld [vmem:[#allocation4 + $0x5e8] sm:$0xff] }
 0x2ff   :  { %v2043_v39 = vadd.f32 %v5106_v40, %v1963_v31  ;;  %v1968_v13 = vmax.f32 %v5888_v25, %v1718_v1 }
 0x300   :  { %2579 = vmatmul.f32.gmra.mxu2 %v5000_v12  ;;  %2602 = vmatmul.f32.vlgmr.msra.gmra.mxu1 %v5126_v62 }
 0x301   :  { %v2115_v11 = vmax.f32 %v2043_v39, 0.0  ;;  %v2048_v59 = vadd.f32 %v5084_v35, %v1968_v13  ;;  %v2320_v39 = vld [vmem:[#allocation4 + $0x450] sm:$0xff] }
 0x302   :  { %v1892_v18 = vpop.f32.mrf.mxu2  ;;  %2755 = vmatpush.msrb.mxu1 %v2320_v39 }
 0x303   :  { %v5249_v19 = vmax.f32 %v2112_v26, %v2115_v11  ;;  %v2120_v22 = vmax.f32 %v2048_v59, 0.0  ;;  %v1893_v62 = vadd.f32 %v1892_v18, %v1803_v16  ;;  %v2354_v16 = vld [vmem:[#allocation4 + $0x560] sm:$0xff]  ;;  %v2319_v11 = vld [vmem:[#allocation4 + $0x448] sm:$0xff] }
 0x304   :  { %v1720_v55 = vpop.f32.mrf.mxu3  ;;  %v1806_v56 = vpop.f32.mrf.mxu0  ;;  %2835 = vmatpush.msrb.mxu0 %v2354_v16  ;;  %2756 = vmatpush.msrb.mxu1 %v2319_v11  ;;  %v2318_v18 = vld [vmem:[#allocation4 + $0x440] sm:$0xff] }
 0x305   :  { %v5251_v15 = vmax.f32 %v2117_v17, %v2120_v22  ;;  %2538 = vmatmul.f32.gmra.mxu0 %v5249_v19  ;;  %v1634_v60 = vpop.f32.mrf.mxu1  ;;  %v1721_v10 = vadd.f32 %v1720_v55, %v1631_v30  ;;  %v1966_v21 = vmax.f32 %v4954_v44, %v1893_v62  ;;  %v2335_v22 = vld [vmem:[#allocation4 + $0x4c8] sm:$0xff]  ;;  %v2334_v55 = vld [vmem:[#allocation4 + $0x4c0] sm:$0xff]  ;;  %v2352_v62 = vld [vmem:[#allocation4 + $0x550] sm:$0xff] }
 0x306   :  { %2797 = vmatpush.msrb.mxu3 %v2335_v22  ;;  %2836 = vmatpush.msrb.mxu0 %v2353_v51  ;;  %v2314_v11 = vld [vmem:[#allocation4 + $0x420] sm:$0xff]  ;;  %v2367_v51 = vld [vmem:[#allocation4 + $0x5c8] sm:$0xff] }
 0x307   :  { %2500 = vmatmul.f32.gmra.mxu3 %v5251_v15  ;;  %v1971_v31 = vmax.f32 %v5889_v4, %v1721_v10  ;;  %v2046_v44 = vadd.f32 %v5106_v40, %v1966_v21  ;;  %2757 = vmatpush.msrb.mxu1 %v2318_v18  ;;  %v2370_v4 = vld [vmem:[#allocation4 + $0x5e0] sm:$0xff] }
 0x308   :  { %2582 = vmatmul.f32.gmra.mxu2 %v5024_v63  ;;  %2605 = vmatmul.f32.gmra.mxu1 %v5150_v14 }
 0x309   :  { %v2051_v59 = vadd.f32 %v5084_v35, %v1971_v31  ;;  %v2118_v61 = vmax.f32 %v2046_v44, 0.0  ;;  %2798 = vmatpush.msrb.mxu3 %v2334_v55  ;;  %2837 = vmatpush.msrb.mxu0 %v2352_v62  ;;  %v2351_v44 = vld [vmem:[#allocation4 + $0x548] sm:$0xff] }
 0x30a   :  { %v1895_v38 = vpop.f32.mrf.mxu2  ;;  %v5892_v62 = vld [vmem:[#allocation73_spill] sm:$0xff] }
 0x30b   :  { %v1896_v1 = vadd.f32 %v1895_v38, %v1806_v56  ;;  %2838 = vmatpush.msrb.mxu0 %v2351_v44 }
 0x30c   :  { %v1723_v30 = vpop.f32.mrf.mxu3  ;;  %v1809_v28 = vpop.f32.mrf.mxu0 }
 0x30d   :  { %v1969_v25 = vmax.f32 %v4965_v52, %v1896_v1  ;;  %v1724_v13 = vadd.f32 %v1723_v30, %v1634_v60  ;;  %v1637_v26 = vpop.f32.mrf.mxu1  ;;  %v2372_v60 = vld [vmem:[#allocation4 + $0x5f0] sm:$0xff]  ;;  %v2315_v1 = vld [vmem:[#allocation4 + $0x428] sm:$0xff]  ;;  %v2369_v30 = vld [vmem:[#allocation4 + $0x5d8] sm:$0xff] }
 0x30e   :  { %2874 = vmatpush.msrb.mxu2 %v2372_v60  ;;  %v2312_v60 = vld [vmem:[#allocation4 + $0x410] sm:$0xff] }
 0x30f   :  { %v2049_v24 = vadd.f32 %v5106_v40, %v1969_v25  ;;  %v1974_v33 = vmax.f32 %v5890_v3, %v1724_v13  ;;  %2643 = vmatmul.f32.vlgmr.msra.gmra.mxu3 %v5148_v48  ;;  %v2317_v48 = vld [vmem:[#allocation4 + $0x438] sm:$0xff]  ;;  %v2332_v25 = vld [vmem:[#allocation4 + $0x4b0] sm:$0xff] }
 0x310   :  { %2725 = vmatmul.f32.vlgmr.msra.gmra.mxu2 %v5150_v14  ;;  %2608 = vmatmul.f32.gmra.mxu1 %v5173_v43  ;;  %v2123_v14 = vmax.f32 %v2051_v59, 0.0  ;;  %v5891_v59 = vld [vmem:[#allocation70_spill] sm:$0xff] }
 0x311   :  { %v2121_v52 = vmax.f32 %v2049_v24, 0.0  ;;  %v2054_v17 = vadd.f32 %v5084_v35, %v1974_v33  ;;  %2758 = vmatpush.msrb.mxu1 %v2317_v48  ;;  %2875 = vmatpush.msrb.mxu2 %v2371_v8  ;;  %v2368_v33 = vld [vmem:[#allocation4 + $0x5d0] sm:$0xff]  ;;  %v2330_v8 = vld [vmem:[#allocation4 + $0x4a0] sm:$0xff] }
 0x312   :  { %v1898_v56 = vpop.f32.mrf.mxu2 }
 0x313   :  { %v5268_v10 = vmax.f32 %v2118_v61, %v2121_v52  ;;  %v2126_v9 = vmax.f32 %v2054_v17, 0.0  ;;  %v1899_v38 = vadd.f32 %v1898_v56, %v1809_v28  ;;  %2759 = vmatpush.msrb.mxu1 %v2316_v7  ;;  %v2333_v28 = vld [vmem:[#allocation4 + $0x4b8] sm:$0xff]  ;;  %2876 = vmatpush.msrb.mxu2 %v2370_v4 }
 0x314   :  { %v1726_v21 = vpop.f32.mrf.mxu3  ;;  %v1812_v6 = vpop.f32.mrf.mxu0  ;;  %2799 = vmatpush.msrb.mxu3 %v2333_v28  ;;  %v2349_v7 = vld [vmem:[#allocation4 + $0x538] sm:$0xff] }
 0x315   :  { %2541 = vmatmul.f32.gmra.mxu0 %v5268_v10  ;;  %v5271_v32 = vmax.f32 %v2123_v14, %v2126_v9  ;;  %v1640_v16 = vpop.f32.mrf.mxu1  ;;  %v1727_v31 = vadd.f32 %v1726_v21, %v1637_v26  ;;  %v1972_v39 = vmax.f32 %v4978_v54, %v1899_v38  ;;  %v2350_v26 = vld [vmem:[#allocation4 + $0x540] sm:$0xff]  ;;  %2760 = vmatpush.msrb.mxu1 %v2315_v1  ;;  %v2313_v54 = vld [vmem:[#allocation4 + $0x418] sm:$0xff]  ;;  %v2348_v1 = vld [vmem:[#allocation4 + $0x530] sm:$0xff] }
 0x316   :  { %2877 = vmatpush.msrb.mxu2 %v2369_v30  ;;  %2800 = vmatpush.msrb.mxu3 %v2332_v25  ;;  %v2366_v14 = vld [vmem:[#allocation4 + $0x5c0] sm:$0xff] }
 0x317   :  { %2646 = vmatmul.f32.gmra.mxu3 %v5171_v36  ;;  %v1977_v24 = vmax.f32 %v5891_v59, %v1727_v31  ;;  %2839 = vmatpush.msrb.mxu0 %v2350_v26  ;;  %v2052_v61 = vadd.f32 %v5106_v40, %v1972_v39  ;;  %v2310_v31 = vld [vmem:[#allocation4 + $0x400] sm:$0xff] }
 0x318   :  { %2728 = vmatmul.f32.gmra.mxu2 %v5173_v43  ;;  %2611 = vmatmul.f32.gmra.mxu1 %v5194_v0 }
 0x319   :  { %2761 = vmatpush.msrb.mxu1 %v2314_v11  ;;  %2878 = vmatpush.msrb.mxu2 %v2368_v33  ;;  %v2057_v55 = vadd.f32 %v5084_v35, %v1977_v24  ;;  %v2124_v9 = vmax.f32 %v2052_v61, 0.0  ;;  %v5893_v33 = vld [vmem:[#allocation76_spill] sm:$0xff]  ;;  %v2328_v61 = vld [vmem:[#allocation4 + $0x490] sm:$0xff] }
 0x31a   :  { %v1901_v13 = vpop.f32.mrf.mxu2  ;;  %2840 = vmatpush.msrb.mxu0 %v2349_v7  ;;  %v5894_v7 = vld [vmem:[#allocation79_spill] sm:$0xff] }
 0x31b   :  { %v1902_v3 = vadd.f32 %v1901_v13, %v1812_v6  ;;  %2762 = vmatpush.msrb.mxu1 %v2313_v54  ;;  %2879 = vmatpush.msrb.mxu2 %v2367_v51  ;;  %v2331_v6 = vld [vmem:[#allocation4 + $0x4a8] sm:$0xff]  ;;  %v2129_v39 = vmax.f32 %v2057_v55, 0.0  ;;  %v2364_v13 = vld [vmem:[#allocation4 + $0x5b0] sm:$0xff] }
 0x31c   :  { %v1729_v18 = vpop.f32.mrf.mxu3  ;;  %v1815_v23 = vpop.f32.mrf.mxu0  ;;  %2801 = vmatpush.msrb.mxu3 %v2331_v6  ;;  %2841 = vmatpush.msrb.mxu0 %v2348_v1  ;;  %v2347_v54 = vld [vmem:[#allocation4 + $0x528] sm:$0xff] }
 0x31d   :  { %v1975_v52 = vmax.f32 %v4989_v2, %v1902_v3  ;;  %v1730_v17 = vadd.f32 %v1729_v18, %v1640_v16  ;;  %2684 = vmatmul.f32.vlgmr.msra.gmra.mxu0 %v4880_v37  ;;  %v1643_v22 = vpop.f32.mrf.mxu1  ;;  %v2311_v2 = vld [vmem:[#allocation4 + $0x408] sm:$0xff]  ;;  %2763 = vmatpush.msrb.mxu1 %v2312_v60  ;;  %v2365_v16 = vld [vmem:[#allocation4 + $0x5b8] sm:$0xff] }
 0x31e   :  { %2880 = vmatpush.msrb.mxu2 %v2366_v14  ;;  %2802 = vmatpush.msrb.mxu3 %v2330_v8  ;;  %v2363_v3 = vld [vmem:[#allocation4 + $0x5a8] sm:$0xff] }
 0x31f   :  { %v2055_v56 = vadd.f32 %v5106_v40, %v1975_v52  ;;  %v1980_v48 = vmax.f32 %v5892_v62, %v1730_v17  ;;  %2649 = vmatmul.f32.gmra.mxu3 %v5192_v34  ;;  %2764 = vmatpush.msrb.mxu1 %v2311_v2  ;;  %v2346_v52 = vld [vmem:[#allocation4 + $0x520] sm:$0xff]  ;;  %v2360_v62 = vld [vmem:[#allocation4 + $0x590] sm:$0xff] }
 0x320   :  { %2731 = vmatmul.f32.gmra.mxu2 %v5194_v0  ;;  %2614 = vmatmul.f32.gmra.mxu1 %v5214_v5 }
 0x321   :  { %v2127_v37 = vmax.f32 %v2055_v56, 0.0  ;;  %v2060_v21 = vadd.f32 %v5084_v35, %v1980_v48  ;;  %2881 = vmatpush.msrb.mxu2 %v2365_v16  ;;  %2765 = vmatpush.msrb.mxu1 %v2310_v31  ;;  %v2327_v48 = vld [vmem:[#allocation4 + $0x488] sm:$0xff]  ;;  %v2326_v16 = vld [vmem:[#allocation4 + $0x480] sm:$0xff]  ;;  %v2344_v31 = vld [vmem:[#allocation4 + $0x510] sm:$0xff] }
 0x322   :  { %v1904_v38 = vpop.f32.mrf.mxu2  ;;  %2842 = vmatpush.msrb.mxu0 %v2347_v54 }
 0x323   :  { %v1905_v4 = vadd.f32 %v1904_v38, %v1815_v23  ;;  %v5288_v30 = vmax.f32 %v2124_v9, %v2127_v37  ;;  %v2132_v28 = vmax.f32 %v2060_v21, 0.0  ;;  %2882 = vmatpush.msrb.mxu2 %v2364_v13  ;;  %v2329_v23 = vld [vmem:[#allocation4 + $0x498] sm:$0xff]  ;;  %v2359_v37 = vld [vmem:[#allocation4 + $0x588] sm:$0xff] }
 0x324   :  { %v1732_v44 = vpop.f32.mrf.mxu3  ;;  %v1818_v25 = vpop.f32.mrf.mxu0  ;;  %2803 = vmatpush.msrb.mxu3 %v2329_v23  ;;  %2843 = vmatpush.msrb.mxu0 %v2346_v52  ;;  %v2345_v38 = vld [vmem:[#allocation4 + $0x518] sm:$0xff] }
 0x325   :  { %v1978_v11 = vmax.f32 %v5002_v29, %v1905_v4  ;;  %v1733_v26 = vadd.f32 %v1732_v44, %v1643_v22  ;;  %2687 = vmatmul.f32.gmra.mxu0 %v4904_v42  ;;  %v5292_v59 = vmax.f32 %v2129_v39, %v2132_v28  ;;  %v1646_v24 = vpop.f32.mrf.mxu1  ;;  %v2362_v29 = vld [vmem:[#allocation4 + $0x5a0] sm:$0xff]  ;;  %2883 = vmatpush.msrb.mxu2 %v2363_v3  ;;  %v2361_v22 = vld [vmem:[#allocation4 + $0x598] sm:$0xff] }
 0x326   :  { %2804 = vmatpush.msrb.mxu3 %v2328_v61  ;;  %2844 = vmatpush.msrb.mxu0 %v2345_v38  ;;  %v2405_v23 = vld [vmem:[#allocation4 + $0x6f8] sm:$0xff]  ;;  %v5895_v61 = vld [vmem:[#allocation81_spill] sm:$0xff] }
 0x327   :  { %v1983_v18 = vmax.f32 %v5893_v33, %v1733_v26  ;;  %2652 = vmatmul.f32.gmra.mxu3 %v5212_v47  ;;  %2884 = vmatpush.msrb.mxu2 %v2362_v29  ;;  %v2058_v60 = vadd.f32 %v5106_v40, %v1978_v11 }
 0x328   :  { %2734 = vmatmul.f32.gmra.mxu2 %v5214_v5  ;;  %2617 = vmatmul.f32.gmra.mxu1 %v5233_v58 }
 0x329   :  { %2885 = vmatpush.msrb.mxu2 %v2361_v22  ;;  %2805 = vmatpush.msrb.mxu3 %v2327_v48  ;;  %v2063_v21 = vadd.f32 %v5084_v35, %v1983_v18  ;;  %v2130_v1 = vmax.f32 %v2058_v60, 0.0  ;;  %v2343_v18 = vld [vmem:[#allocation4 + $0x508] sm:$0xff]  ;;  %v2404_v22 = vld [vmem:[#allocation4 + $0x6f0] sm:$0xff] }
 0x32a   :  { %v1907_v17 = vpop.f32.mrf.mxu2  ;;  %2845 = vmatpush.msrb.mxu0 %v2344_v31 }
 0x32b   :  { %v1908_v51 = vadd.f32 %v1907_v17, %v1818_v25  ;;  %2886 = vmatpush.msrb.mxu2 %v2360_v62  ;;  %2806 = vmatpush.msrb.mxu3 %v2326_v16  ;;  %v2135_v13 = vmax.f32 %v2063_v21, 0.0  ;;  %v2342_v17 = vld [vmem:[#allocation4 + $0x500] sm:$0xff]  ;;  %v2387_v16 = vld [vmem:[#allocation4 + $0x668] sm:$0xff] }
 0x32c   :  { %v1735_v55 = vpop.f32.mrf.mxu3  ;;  %v1821_v56 = vpop.f32.mrf.mxu0  ;;  %2846 = vmatpush.msrb.mxu0 %v2343_v18 }
 0x32d   :  { %v1981_v2 = vmax.f32 %v5013_v57, %v1908_v51  ;;  %v1736_v14 = vadd.f32 %v1735_v55, %v1646_v24  ;;  %2690 = vmatmul.f32.gmra.mxu0 %v4928_v53  ;;  %v1649_v9 = vpop.f32.mrf.mxu1  ;;  %v2358_v57 = vld [vmem:[#allocation4 + $0x580] sm:$0xff]  ;;  %2887 = vmatpush.msrb.mxu2 %v2359_v37  ;;  %v2421_v37 = vld [vmem:[#allocation4 + $0x778] sm:$0xff] }
 0x32e   :  { %2955 = vmatpush.msra.mxu3 %v2405_v23  ;;  %2847 = vmatpush.msrb.mxu0 %v2342_v17 }
 0x32f   :  { %v2061_v6 = vadd.f32 %v5106_v40, %v1981_v2  ;;  %v1986_v8 = vmax.f32 %v5894_v7, %v1736_v14  ;;  %2655 = vmatmul.f32.gmra.mxu3 %v5231_v50  ;;  %2888 = vmatpush.msrb.mxu2 %v2358_v57  ;;  %v2388_v14 = vld [vmem:[#allocation4 + $0x670] sm:$0xff]  ;;  %v2402_v57 = vld [vmem:[#allocation4 + $0x6e0] sm:$0xff] }
 0x330   :  { %2737 = vmatmul.f32.gmra.mxu2 %v5233_v58  ;;  %2620 = vmatmul.f32.gmra.mxu1 %v5251_v15 }
 0x331   :  { %v2066_v4 = vadd.f32 %v5084_v35, %v1986_v8  ;;  %v2133_v39 = vmax.f32 %v2061_v6, 0.0  ;;  %2956 = vmatpush.msra.mxu3 %v2404_v22  ;;  %v5896_v8 = vld [vmem:[#allocation84_spill] sm:$0xff]  ;;  %2996 = vmatpush.msra.mxu0 %v2421_v37  ;;  %v2384_v22 = vld [vmem:[#allocation4 + $0x650] sm:$0xff] }
 0x332   :  { %v1910_v28 = vpop.f32.mrf.mxu2  ;;  %v2382_v37 = vld [vmem:[#allocation4 + $0x640] sm:$0xff] }
 0x333   :  { %v1911_v44 = vadd.f32 %v1910_v28, %v1821_v56  ;;  %v5308_v25 = vmax.f32 %v2130_v1, %v2133_v39  ;;  %v2138_v11 = vmax.f32 %v2066_v4, 0.0  ;;  %v2420_v4 = vld [vmem:[#allocation4 + $0x770] sm:$0xff] }
 0x334   :  { %v1738_v26 = vpop.f32.mrf.mxu3  ;;  %v1824_v24 = vpop.f32.mrf.mxu0  ;;  %2997 = vmatpush.msra.mxu0 %v2420_v4  ;;  %v2397_v4 = vld [vmem:[#allocation4 + $0x6b8] sm:$0xff] }
 0x335   :  { %v1984_v3 = vmax.f32 %v5026_v49, %v1911_v44  ;;  %v1739_v33 = vadd.f32 %v1738_v26, %v1649_v9  ;;  %2693 = vmatmul.f32.gmra.mxu0 %v4952_v41  ;;  %v5312_v54 = vmax.f32 %v2135_v13, %v2138_v11  ;;  %v1652_v29 = vpop.f32.mrf.mxu1  ;;  %v2389_v49 = vld [vmem:[#allocation4 + $0x678] sm:$0xff]  ;;  %v2403_v9 = vld [vmem:[#allocation4 + $0x6e8] sm:$0xff] }
 0x336   :  { %2914 = vmatpush.msra.mxu1 %v2389_v49  ;;  %2957 = vmatpush.msra.mxu3 %v2403_v9 }
 0x337   :  { %v1989_v52 = vmax.f32 %v5895_v61, %v1739_v33  ;;  %2658 = vmatmul.f32.gmra.mxu3 %v5249_v19  ;;  %v2064_v48 = vadd.f32 %v5106_v40, %v1984_v3  ;;  %v2401_v3 = vld [vmem:[#allocation4 + $0x6d8] sm:$0xff]  ;;  %v2419_v33 = vld [vmem:[#allocation4 + $0x768] sm:$0xff]  ;;  %v2418_v61 = vld [vmem:[#allocation4 + $0x760] sm:$0xff] }
 0x338   :  { %2740 = vmatmul.f32.gmra.mxu2 %v5251_v15  ;;  %2623 = vmatmul.f32.gmra.mxu1 %v5271_v32 }
 0x339   :  { %2915 = vmatpush.msra.mxu1 %v2388_v14  ;;  %v2069_v6 = vadd.f32 %v5084_v35, %v1989_v52  ;;  %v2136_v31 = vmax.f32 %v2064_v48, 0.0  ;;  %2958 = vmatpush.msra.mxu3 %v2402_v57  ;;  %v2399_v48 = vld [vmem:[#allocation4 + $0x6c8] sm:$0xff] }
 0x33a   :  { %v1913_v51 = vpop.f32.mrf.mxu2  ;;  %2998 = vmatpush.msra.mxu0 %v2419_v33  ;;  %v2383_v14 = vld [vmem:[#allocation4 + $0x648] sm:$0xff]  ;;  %v2376_v33 = vld [vmem:[#allocation4 + $0x610] sm:$0xff] }
 0x33b   :  { %v1914_v55 = vadd.f32 %v1913_v51, %v1824_v24  ;;  %2916 = vmatpush.msra.mxu1 %v2387_v16  ;;  %v2141_v13 = vmax.f32 %v2069_v6, 0.0  ;;  %2959 = vmatpush.msra.mxu3 %v2401_v3  ;;  %v2398_v6 = vld [vmem:[#allocation4 + $0x6c0] sm:$0xff]  ;;  %v2381_v16 = vld [vmem:[#allocation4 + $0x638] sm:$0xff] }
 0x33c   :  { %v1741_v56 = vpop.f32.mrf.mxu3  ;;  %v1827_v62 = vpop.f32.mrf.mxu0  ;;  %2999 = vmatpush.msra.mxu0 %v2418_v61 }
 0x33d   :  { %v1987_v60 = vmax.f32 %v5037_v45, %v1914_v55  ;;  %v1742_v2 = vadd.f32 %v1741_v56, %v1652_v29  ;;  %2696 = vmatmul.f32.gmra.mxu0 %v4976_v46  ;;  %v5321_v21 = vpop.f32.mrf.mxu1  ;;  %v2385_v29 = vld [vmem:[#allocation4 + $0x658] sm:$0xff]  ;;  %v5897_v55 = vld [vmem:[#allocation18_spill] sm:$0xff] }
 0x33f   :  { %v2067_v7 = vadd.f32 %v5106_v40, %v1987_v60  ;;  %v1992_v38 = vmax.f32 %v5896_v8, %v1742_v2  ;;  %2661 = vmatmul.f32.gmra.mxu3 %v5268_v10  ;;  %v2417_v60 = vld [vmem:[#allocation4 + $0x758] sm:$0xff] }
 0x340   :  { %2743 = vmatmul.f32.gmra.mxu2 %v5271_v32  ;;  %2766 = vmatmul.f32.vlgmr.msrb.gmra.mxu1 %v5171_v36  ;;  %v2386_v36 = vld [vmem:[#allocation4 + $0x660] sm:$0xff] }
 0x341   :  { %v2072_v45 = vadd.f32 %v5084_v35, %v1992_v38  ;;  %v2139_v1 = vmax.f32 %v2067_v7, 0.0  ;;  %2917 = vmatpush.msra.mxu1 %v2386_v36  ;;  %3000 = vmatpush.msra.mxu0 %v2417_v60  ;;  %v2416_v7 = vld [vmem:[#allocation4 + $0x750] sm:$0xff]  ;;  %v2377_v36 = vld [vmem:[#allocation4 + $0x618] sm:$0xff]  ;;  %v2411_v60 = vld [vmem:[#allocation4 + $0x728] sm:$0xff] }
 0x342   :  { %v1916_v39 = vpop.f32.mrf.mxu2 }
 0x343   :  { %v1917_v28 = vadd.f32 %v1916_v39, %v1827_v62  ;;  %v5330_v44 = vmax.f32 %v2136_v31, %v2139_v1  ;;  %v2144_v11 = vmax.f32 %v2072_v45, 0.0  ;;  %2918 = vmatpush.msra.mxu1 %v2385_v29  ;;  %3001 = vmatpush.msra.mxu0 %v2416_v7  ;;  %v2415_v31 = vld [vmem:[#allocation4 + $0x748] sm:$0xff] }
 0x344   :  { %v1830_v26 = vpop.f32.mrf.mxu0  ;;  %v5332_v24 = vpop.f32.mrf.mxu3  ;;  %v2379_v39 = vld [vmem:[#allocation4 + $0x628] sm:$0xff] }
 0x345   :  { %v1990_v35 = vmax.f32 %v5050_v27, %v1917_v28  ;;  %2699 = vmatmul.f32.gmra.mxu0 %v5000_v12  ;;  %v5336_v18 = vmax.f32 %v2141_v13, %v2144_v11  ;;  %v5338_v23 = vpop.f32.mrf.mxu1  ;;  %v2400_v27 = vld [vmem:[#allocation4 + $0x6d0] sm:$0xff]  ;;  %2919 = vmatpush.msra.mxu1 %v2384_v22  ;;  %v2378_v13 = vld [vmem:[#allocation4 + $0x620] sm:$0xff]  ;;  %v2395_v29 = vld [vmem:[#allocation4 + $0x6a8] sm:$0xff] }
 0x346   :  { %2960 = vmatpush.msra.mxu3 %v2400_v27  ;;  %3002 = vmatpush.msra.mxu0 %v2415_v31  ;;  %v2396_v11 = vld [vmem:[#allocation4 + $0x6b0] sm:$0xff]  ;;  %v2413_v27 = vld [vmem:[#allocation4 + $0x738] sm:$0xff] }
 0x347   :  { %2664 = vmatmul.f32.gmra.mxu3 %v5288_v30  ;;  %v2070_v51 = vadd.f32 %v5106_v40, %v1990_v35  ;;  %2920 = vmatpush.msra.mxu1 %v2383_v14 }
 0x348   :  { %2746 = vmatmul.f32.gmra.mxu2 %v5292_v59  ;;  %2769 = vmatmul.f32.gmra.mxu1 %v5192_v34 }
 0x349   :  { %2961 = vmatpush.msra.mxu3 %v2399_v48  ;;  %v2142_v8 = vmax.f32 %v2070_v51, 0.0  ;;  %2921 = vmatpush.msra.mxu1 %v2382_v37  ;;  %v2394_v51 = vld [vmem:[#allocation4 + $0x6a0] sm:$0xff]  ;;  %v2393_v48 = vld [vmem:[#allocation4 + $0x698] sm:$0xff] }
 0x34a   :  { %v1919_v52 = vpop.f32.mrf.mxu2  ;;  %v2410_v37 = vld [vmem:[#allocation4 + $0x720] sm:$0xff] }
 0x34b   :  { %v1920_v17 = vadd.f32 %v1919_v52, %v1830_v26  ;;  %2962 = vmatpush.msra.mxu3 %v2398_v6  ;;  %2922 = vmatpush.msra.mxu1 %v2381_v16  ;;  %v2414_v26 = vld [vmem:[#allocation4 + $0x740] sm:$0xff]  ;;  %v2375_v52 = vld [vmem:[#allocation4 + $0x608] sm:$0xff]  ;;  %v2409_v16 = vld [vmem:[#allocation4 + $0x718] sm:$0xff] }
 0x34c   :  { %v5343_v49 = vpop.f32.mrf.mxu0  ;;  %v5347_v62 = vpop.f32.mrf.mxu3  ;;  %3003 = vmatpush.msra.mxu0 %v2414_v26 }
 0x34d   :  { %v1993_v56 = vmax.f32 %v5897_v55, %v1920_v17  ;;  %2702 = vmatmul.f32.gmra.mxu0 %v5024_v63  ;;  %v5350_v2 = vpop.f32.mrf.mxu1  ;;  %2963 = vmatpush.msra.mxu3 %v2397_v4  ;;  %v2374_v17 = vld [vmem:[#allocation4 + $0x600] sm:$0xff]  ;;  %v2412_v55 = vld [vmem:[#allocation4 + $0x730] sm:$0xff] }
 0x34e   :  { %3004 = vmatpush.msra.mxu0 %v2413_v27  ;;  %v2390_v4 = vld [vmem:[#allocation4 + $0x680] sm:$0xff] }
 0x34f   :  { %v2073_v9 = vadd.f32 %v5106_v40, %v1993_v56  ;;  %2807 = vmatmul.f32.vlgmr.msrb.gmra.mxu3 %v4904_v42  ;;  %v2380_v42 = vld [vmem:[#allocation4 + $0x630] sm:$0xff] }
 0x350   :  { %2889 = vmatmul.f32.vlgmr.msrb.gmra.mxu2 %v5192_v34  ;;  %2772 = vmatmul.f32.gmra.mxu1 %v5212_v47  ;;  %v5898_v34 = vld [vmem:[#allocation26_spill] sm:$0xff] }
 0x351   :  { %v2145_v38 = vmax.f32 %v2073_v9, 0.0  ;;  %2923 = vmatpush.msra.mxu1 %v2380_v42  ;;  %2964 = vmatpush.msra.mxu3 %v2396_v11  ;;  %v2392_v9 = vld [vmem:[#allocation4 + $0x690] sm:$0xff] }
 0x352   :  { %v5356_v45 = vpop.f32.mrf.mxu2  ;;  %3005 = vmatpush.msra.mxu0 %v2412_v55 }
 0x353   :  { %v5358_v57 = vmax.f32 %v2142_v8, %v2145_v38  ;;  %2924 = vmatpush.msra.mxu1 %v2379_v39  ;;  %2965 = vmatpush.msra.mxu3 %v2395_v29  ;;  %v2391_v8 = vld [vmem:[#allocation4 + $0x688] sm:$0xff] }
 0x354   :  { %v5360_v40 = vpop.f32.mrf.mxu0  ;;  %v5365_v28 = vpop.f32.mrf.mxu3  ;;  %3006 = vmatpush.msra.mxu0 %v2411_v60 }
 0x355   :  { %2705 = vmatmul.f32.gmra.mxu0 %v5898_v34  ;;  %v5363_v1 = vpop.f32.mrf.mxu1  ;;  %2925 = vmatpush.msra.mxu1 %v2378_v13  ;;  %v2408_v13 = vld [vmem:[#allocation4 + $0x710] sm:$0xff] }
 0x356   :  { %2966 = vmatpush.msra.mxu3 %v2394_v51  ;;  %3007 = vmatpush.msra.mxu0 %v2410_v37 }
 0x357   :  { %2810 = vmatmul.f32.gmra.mxu3 %v4928_v53  ;;  %2926 = vmatpush.msra.mxu1 %v2377_v36 }
 0x358   :  { %2892 = vmatmul.f32.gmra.mxu2 %v5212_v47  ;;  %2775 = vmatmul.f32.gmra.mxu1 %v5231_v50 }
 0x359   :  { %2927 = vmatpush.msra.mxu1 %v2376_v33  ;;  %2967 = vmatpush.msra.mxu3 %v2393_v48  ;;  %v2407_v33 = vld [vmem:[#allocation4 + $0x708] sm:$0xff] }
 0x35a   :  { %v5370_v35 = vpop.f32.mrf.mxu2  ;;  %3008 = vmatpush.msra.mxu0 %v2409_v16 }
 0x35b   :  { %2928 = vmatpush.msra.mxu1 %v2375_v52  ;;  %2968 = vmatpush.msra.mxu3 %v2392_v9  ;;  %v2406_v52 = vld [vmem:[#allocation4 + $0x700] sm:$0xff] }
 0x35c   :  { %v5372_v3 = vpop.f32.mrf.mxu0  ;;  %v5377_v22 = vpop.f32.mrf.mxu3  ;;  %3009 = vmatpush.msra.mxu0 %v2408_v13  ;;  %v5899_v13 = vld [vmem:[#allocation29_spill] sm:$0xff] }
 0x35d   :  { %2848 = vmatmul.f32.vlgmr.msrb.gmra.mxu0 %v5173_v43  ;;  %v2451_v61 = vpop.f32.mrf.mxu1  ;;  %2929 = vmatpush.msra.mxu1 %v2374_v17 }
 0x35e   :  { %2969 = vmatpush.msra.mxu3 %v2391_v8  ;;  %3010 = vmatpush.msra.mxu0 %v2407_v33  ;;  %v2481_v33 = vadd.f32 %v5332_v24, %v5321_v21 }
 0x35f   :  { %2813 = vmatmul.f32.gmra.mxu3 %v4952_v41 }
 0x360   :  { %2895 = vmatmul.f32.gmra.mxu2 %v5231_v50  ;;  %2778 = vmatmul.f32.gmra.mxu1 %v5249_v19 }
 0x361   :  { %2970 = vmatpush.msra.mxu3 %v2390_v4  ;;  %3011 = vmatpush.msra.mxu0 %v2406_v52 }
 0x362   :  { %v5380_v43 = vpop.f32.mrf.mxu2 }
 0x364   :  { %v5382_v56 = vpop.f32.mrf.mxu0  ;;  %v2492_v7 = vpop.f32.mrf.mxu3 }
 0x365   :  { %2851 = vmatmul.f32.gmra.mxu0 %v5194_v0  ;;  %v2454_v14 = vpop.f32.mrf.mxu1  ;;  %v2493_v31 = vadd.f32 %v2492_v7, %v2451_v61 }
 0x367   :  { %2816 = vmatmul.f32.gmra.mxu3 %v4976_v46 }
 0x368   :  { %2898 = vmatmul.f32.gmra.mxu2 %v5249_v19  ;;  %2781 = vmatmul.f32.gmra.mxu1 %v5268_v10 }
 0x36a   :  { %v5388_v6 = vpop.f32.mrf.mxu2 }
 0x36c   :  { %v2533_v38 = vpop.f32.mrf.mxu0  ;;  %v2495_v36 = vpop.f32.mrf.mxu3 }
 0x36d   :  { %2854 = vmatmul.f32.gmra.mxu0 %v5214_v5  ;;  %v2457_v42 = vpop.f32.mrf.mxu1  ;;  %v2534_v39 = vadd.f32 %v2533_v38, %v2493_v31  ;;  %v2496_v61 = vadd.f32 %v2495_v36, %v2454_v14  ;;  %v2484_v14 = vadd.f32 %v5347_v62, %v5338_v23  ;;  %v2487_v23 = vadd.f32 %v5365_v28, %v5350_v2 }
 0x36e   :  { %v2490_v2 = vadd.f32 %v5377_v22, %v5363_v1 }
 0x36f   :  { %2819 = vmatmul.f32.gmra.mxu3 %v5000_v12  ;;  %v2525_v7 = vadd.f32 %v5360_v40, %v2484_v14  ;;  %v2528_v62 = vadd.f32 %v5372_v3, %v2487_v23  ;;  %v2522_v3 = vadd.f32 %v5343_v49, %v2481_v33 }
 0x370   :  { %2901 = vmatmul.f32.gmra.mxu2 %v5268_v10  ;;  %2784 = vmatmul.f32.gmra.mxu1 %v5288_v30 }
 0x371   :  { %v2566_v16 = vadd.f32 %v5370_v35, %v2525_v7  ;;  %v2569_v35 = vadd.f32 %v5380_v43, %v2528_v62  ;;  %v2531_v43 = vadd.f32 %v5382_v56, %v2490_v2 }
 0x372   :  { %v2574_v11 = vpop.f32.mrf.mxu2 }
 0x373   :  { %v5394_v26 = vadd.f32 %v2574_v11, %v2534_v39 }
 0x374   :  { %v2536_v27 = vpop.f32.mrf.mxu0 }
 0x375   :  { %2857 = vmatmul.f32.gmra.mxu0 %v5233_v58  ;;  %v2460_v29 = vpop.f32.mrf.mxu1  ;;  %v2537_v17 = vadd.f32 %v2536_v27, %v2496_v61  ;;  %v2563_v27 = vadd.f32 %v5356_v45, %v2522_v3  ;;  %v2572_v61 = vadd.f32 %v5388_v6, %v2531_v43 }
 0x377   :  { %2822 = vmatmul.f32.gmra.mxu3 %v5024_v63 }
 0x378   :  { %2904 = vmatmul.f32.gmra.mxu2 %v5288_v30  ;;  %2787 = vmatmul.f32.gmra.mxu1 %v5308_v25 }
 0x37a   :  { %v2498_v48 = vpop.f32.mrf.mxu3 }
 0x37b   :  { %v2577_v51 = vpop.f32.mrf.mxu2  ;;  %v2499_v9 = vadd.f32 %v2498_v48, %v2457_v42 }
 0x37c   :  { %v5400_v55 = vadd.f32 %v2577_v51, %v2537_v17 }
 0x37d   :  { %2860 = vmatmul.f32.gmra.mxu0 %v5251_v15  ;;  %v2603_v60 = vpop.f32.mrf.mxu1 }
 0x37e   :  { %v2604_v24 = vadd.f32 %v2603_v60, %v2563_v27 }
 0x37f   :  { %2825 = vmatmul.f32.gmra.mxu3 %v5898_v34 }
 0x380   :  { %2907 = vmatmul.f32.gmra.mxu2 %v5308_v25  ;;  %2930 = vmatmul.f32.vlgmr.msra.gmra.mxu1 %v4928_v53 }
 0x382   :  { %v2539_v37 = vpop.f32.mrf.mxu0 }
 0x383   :  { %v2540_v8 = vadd.f32 %v2539_v37, %v2499_v9  ;;  %v2580_v38 = vpop.f32.mrf.mxu2 }
 0x385   :  { %v2581_v4 = vadd.f32 %v2580_v38, %v2540_v8  ;;  %2863 = vmatmul.f32.gmra.mxu0 %v5271_v32  ;;  %v2606_v31 = vpop.f32.mrf.mxu1 }
 0x386   :  { %v2607_v39 = vadd.f32 %v2606_v31, %v2566_v16 }
 0x387   :  { %2828 = vmatmul.f32.gmra.mxu3 %v5899_v13 }
 0x388   :  { %2910 = vmatmul.f32.gmra.mxu2 %v5330_v44  ;;  %2933 = vmatmul.f32.gmra.mxu1 %v4952_v41 }
 0x38a   :  { %v2501_v53 = vpop.f32.mrf.mxu3 }
 0x38b   :  { %v2502_v40 = vadd.f32 %v2501_v53, %v2460_v29  ;;  %v2583_v11 = vpop.f32.mrf.mxu2 }
 0x38d   :  { %2866 = vmatmul.f32.gmra.mxu0 %v5292_v59  ;;  %v2609_v42 = vpop.f32.mrf.mxu1 }
 0x38e   :  { %v2610_v36 = vadd.f32 %v2609_v42, %v2569_v35 }
 0x38f   :  { %2971 = vmatmul.f32.vlgmr.msra.gmra.mxu3 %v5194_v0 }
 0x390   :  { %2936 = vmatmul.f32.gmra.mxu1 %v4976_v46 }
 0x392   :  { %v2542_v41 = vpop.f32.mrf.mxu0  ;;  %v2644_v28 = vpop.f32.mrf.mxu3 }
 0x393   :  { %v2543_v29 = vadd.f32 %v2542_v41, %v2502_v40  ;;  %v2645_v46 = vadd.f32 %v2644_v28, %v2604_v24  ;;  %v5431_v1 = vpop.f32.mrf.mxu2 }
 0x395   :  { %2869 = vmatmul.f32.gmra.mxu0 %v5312_v54  ;;  %v2584_v0 = vadd.f32 %v2583_v11, %v2543_v29  ;;  %v2612_v21 = vpop.f32.mrf.mxu1 }
 0x396   :  { %v2613_v52 = vadd.f32 %v2612_v21, %v2572_v61 }
 0x397   :  { %2974 = vmatmul.f32.gmra.mxu3 %v5214_v5 }
 0x398   :  { %2939 = vmatmul.f32.gmra.mxu1 %v5000_v12 }
 0x39a   :  { %v2647_v49 = vpop.f32.mrf.mxu3  ;;  %v2685_v22 = vpop.f32.mrf.mxu0 }
 0x39b   :  { %v2648_v56 = vadd.f32 %v2647_v49, %v2607_v39  ;;  %v5434_v17 = vadd.f32 %v2685_v22, %v2645_v46  ;;  %v2729_v14 = vpop.f32.mrf.mxu2 }
 0x39d   :  { %3012 = vmatmul.f32.vlgmr.msra.gmra.mxu0 %v5212_v47  ;;  %v2615_v45 = vpop.f32.mrf.mxu1 }
 0x39e   :  { %v2616_v6 = vadd.f32 %v2615_v45, %v5394_v26 }
 0x39f   :  { %2977 = vmatmul.f32.gmra.mxu3 %v5233_v58 }
 0x3a0   :  { %2942 = vmatmul.f32.gmra.mxu1 %v5024_v63 }
 0x3a2   :  { %v2650_v5 = vpop.f32.mrf.mxu3  ;;  %v2688_v51 = vpop.f32.mrf.mxu0 }
 0x3a3   :  { %v2651_v48 = vadd.f32 %v2650_v5, %v2610_v36  ;;  %v2689_v60 = vadd.f32 %v2688_v51, %v2648_v56 }
 0x3a5   :  { %3015 = vmatmul.f32.gmra.mxu0 %v5231_v50  ;;  %v2730_v12 = vadd.f32 %v2729_v14, %v2689_v60  ;;  %v2618_v9 = vpop.f32.mrf.mxu1 }
 0x3a6   :  { %v2619_v37 = vadd.f32 %v2618_v9, %v5400_v55  ;;  %v2727_v9 = vadd.f32 %v5431_v1, %v5434_v17 }
 0x3a7   :  { %2980 = vmatmul.f32.gmra.mxu3 %v5251_v15 }
 0x3a8   :  { %2945 = vmatmul.f32.gmra.mxu1 %v5898_v34 }
 0x3aa   :  { %v2653_v47 = vpop.f32.mrf.mxu3  ;;  %v2691_v26 = vpop.f32.mrf.mxu0 }
 0x3ab   :  { %v2654_v58 = vadd.f32 %v2653_v47, %v2613_v52  ;;  %v5444_v7 = vadd.f32 %v2691_v26, %v2651_v48 }
 0x3ad   :  { %3018 = vmatmul.f32.gmra.mxu0 %v5249_v19  ;;  %v2621_v63 = vpop.f32.mrf.mxu1 }
 0x3ae   :  { %v2622_v8 = vadd.f32 %v2621_v63, %v2581_v4 }
 0x3af   :  { %2983 = vmatmul.f32.gmra.mxu3 %v5271_v32 }
 0x3b0   :  { %2948 = vmatmul.f32.gmra.mxu1 %v5899_v13 }
 0x3b2   :  { %v2656_v50 = vpop.f32.mrf.mxu3  ;;  %v2694_v38 = vpop.f32.mrf.mxu0 }
 0x3b3   :  { %v2657_v55 = vadd.f32 %v2656_v50, %v2616_v6  ;;  %v5449_v16 = vadd.f32 %v2694_v38, %v2654_v58 }
 0x3b5   :  { %3021 = vmatmul.f32.gmra.mxu0 %v5268_v10  ;;  %v2624_v15 = vpop.f32.mrf.mxu1 }
 0x3b6   :  { %v2625_v34 = vadd.f32 %v2624_v15, %v2584_v0 }
 0x3b7   :  { %2986 = vmatmul.f32.gmra.mxu3 %v5292_v59 }
 0x3b8   :  { %2951 = vmatmul.f32.gmra.mxu1 %v5097_v20  ;;  %v2732_v20 = vpop.f32.mrf.mxu2 }
 0x3ba   :  { %v2659_v19 = vpop.f32.mrf.mxu3  ;;  %v2697_v31 = vpop.f32.mrf.mxu0 }
 0x3bb   :  { %v2660_v4 = vadd.f32 %v2659_v19, %v2619_v37  ;;  %v5454_v39 = vadd.f32 %v2697_v31, %v2657_v55 }
 0x3bd   :  { %3024 = vmatmul.f32.gmra.mxu0 %v5288_v30  ;;  %v2767_v32 = vpop.f32.mrf.mxu1 }
 0x3be   :  { %v2768_v37 = vadd.f32 %v2767_v32, %v2727_v9 }
 0x3bf   :  { %2989 = vmatmul.f32.gmra.mxu3 %v5312_v54 }
 0x3c0   :  { %v2735_v33 = vpop.f32.mrf.mxu2 }
 0x3c2   :  { %v2662_v13 = vpop.f32.mrf.mxu3  ;;  %v2700_v23 = vpop.f32.mrf.mxu0 }
 0x3c3   :  { %v2663_v53 = vadd.f32 %v2662_v13, %v2622_v8  ;;  %v5458_v10 = vadd.f32 %v2700_v23, %v2660_v4  ;;  %v2733_v13 = vadd.f32 %v2732_v20, %v5444_v7 }
 0x3c5   :  { %3027 = vmatmul.f32.gmra.mxu0 %v5308_v25  ;;  %v2770_v59 = vpop.f32.mrf.mxu1 }
 0x3c6   :  { %v2771_v62 = vadd.f32 %v2770_v59, %v2730_v12 }
 0x3c7   :  { %2992 = vmatmul.f32.gmra.mxu3 %v5336_v18 }
 0x3c8   :  { %v2738_v3 = vpop.f32.mrf.mxu2 }
 0x3ca   :  { %v2665_v40 = vpop.f32.mrf.mxu3  ;;  %v2703_v35 = vpop.f32.mrf.mxu0 }
 0x3cb   :  { %v2666_v42 = vadd.f32 %v2665_v40, %v2625_v34  ;;  %v5462_v11 = vadd.f32 %v2703_v35, %v2663_v53 }
 0x3cd   :  { %3030 = vmatmul.f32.gmra.mxu0 %v5330_v44  ;;  %v2773_v30 = vpop.f32.mrf.mxu1 }
 0x3ce   :  { %v2774_v1 = vadd.f32 %v2773_v30, %v2733_v13 }
 0x3d0   :  { %v5468_v0 = vpop.f32.mrf.mxu2 }
 0x3d2   :  { %v2706_v54 = vpop.f32.mrf.mxu0  ;;  %v2808_v36 = vpop.f32.mrf.mxu3 }
 0x3d3   :  { %v5465_v2 = vadd.f32 %v2706_v54, %v2666_v42  ;;  %v2809_v47 = vadd.f32 %v2808_v36, %v2768_v37 }
 0x3d5   :  { %3033 = vmatmul.f32.gmra.mxu0 %v5358_v57  ;;  %v2776_v25 = vpop.f32.mrf.mxu1 }
 0x3d8   :  { %v5472_v52 = vpop.f32.mrf.mxu2 }
 0x3da   :  { %v2811_v41 = vpop.f32.mrf.mxu3  ;;  %v2849_v28 = vpop.f32.mrf.mxu0 }
 0x3db   :  { %v2812_v18 = vadd.f32 %v2811_v41, %v2771_v62  ;;  %v2850_v63 = vadd.f32 %v2849_v28, %v2809_v47  ;;  %v2736_v62 = vadd.f32 %v2735_v33, %v5449_v16 }
 0x3dd   :  { %v2779_v43 = vpop.f32.mrf.mxu1  ;;  %v2777_v42 = vadd.f32 %v2776_v25, %v2736_v62 }
 0x3e0   :  { %v5478_v45 = vpop.f32.mrf.mxu2 }
 0x3e2   :  { %v2814_v29 = vpop.f32.mrf.mxu3  ;;  %v2852_v27 = vpop.f32.mrf.mxu0 }
 0x3e3   :  { %v2853_v61 = vadd.f32 %v2852_v27, %v2812_v18  ;;  %v2815_v17 = vadd.f32 %v2814_v29, %v2774_v1  ;;  %v2739_v18 = vadd.f32 %v2738_v3, %v5454_v39  ;;  %v2742_v39 = vadd.f32 %v5468_v0, %v5458_v10 }
 0x3e5   :  { %v5470_v44 = vpop.f32.mrf.mxu1  ;;  %v2780_v29 = vadd.f32 %v2779_v43, %v2739_v18  ;;  %v3557_v18 = vld [vmem:[%s5690_s5 + $0x60] sm:$0xff] }
 0x3e8   :  { %v2890_v48 = vpop.f32.mrf.mxu2 }
 0x3e9   :  { %v2891_v38 = vadd.f32 %v2890_v48, %v2850_v63 }
 0x3ea   :  { %v2817_v21 = vpop.f32.mrf.mxu3  ;;  %v2855_v24 = vpop.f32.mrf.mxu0 }
 0x3eb   :  { %v2856_v32 = vadd.f32 %v2855_v24, %v2815_v17  ;;  %v2818_v36 = vadd.f32 %v2817_v21, %v2777_v42 }
 0x3ed   :  { %v5474_v46 = vpop.f32.mrf.mxu1 }
 0x3f0   :  { %v2893_v26 = vpop.f32.mrf.mxu2 }
 0x3f1   :  { %v2894_v48 = vadd.f32 %v2893_v26, %v2853_v61  ;;  %v2783_v61 = vadd.f32 %v5470_v44, %v2742_v39  ;;  %v2745_v44 = vadd.f32 %v5472_v52, %v5462_v11  ;;  %v2748_v11 = vadd.f32 %v5478_v45, %v5465_v2  ;;  %v3101_v39 = vld [vmem:[%s5690_s5] sm:$0xff] }
 0x3f2   :  { %v2820_v57 = vpop.f32.mrf.mxu3  ;;  %v2858_v49 = vpop.f32.mrf.mxu0 }
 0x3f3   :  { %v2859_v7 = vadd.f32 %v2858_v49, %v2818_v36  ;;  %v2821_v33 = vadd.f32 %v2820_v57, %v2780_v29  ;;  %v3556_v29 = vld [vmem:[%s5690_s5 + $0x58] sm:$0xff] }
 0x3f5   :  { %v5480_v6 = vpop.f32.mrf.mxu1 }
 0x3f8   :  { %v2896_v15 = vpop.f32.mrf.mxu2 }
 0x3f9   :  { %v2897_v54 = vadd.f32 %v2896_v15, %v2856_v32 }
 0x3fa   :  { %v5476_v22 = vpop.f32.mrf.mxu3  ;;  %v2861_v56 = vpop.f32.mrf.mxu0 }
 0x3fb   :  { %v2862_v9 = vadd.f32 %v2861_v56, %v2821_v33  ;;  %v2824_v57 = vadd.f32 %v5476_v22, %v2783_v61  ;;  %v3577_v33 = vld [vmem:[%s5690_s5 + $0xe8] sm:$0xff]  ;;  %v3575_v61 = vld [vmem:[%s5690_s5 + $0xd8] sm:$0xff] }
 0x3fd   :  { %v2931_v60 = vpop.f32.mrf.mxu1 }
 0x3fe   :  { %v2932_v55 = vadd.f32 %v2931_v60, %v2891_v38 }
 0x400   :  { %v2899_v40 = vpop.f32.mrf.mxu2 }
 0x401   :  { %v2900_v60 = vadd.f32 %v2899_v40, %v2859_v7 }
 0x402   :  { %v5482_v5 = vpop.f32.mrf.mxu3  ;;  %v5484_v51 = vpop.f32.mrf.mxu0 }
 0x403   :  { %v2865_v10 = vadd.f32 %v5484_v51, %v2824_v57 }
 0x405   :  { %v2934_v58 = vpop.f32.mrf.mxu1 }
 0x406   :  { %v2935_v25 = vadd.f32 %v2934_v58, %v2894_v48  ;;  %v3554_v48 = vld [vmem:[%s5690_s5 + $0x48] sm:$0xff] }
 0x408   :  { %v2902_v24 = vpop.f32.mrf.mxu2 }
 0x409   :  { %v2903_v26 = vadd.f32 %v2902_v24, %v2862_v9  ;;  %v3555_v24 = vld [vmem:[%s5690_s5 + $0x50] sm:$0xff]  ;;  %v3105_v9 = vld [vmem:[%s5690_s5 + $0x20] sm:$0xff] }
 0x40a   :  { %v5486_v14 = vpop.f32.mrf.mxu3  ;;  %v5488_v12 = vpop.f32.mrf.mxu0 }
 0x40d   :  { %v2937_v34 = vpop.f32.mrf.mxu1 }
 0x40e   :  { %v2938_v41 = vadd.f32 %v2937_v34, %v2897_v54  ;;  %v2786_v34 = vadd.f32 %v5474_v46, %v2745_v44  ;;  %v2789_v46 = vadd.f32 %v5480_v6, %v2748_v11  ;;  %v3239_v11 = vld [vmem:[%s5692_s7 + $0x10] sm:$0xff] }
 0x410   :  { %v2905_v56 = vpop.f32.mrf.mxu2  ;;  %v2827_v22 = vadd.f32 %v5482_v5, %v2786_v34  ;;  %v2830_v5 = vadd.f32 %v5486_v14, %v2789_v46  ;;  %v3560_v14 = vld [vmem:[%s5690_s5 + $0x78] sm:$0xff] }
 0x411   :  { %3130 = vmatpush.msra.mxu2 %v3560_v14 }
 0x412   :  { %v5492_v8 = vpop.f32.mrf.mxu0  ;;  %v2972_v50 = vpop.f32.mrf.mxu3  ;;  %v2868_v51 = vadd.f32 %v5488_v12, %v2827_v22 }
 0x413   :  { %v2973_v19 = vadd.f32 %v2972_v50, %v2932_v55  ;;  %v2871_v12 = vadd.f32 %v5492_v8, %v2830_v5  ;;  %v3559_v8 = vld [vmem:[%s5690_s5 + $0x70] sm:$0xff]  ;;  %v3568_v5 = vld [vmem:[%s5690_s5 + $0xa8] sm:$0xff] }
 0x414   :  { %3131 = vmatpush.msra.mxu2 %v3559_v8 }
 0x415   :  { %v2940_v35 = vpop.f32.mrf.mxu1 }
 0x416   :  { %v2941_v21 = vadd.f32 %v2940_v35, %v2900_v60  ;;  %v3553_v60 = vld [vmem:[%s5690_s5 + $0x40] sm:$0xff] }
 0x41a   :  { %v2975_v31 = vpop.f32.mrf.mxu3  ;;  %v3013_v4 = vpop.f32.mrf.mxu0 }
 0x41b   :  { %v5495_v23 = vadd.f32 %v3013_v4, %v2973_v19  ;;  %v2976_v49 = vadd.f32 %v2975_v31, %v2935_v25  ;;  %v2906_v19 = vadd.f32 %v2905_v56, %v2865_v10  ;;  %v2908_v4 = vpop.f32.mrf.mxu2  ;;  %v3107_v25 = vld [vmem:[%s5690_s5 + $0x30] sm:$0xff] }
 0x41d   :  { %3045 = vrot.lane.b32.xlu2 %v5495_v23, %s3825_s2  ;;  %v2943_v16 = vpop.f32.mrf.mxu1 }
 0x41e   :  { %v2944_v58 = vadd.f32 %v2943_v16, %v2903_v26  ;;  %v3108_v16 = vld [vmem:[%s5690_s5 + $0x38] sm:$0xff]  ;;  %v3574_v26 = vld [vmem:[%s5690_s5 + $0xd0] sm:$0xff] }
 0x422   :  { %v2978_v53 = vpop.f32.mrf.mxu3  ;;  %v3016_v59 = vpop.f32.mrf.mxu0 }
 0x423   :  { %v2979_v20 = vadd.f32 %v2978_v53, %v2938_v41  ;;  %v5507_v3 = vadd.f32 %v3016_v59, %v2976_v49  ;;  %v2909_v53 = vadd.f32 %v2908_v4, %v2868_v51  ;;  %v2911_v42 = vpop.f32.mrf.mxu2  ;;  %v3104_v49 = vld [vmem:[%s5690_s5 + $0x18] sm:$0xff] }
 0x424   :  { %v2912_v45 = vadd.f32 %v2911_v42, %v2871_v12 }
 0x425   :  { %v2946_v50 = vpop.f32.mrf.mxu1 }
 0x426   :  { %v2947_v31 = vadd.f32 %v2946_v50, %v2906_v19  ;;  %v3759_v50 = vld [vmem:[%s5689_s4] ss:$0 sm:$0xff] }
 0x42a   :  { %v2981_v28 = vpop.f32.mrf.mxu3  ;;  %v3019_v30 = vpop.f32.mrf.mxu0 }
 0x42b   :  { %v5501_v27 = vadd.f32 %v3019_v30, %v2979_v20  ;;  %v2982_v37 = vadd.f32 %v2981_v28, %v2941_v21  ;;  %v3579_v20 = vld [vmem:[%s5690_s5 + $0xf8] sm:$0xff]  ;;  %v3558_v28 = vld [vmem:[%s5690_s5 + $0x68] sm:$0xff]  ;;  %v3578_v30 = vld [vmem:[%s5690_s5 + $0xf0] sm:$0xff] }
 0x42c   :  { %3218 = vmatpush.msrb.mxu1 %v3579_v20  ;;  %3132 = vmatpush.msra.mxu2 %v3558_v28  ;;  %v3106_v21 = vld [vmem:[%s5690_s5 + $0x28] sm:$0xff] }
 0x42d   :  { %3049 = vrot.lane.b32.xlu0 %v5501_v27, %s3825_s2  ;;  %v2949_v1 = vpop.f32.mrf.mxu1 }
 0x42e   :  { %v2950_v59 = vadd.f32 %v2949_v1, %v2909_v53  ;;  %3219 = vmatpush.msrb.mxu1 %v3578_v30  ;;  %3133 = vmatpush.msra.mxu2 %v3557_v18  ;;  %v3572_v1 = vld [vmem:[%s5690_s5 + $0xc0] sm:$0xff] }
 0x430   :  { %3134 = vmatpush.msra.mxu2 %v3556_v29  ;;  %3220 = vmatpush.msrb.mxu1 %v3577_v33 }
 0x432   :  { %v2984_v47 = vpop.f32.mrf.mxu3  ;;  %v3022_v63 = vpop.f32.mrf.mxu0  ;;  %3135 = vmatpush.msra.mxu2 %v3555_v24 }
 0x433   :  { %v5509_v43 = vadd.f32 %v3022_v63, %v2982_v37  ;;  %v2985_v0 = vadd.f32 %v2984_v47, %v2944_v58  ;;  %v3103_v37 = vld [vmem:[%s5690_s5 + $0x10] sm:$0xff]  ;;  %v3576_v47 = vld [vmem:[%s5690_s5 + $0xe0] sm:$0xff]  ;;  %v3102_v63 = vld [vmem:[%s5690_s5 + $0x8] sm:$0xff] }
 0x434   :  { %3136 = vmatpush.msra.mxu2 %v3554_v48  ;;  %3221 = vmatpush.msrb.mxu1 %v3576_v47  ;;  %v3573_v58 = vld [vmem:[%s5690_s5 + $0xc8] sm:$0xff] }
 0x435   :  { %3051 = vrot.lane.b32.xlu1 %v5509_v43, %s3825_s2  ;;  %3047 = vrot.lane.b32.xlu0 %v5507_v3, %s3825_s2  ;;  %v2952_v2 = vpop.f32.mrf.mxu1 }
 0x436   :  { %v2953_v54 = vadd.f32 %v2952_v2, %v2912_v45  ;;  %3137 = vmatpush.msra.mxu2 %v3553_v60  ;;  %3222 = vmatpush.msrb.mxu1 %v3575_v61  ;;  %v3565_v45 = vld [vmem:[%s5690_s5 + $0x90] sm:$0xff]  ;;  %v3238_v60 = vld [vmem:[%s5692_s7 + $0x8] sm:$0xff]  ;;  %v3270_v61 = vld [vmem:[%s5694_s9] sm:$0xff] }
 0x438   :  { %3153 = vmatpush.msrb.mxu2 %v3108_v16  ;;  %3223 = vmatpush.msrb.mxu1 %v3574_v26  ;;  %v3237_v16 = vld [vmem:[%s5692_s7] sm:$0xff] }
 0x439   :  { %v3761_v26 = vld [vmem:[%s5693_s8] ss:$0 sm:$0xff] }
 0x43a   :  { %v2987_v38 = vpop.f32.mrf.mxu3  ;;  %v3025_v55 = vpop.f32.mrf.mxu0  ;;  %3154 = vmatpush.msrb.mxu2 %v3107_v25  ;;  %3224 = vmatpush.msrb.mxu1 %v3573_v58 }
 0x43b   :  { %v5520_v15 = vadd.f32 %v3025_v55, %v2985_v0  ;;  %v2988_v13 = vadd.f32 %v2987_v38, %v2947_v31 }
 0x43c   :  { %3155 = vmatpush.msrb.mxu2 %v3106_v21  ;;  %3225 = vmatpush.msrb.mxu1 %v3572_v1 }
 0x43d   :  { %3053 = vrot.lane.b32.xlu1 %v5520_v15, %s3825_s2 }
 0x43e   :  { %3156 = vmatpush.msrb.mxu2 %v3105_v9 }
 0x440   :  { %3157 = vmatpush.msrb.mxu2 %v3104_v49  ;;  %v3760_v49 = vld [vmem:[%s5691_s6] ss:$0 sm:$0xff] }
 0x442   :  { %v3028_v17 = vpop.f32.mrf.mxu0  ;;  %v2990_v32 = vpop.f32.mrf.mxu3  ;;  %3158 = vmatpush.msrb.mxu2 %v3103_v37 }
 0x443   :  { %v5529_v52 = vadd.f32 %v3028_v17, %v2988_v13  ;;  %v2991_v62 = vadd.f32 %v2990_v32, %v2950_v59  ;;  %v3570_v13 = vld [vmem:[%s5690_s5 + $0xb8] sm:$0xff] }
 0x444   :  { %3159 = vmatpush.msrb.mxu2 %v3102_v63 }
 0x445   :  { %3055 = vrot.lane.b32.xlu2 %v5529_v52, %s3825_s2 }
 0x446   :  { %3160 = vmatpush.msrb.mxu2 %v3101_v39 }
 0x44a   :  { %v3031_v40 = vpop.f32.mrf.mxu0  ;;  %v2993_v6 = vpop.f32.mrf.mxu3 }
 0x44b   :  { %v5536_v35 = vadd.f32 %v3031_v40, %v2991_v62  ;;  %v2994_v36 = vadd.f32 %v2993_v6, %v2953_v54  ;;  %v3567_v62 = vld [vmem:[%s5690_s5 + $0xa0] sm:$0xff]  ;;  %v3564_v6 = vld [vmem:[%s5690_s5 + $0x88] sm:$0xff] }
 0x44d   :  { %3057 = vrot.lane.b32.xlu0 %v5536_v35, %s3825_s2 }
 0x452   :  { %v3034_v41 = vpop.f32.mrf.mxu0 }
 0x453   :  { %v5540_v7 = vadd.f32 %v3034_v41, %v2994_v36  ;;  %v3563_v36 = vld [vmem:[%s5690_s5 + $0x80] sm:$0xff] }
 0x455   :  { %3059 = vrot.lane.b32.xlu1 %v5540_v7, %s3825_s2 }
 0x477   :  { %v3046_v44 = vpop.permute.xlu2 %3045 }
 0x49f   :  { %v3050_v57 = vpop.permute.xlu0 %3049  ;;  %v3056_v32 = vpop.permute.xlu2 %3055 }
 0x4a0   :  { %v3071_v56 = vmax.f32 %v5501_v27, %v3050_v57  ;;  %v3069_v27 = vmax.f32 %v5495_v23, %v3046_v44  ;;  %v3569_v23 = vld [vmem:[%s5690_s5 + $0xb0] sm:$0xff]  ;;  %v3074_v12 = vmax.f32 %v5529_v52, %v3056_v32 }
 0x4a2   :  { %v3083_v38 = vadd.f32 %v3759_v50, %v3071_v56  ;;  %v3081_v17 = vadd.f32 %v3759_v50, %v3069_v27  ;;  %v3086_v2 = vadd.f32 %v3759_v50, %v3074_v12 }
 0x4a4   :  { %v3091_v22 = vmax.f32 %v3083_v38, 0.0  ;;  %v3089_v59 = vmax.f32 %v3081_v17, 0.0  ;;  %v3094_v54 = vmax.f32 %v3086_v2, 0.0 }
 0x4a7   :  { %v3052_v10 = vpop.permute.xlu1 %3051  ;;  %v3048_v0 = vpop.permute.xlu0 %3047 }
 0x4a8   :  { %v3072_v55 = vmax.f32 %v5509_v43, %v3052_v10  ;;  %v3070_v19 = vmax.f32 %v5507_v3, %v3048_v0  ;;  %v3240_v3 = vld [vmem:[%s5692_s7 + $0x18] sm:$0xff] }
 0x4a9   :  { %3261 = vmatpush.msrb.mxu3 %v3240_v3 }
 0x4aa   :  { %v3084_v34 = vadd.f32 %v3759_v50, %v3072_v55  ;;  %v3082_v51 = vadd.f32 %v3759_v50, %v3070_v19 }
 0x4ab   :  { %3262 = vmatpush.msrb.mxu3 %v3239_v11 }
 0x4ac   :  { %v3092_v31 = vmax.f32 %v3084_v34, 0.0  ;;  %v3090_v46 = vmax.f32 %v3082_v51, 0.0 }
 0x4ad   :  { %3263 = vmatpush.msrb.mxu3 %v3238_v60 }
 0x4ae   :  { %v3098_v4 = vmax.f32 %v3091_v22, %v3092_v31  ;;  %v3097_v40 = vmax.f32 %v3089_v59, %v3090_v46 }
 0x4af   :  { %v3054_v43 = vpop.permute.xlu1 %3053  ;;  %3264 = vmatpush.msrb.mxu3 %v3237_v16 }
 0x4b0   :  { %3561 = vmatmul.msk.f32.vlgmr.msra.gmra.mxu2 %vm3118_vm6, %v3098_v4  ;;  %v3073_v53 = vmax.f32 %v5520_v15, %v3054_v43  ;;  %v3566_v15 = vld [vmem:[%s5690_s5 + $0x98] sm:$0xff] }
 0x4b1   :  { %3185 = vmatpush.msra.mxu2 %v3570_v13 }
 0x4b2   :  { %v3085_v42 = vadd.f32 %v3759_v50, %v3073_v53 }
 0x4b3   :  { %3186 = vmatpush.msra.mxu2 %v3569_v23 }
 0x4b4   :  { %v3093_v52 = vmax.f32 %v3085_v42, 0.0 }
 0x4b5   :  { %3187 = vmatpush.msra.mxu2 %v3568_v5 }
 0x4b6   :  { %v3099_v41 = vmax.f32 %v3093_v52, %v3094_v54 }
 0x4b7   :  { %3188 = vmatpush.msra.mxu2 %v3567_v62 }
 0x4b8   :  { %3562 = vmatmul.msk.f32.vlgmr.msrb.gmra.mxu2 %vm3118_vm6, %v3097_v40 }
 0x4b9   :  { %3189 = vmatpush.msra.mxu2 %v3566_v15 }
 0x4bb   :  { %3190 = vmatpush.msra.mxu2 %v3565_v45 }
 0x4bd   :  { %3191 = vmatpush.msra.mxu2 %v3564_v6 }
 0x4bf   :  { %3192 = vmatpush.msra.mxu2 %v3563_v36  ;;  %v3058_v14 = vpop.permute.xlu0 %3057 }
 0x4c0   :  { %3571 = vmatmul.msk.f32.vlgmr.msra.gmra.mxu2 %vm3118_vm6, %v3099_v41  ;;  %v3075_v8 = vmax.f32 %v5536_v35, %v3058_v14  ;;  %v3271_v35 = vld [vmem:[%s5694_s9 + $0x8] sm:$0xff] }
 0x4c1   :  { %3294 = vmatpush.msrb.mxu2 %v3271_v35 }
 0x4c2   :  { %v3087_v28 = vadd.f32 %v3759_v50, %v3075_v8 }
 0x4c3   :  { %3295 = vmatpush.msrb.mxu2 %v3270_v61 }
 0x4c4   :  { %v3095_v29 = vmax.f32 %v3087_v28, 0.0 }
 0x4c7   :  { %v3060_v20 = vpop.permute.xlu1 %3059 }
 0x4c8   :  { %v3076_v30 = vmax.f32 %v5540_v7, %v3060_v20 }
 0x4ca   :  { %v3088_v18 = vadd.f32 %v3759_v50, %v3076_v30  ;;  %v3762_v50 = vld [vmem:[%s5695_s10] ss:$0 sm:$0xff] }
 0x4cc   :  { %v3096_v24 = vmax.f32 %v3088_v18, 0.0 }
 0x4ce   :  { %v3100_v48 = vmax.f32 %v3095_v29, %v3096_v24 }
 0x4d0   :  { %3580 = vmatmul.msk.f32.vlgmr.msrb.gmra.mxu1 %vm3118_vm6, %v3100_v48 }
 0x533   :  { %v3139_v7 = vpop.f32.mrf.mxu2 }
 0x53b   :  { %v3162_v33 = vpop.f32.mrf.mxu2 }
 0x53c   :  { %v3163_v21 = vadd.f32 %v3162_v33, %v3139_v7 }
 0x543   :  { %v3194_v25 = vpop.f32.mrf.mxu2 }
 0x544   :  { %v3197_v9 = vadd.f32 %v3194_v25, %v3163_v21 }
 0x54d   :  { %v3227_v37 = vpop.f32.mrf.mxu1 }
 0x54e   :  { %v3230_v47 = vadd.f32 %v3227_v37, %v3197_v9 }
 0x550   :  { %v3235_v63 = vadd.f32 %v3760_v49, %v3230_v47 }
 0x552   :  { %v3236_v39 = vmax.f32 %v3235_v63, 0.0 }
 0x554   :  { %3581 = vmatmul.msk.f32.vlgmr.msrb.gmra.mxu3 %vm3245_vm7, %v3236_v39 }
 0x5d7   :  { %v3266_v57 = vpop.f32.mrf.mxu3 }
 0x5d8   :  { %v3267_v56 = vadd.f32 %v3761_v26, %v3266_v57 }
 0x5da   :  { %v3269_v58 = vmax.f32 %v3267_v56, 0.0 }
 0x5dc   :  { %3582 = vmatmul.msk.f32.vlgmr.msrb.gmra.mxu2 %vm3276_vm8, %v3269_v58 }
 0x65f   :  { %v3297_v10 = vpop.f32.mrf.mxu2 }
 0x660   :  { %v3298_v0 = vadd.f32 %v3762_v50, %v3297_v10 }
 0x662   :  { %3300 = vst [vmem:[%s5696_s11] sm:$0xff] %v3298_v0 }
 0x663   :  { %3305 = vsyncpa [#allocation3], 1 }
 0x664   :  { %3306 = vsyncpa [#allocation5], 1 }

</bundles_post_ra>
